<compile_context>
chip_gen: v7x
topology: tpu7x:2x2x1
jax: 0.10.0
libtpu: 0.0.40
codegen_flags: <defaults>
</compile_context>

<pallas_src>
import functools

import jax
import jax.numpy as jnp
from jax import lax
from jax.experimental import pallas as pl
from jax.experimental.pallas import tpu as pltpu

# ---- synthetic config (mirrors metrabs FLAGS defaults; eval mode) ----
DEPTH = 8              # FLAGS.depth
PROC_SIDE = 256        # FLAGS.proc_side
STRIDE = 32            # FLAGS.stride_test (self.training == False)
CENTERED_STRIDE = True
BOX_SIZE_MM = 2200.0   # FLAGS.box_size_m * 1000

_LANES = 128


def _image_constants():
    last_image_pixel = PROC_SIDE - 1
    lrc = float(last_image_pixel - last_image_pixel % STRIDE)   # last receptive center
    off = float(STRIDE // 2) if CENTERED_STRIDE else 0.0
    return lrc, off


def _round_up(x, m):
    return (x + m - 1) // m * m


def _pick_tb(b, tb_max=8):
    """Batch-tile size: largest divisor of b <= tb_max that keeps >= 2 grid steps."""
    cands = [t for t in range(1, tb_max + 1) if b % t == 0 and b // t >= 2]
    if not cands:
        cands = [t for t in range(1, tb_max + 1) if b % t == 0]
    return max(cands)


def metrabs_heads_kernel(x_ref, w_ref, b_ref, r_ref, out_ref, *,
                         TB, D, JP, x_img_scale, y_img_scale):
    """Fused 1x1 conv + 2D/3D soft-argmax heads for a tile of TB images.

    x_ref:   (TB, C, HW)  bf16  NCHW activations (free reshape, no transpose)
    w_ref:   (OP, C)      bf16  conv_final weight, regrouped/padded; OP = (D+1)*JP
                                group 0   -> 2D head (J real cols, padded to JP)
                                group 1+d -> 3D head depth slice d
    b_ref:   (OP, 1)      f32   conv_final bias, same layout
    r_ref:   (8, HW)      f32   reduction rows: [ones; ix; iy; 0; ...]
    out_ref: (TB, 8, JP)  f32   rows 0-1: coords2d (x, y); rows 2-4: coords3d (x, y, z)
    """
    _, off = _image_constants()
    xy_scale = BOX_SIZE_MM / PROC_SIDE
    z_w = [(float(d) / float(D - 1)) if D > 1 else 0.0 for d in range(D)]

    w = w_ref[...]         # resident across the grid (constant index_map)
    bias = b_ref[...]
    r = r_ref[...]

    for t in range(TB):    # static unroll over the batch tile
        x_t = x_ref[t]     # (C, HW) bf16

        # 1x1 conv == (OP, C) @ (C, HW) on the MXU; logits come out channel-major.
        logits = lax.dot_general(
            w, x_t, dimension_numbers=(((1,), (0,)), ((), ())),
            preferred_element_type=jnp.float32) + bias            # (OP, HW) f32

        # Per output-channel max over the HW pixels (one lane reduction).
        cmax = jnp.max(logits, axis=1, keepdims=True)             # (OP, 1)
        m2 = cmax[:JP, :]                                         # 2D head group
        m3 = cmax[JP:2 * JP, :]                                   # per-joint max over depth
        for d in range(1, D):
            m3 = jnp.maximum(m3, cmax[(1 + d) * JP:(2 + d) * JP, :])
        sub = jnp.concatenate([m2] + [m3] * D, axis=0)            # (OP, 1)

        # Single full-width exp pass over the whole slab (2D + all depth groups).
        e = jnp.exp(logits - sub)                                 # (OP, HW) f32

        # [ones; ix; iy] @ e^T on the MXU (trans-B dot):
        #   row 0 = sum(e), row 1 = sum(e*ix), row 2 = sum(e*iy)  for every column.
        s = lax.dot_general(
            r, e, dimension_numbers=(((1,), (1,)), ((), ())),
            preferred_element_type=jnp.float32)                   # (8, OP)

        # ---------------- 2D head (heatmap_to_image) ----------------
        s2 = s[:, :JP]
        inv_z2 = 1.0 / s2[0:1, :]
        cx2 = s2[1:2, :] * inv_z2 * x_img_scale + off
        cy2 = s2[2:3, :] * inv_z2 * y_img_scale + off

        # ------- 3D head: fold the D depth groups (full-128-lane slices) -------
        acc = s[:, JP:2 * JP]
        accz = jnp.zeros((1, JP), jnp.float32)                    # depth weight of d=0 is 0
        for d in range(1, D):
            sd = s[:, (1 + d) * JP:(2 + d) * JP]
            acc = acc + sd
            accz = accz + z_w[d] * sd[0:1, :]
        inv_z3 = 1.0 / acc[0:1, :]
        cx3 = (acc[1:2, :] * inv_z3 * x_img_scale + off) * xy_scale   # heatmap_to_metric
        cy3 = (acc[2:3, :] * inv_z3 * y_img_scale + off) * xy_scale
        cz3 = accz * inv_z3 * BOX_SIZE_MM

        # One lane-dense (8, JP) store per image.
        out_ref[t] = jnp.concatenate(
            [cx2, cy2, cx3, cy3, cz3, jnp.zeros((3, JP), jnp.float32)], axis=0)


def metrabs_heads(inp_nchw, weight, bias, *, n_points, depth=DEPTH):
    """inp_nchw: (B, C, H, W); weight: (O, C) (PyTorch (O, C, 1, 1) squeezed); bias: (O,)."""
    B, C, H, W = inp_nchw.shape
    J, D = n_points, depth
    O = J + D * J
    assert weight.shape == (O, C) and bias.shape == (O,)
    HW = H * W
    JP = _round_up(J, _LANES)       # pad every joint group to a full 128-lane block
    OP = (D + 1) * JP               # group 0: 2D head, groups 1..D: 3D depth slices

    # Activations: free reshape of NCHW (no HBM transpose pass), bf16 halves DMA traffic.
    x = inp_nchw.reshape(B, C, HW).astype(jnp.bfloat16)

    # conv_final weight (O, C): regroup rows into the padded (OP, C) layout (no transpose).
    w_f = weight.astype(jnp.float32)
    w2 = jnp.pad(w_f[:J], ((0, JP - J), (0, 0)))                              # (JP, C)
    w3 = jnp.pad(w_f[J:].reshape(D, J, C), ((0, 0), (0, JP - J), (0, 0)))     # (D, JP, C)
    w_p = jnp.concatenate([w2[None], w3], axis=0).reshape(OP, C).astype(jnp.bfloat16)

    b_f = bias.astype(jnp.float32)
    b2 = jnp.pad(b_f[:J], (0, JP - J))
    b3 = jnp.pad(b_f[J:].reshape(D, J), ((0, 0), (0, JP - J)))
    b_p = jnp.concatenate([b2[None], b3], axis=0).reshape(OP, 1)

    # Reduction rows consumed by a single MXU matmul: [ones; ix; iy] with integer pixel
    # coordinates (exact); the 1/(W-1), 1/(H-1) normalization is folded into the final
    # f32 affine inside the kernel.
    p = jnp.arange(HW, dtype=jnp.int32)
    ix = (p % W).astype(jnp.float32)
    iy = (p // W).astype(jnp.float32)
    r = jnp.zeros((8, HW), jnp.float32).at[0].set(1.0).at[1].set(ix).at[2].set(iy)

    lrc, _ = _image_constants()
    x_img_scale = lrc / float(max(W - 1, 1))
    y_img_scale = lrc / float(max(H - 1, 1))

    TB = _pick_tb(B)
    kernel = functools.partial(metrabs_heads_kernel, TB=TB, D=D, JP=JP,
                               x_img_scale=x_img_scale, y_img_scale=y_img_scale)

    out = pl.pallas_call(
        kernel,
        out_shape=jax.ShapeDtypeStruct((B, 8, JP), jnp.float32),
        grid=(B // TB,),
        in_specs=[
            pl.BlockSpec((TB, C, HW), lambda bi: (bi, 0, 0)),   # per-step batch tile
            pl.BlockSpec((OP, C), lambda bi: (0, 0)),           # weight: DMA'd once, resident
            pl.BlockSpec((OP, 1), lambda bi: (0, 0)),
            pl.BlockSpec((8, HW), lambda bi: (0, 0)),
        ],
        out_specs=pl.BlockSpec((TB, 8, JP), lambda bi: (bi, 0, 0)),
        compiler_params=pltpu.CompilerParams(
            dimension_semantics=("parallel",),
            vmem_limit_bytes=32 * 1024 * 1024,
        ),
    )(x, w_p, b_p, r)

    coords2d_pred = jnp.transpose(out[:, 0:2, :J], (0, 2, 1))       # (B, J, 2)
    coords3d_rel_pred = jnp.transpose(out[:, 2:5, :J], (0, 2, 1))   # (B, J, 3)
    return coords2d_pred, coords3d_rel_pred


# ----------------------------- pure-JAX reference -----------------------------
def _soft_argmax_ref(t, dims):
    m = jnp.max(t, axis=dims, keepdims=True)
    e = jnp.exp(t - m)
    prob = e / jnp.sum(e, axis=dims, keepdims=True)
    coords = []
    for d in dims:
        n = t.shape[d]
        lin = jnp.linspace(0.0, 1.0, n)
        shape = [1] * t.ndim
        shape[d] = n
        coords.append(jnp.sum(prob * lin.reshape(shape), axis=dims))
    return jnp.stack(coords, axis=-1)


def metrabs_heads_reference(inp, weight, bias, n_points, depth):
    B, C, H, W = inp.shape
    J, D = n_points, depth
    # Conv in bf16 with f32 accumulation, matching the kernel's storage choice.
    x = jnp.einsum('bchw,oc->bohw', inp.astype(jnp.bfloat16), weight.astype(jnp.bfloat16),
                   preferred_element_type=jnp.float32) + bias[None, :, None, None]
    logits2d = x[:, :J]
    logits3d = x[:, J:].reshape(B, D, J, H, W)
    coords3d = _soft_argmax_ref(logits3d, (4, 3, 1))     # (B, J, 3): x, y, z
    coords2d = _soft_argmax_ref(logits2d, (3, 2))        # (B, J, 2): x, y
    lrc, off = _image_constants()
    coords2d_pred = coords2d * lrc + off
    c3xy = (coords3d[..., :2] * lrc + off) * BOX_SIZE_MM / PROC_SIDE
    c3z = coords3d[..., 2:] * BOX_SIZE_MM
    return coords2d_pred, jnp.concatenate([c3xy, c3z], axis=-1)


if __name__ == "__main__":
    key = jax.random.PRNGKey(0)
    B, C, H, W = 2, 32, 8, 8            # backbone feature map (proc_side/stride = 8)
    J = 8                                # n_points
    D = DEPTH
    O = J + D * J                        # conv_final out channels = 72

    k1, k2, k3 = jax.random.split(key, 3)
    inp = jax.random.normal(k1, (B, C, H, W), jnp.float32)
    weight = jax.random.normal(k2, (O, C), jnp.float32) * 0.1   # conv (O, C, 1, 1) squeezed
    bias = jax.random.normal(k3, (O,), jnp.float32) * 0.01

    c2, c3 = metrabs_heads(inp, weight, bias, n_points=J, depth=D)
    jax.block_until_ready((c2, c3))

    r2, r3 = metrabs_heads_reference(inp, weight, bias, J, D)
    assert c2.shape == (B, J, 2) and c3.shape == (B, J, 3)
    assert jnp.allclose(c2, r2, rtol=2e-3, atol=0.25), "coords2d mismatch"
    assert jnp.allclose(c3, r3, rtol=2e-3, atol=0.25), "coords3d mismatch"
    print("KERNEL_OK")
</pallas_src>

<mosaic_0001>
module attributes {stable_mosaic.version = 11 : i64} {
  func.func @metrabs_heads_kernel(%arg0: i32, %arg1: memref<1x32x64xbf16, #tpu.memory_space<vmem>>, %arg2: memref<1152x32xbf16, #tpu.memory_space<vmem>>, %arg3: memref<1152x1xf32, #tpu.memory_space<vmem>>, %arg4: memref<8x64xf32, #tpu.memory_space<vmem>>, %arg5: memref<1x8x128xf32, #tpu.memory_space<vmem>>) attributes {dimension_semantics = [#tpu.dimension_semantics<parallel>], iteration_bounds = array<i64: 2>, scalar_prefetch = 0 : i64, scratch_operands = 0 : i64, tpu.core_type = #tpu.core_type<tc>, window_params = [{transform_indices = @transform_0, window_bounds = array<i64: 1, 32, 64>}, {pipeline_mode = #tpu.pipeline_mode<synchronous>, transform_indices = @transform_1, window_bounds = array<i64: 1152, 32>}, {pipeline_mode = #tpu.pipeline_mode<synchronous>, transform_indices = @transform_2, window_bounds = array<i64: 1152, 1>}, {pipeline_mode = #tpu.pipeline_mode<synchronous>, transform_indices = @transform_3, window_bounds = array<i64: 8, 64>}, {transform_indices = @transform_4, window_bounds = array<i64: 1, 8, 128>}]} {
    %c0 = arith.constant 0 : index
    %c0_0 = arith.constant 0 : index
    %0 = vector.load %arg2[%c0, %c0_0] : memref<1152x32xbf16, #tpu.memory_space<vmem>>, vector<1152x32xbf16>
    %c0_1 = arith.constant 0 : index
    %c0_2 = arith.constant 0 : index
    %1 = vector.load %arg3[%c0_1, %c0_2] : memref<1152x1xf32, #tpu.memory_space<vmem>>, vector<1152x1xf32>
    %c0_3 = arith.constant 0 : index
    %c0_4 = arith.constant 0 : index
    %2 = vector.load %arg4[%c0_3, %c0_4] : memref<8x64xf32, #tpu.memory_space<vmem>>, vector<8x64xf32>
    %c0_5 = arith.constant 0 : index
    %c0_6 = arith.constant 0 : index
    %c0_7 = arith.constant 0 : index
    %3 = vector.load %arg1[%c0_5, %c0_6, %c0_7] : memref<1x32x64xbf16, #tpu.memory_space<vmem>>, vector<1x32x64xbf16>
    %4 = vector.shape_cast %3 : vector<1x32x64xbf16> to vector<32x64xbf16>
    %cst = arith.constant dense<0.000000e+00> : vector<1152x64xf32>
    %5 = tpu.matmul %0, %4, %cst {dimension_numbers = #tpu.dot_dimension_numbers<[1], [0], [0], [1], [0, 0, 1, 1], [], []>} : vector<1152x32xbf16>, vector<32x64xbf16>, vector<1152x64xf32> -> vector<1152x64xf32>
    %6 = vector.broadcast %1 : vector<1152x1xf32> to vector<1152x64xf32>
    %7 = arith.addf %5, %6 : vector<1152x64xf32>
    %cst_8 = arith.constant dense<0xFF800000> : vector<1152xf32>
    %8 = vector.multi_reduction <maximumf>, %7, %cst_8 [1] : vector<1152x64xf32> to vector<1152xf32>
    %9 = vector.shape_cast %8 : vector<1152xf32> to vector<1152x1xf32>
    %10 = vector.extract_strided_slice %9 {offsets = [0, 0], sizes = [128, 1], strides = [1, 1]} : vector<1152x1xf32> to vector<128x1xf32>
    %11 = vector.extract_strided_slice %9 {offsets = [128, 0], sizes = [128, 1], strides = [1, 1]} : vector<1152x1xf32> to vector<128x1xf32>
    %12 = vector.extract_strided_slice %9 {offsets = [256, 0], sizes = [128, 1], strides = [1, 1]} : vector<1152x1xf32> to vector<128x1xf32>
    %13 = arith.maximumf %11, %12 : vector<128x1xf32>
    %14 = vector.extract_strided_slice %9 {offsets = [384, 0], sizes = [128, 1], strides = [1, 1]} : vector<1152x1xf32> to vector<128x1xf32>
    %15 = arith.maximumf %13, %14 : vector<128x1xf32>
    %16 = vector.extract_strided_slice %9 {offsets = [512, 0], sizes = [128, 1], strides = [1, 1]} : vector<1152x1xf32> to vector<128x1xf32>
    %17 = arith.maximumf %15, %16 : vector<128x1xf32>
    %18 = vector.extract_strided_slice %9 {offsets = [640, 0], sizes = [128, 1], strides = [1, 1]} : vector<1152x1xf32> to vector<128x1xf32>
    %19 = arith.maximumf %17, %18 : vector<128x1xf32>
    %20 = vector.extract_strided_slice %9 {offsets = [768, 0], sizes = [128, 1], strides = [1, 1]} : vector<1152x1xf32> to vector<128x1xf32>
    %21 = arith.maximumf %19, %20 : vector<128x1xf32>
    %22 = vector.extract_strided_slice %9 {offsets = [896, 0], sizes = [128, 1], strides = [1, 1]} : vector<1152x1xf32> to vector<128x1xf32>
    %23 = arith.maximumf %21, %22 : vector<128x1xf32>
    %24 = vector.extract_strided_slice %9 {offsets = [1024, 0], sizes = [128, 1], strides = [1, 1]} : vector<1152x1xf32> to vector<128x1xf32>
    %25 = arith.maximumf %23, %24 : vector<128x1xf32>
    %26 = tpu.concatenate %10, %25, %25, %25, %25, %25, %25, %25, %25 in 0 : vector<128x1xf32>, vector<128x1xf32>, vector<128x1xf32>, vector<128x1xf32>, vector<128x1xf32>, vector<128x1xf32>, vector<128x1xf32>, vector<128x1xf32>, vector<128x1xf32> -> vector<1152x1xf32>
    %27 = vector.broadcast %26 : vector<1152x1xf32> to vector<1152x64xf32>
    %28 = arith.subf %7, %27 : vector<1152x64xf32>
    %29 = math.exp %28 : vector<1152x64xf32>
    %cst_9 = arith.constant dense<0.000000e+00> : vector<8x1152xf32>
    %30 = tpu.matmul %2, %29, %cst_9 {dimension_numbers = #tpu.dot_dimension_numbers<[1], [1], [0], [0], [0, 0, 1, 0], [], []>} : vector<8x64xf32>, vector<1152x64xf32>, vector<8x1152xf32> -> vector<8x1152xf32>
    %31 = vector.extract_strided_slice %30 {offsets = [0, 0], sizes = [8, 128], strides = [1, 1]} : vector<8x1152xf32> to vector<8x128xf32>
    %32 = vector.extract_strided_slice %31 {offsets = [0, 0], sizes = [1, 128], strides = [1, 1]} : vector<8x128xf32> to vector<1x128xf32>
    %cst_10 = arith.constant 1.000000e+00 : f32
    %33 = vector.broadcast %cst_10 : f32 to vector<1x128xf32>
    %34 = arith.divf %33, %32 : vector<1x128xf32>
    %35 = vector.extract_strided_slice %31 {offsets = [1, 0], sizes = [1, 128], strides = [1, 1]} : vector<8x128xf32> to vector<1x128xf32>
    %36 = arith.mulf %35, %34 : vector<1x128xf32>
    %cst_11 = arith.constant 3.200000e+01 : f32
    %37 = vector.broadcast %cst_11 : f32 to vector<1x128xf32>
    %38 = arith.mulf %36, %37 : vector<1x128xf32>
    %cst_12 = arith.constant 1.600000e+01 : f32
    %39 = vector.broadcast %cst_12 : f32 to vector<1x128xf32>
    %40 = arith.addf %38, %39 : vector<1x128xf32>
    %41 = vector.extract_strided_slice %31 {offsets = [2, 0], sizes = [1, 128], strides = [1, 1]} : vector<8x128xf32> to vector<1x128xf32>
    %42 = arith.mulf %41, %34 : vector<1x128xf32>
    %cst_13 = arith.constant 3.200000e+01 : f32
    %43 = vector.broadcast %cst_13 : f32 to vector<1x128xf32>
    %44 = arith.mulf %42, %43 : vector<1x128xf32>
    %cst_14 = arith.constant 1.600000e+01 : f32
    %45 = vector.broadcast %cst_14 : f32 to vector<1x128xf32>
    %46 = arith.addf %44, %45 : vector<1x128xf32>
    %47 = vector.extract_strided_slice %30 {offsets = [0, 128], sizes = [8, 128], strides = [1, 1]} : vector<8x1152xf32> to vector<8x128xf32>
    %cst_15 = arith.constant 0.000000e+00 : f32
    %48 = vector.broadcast %cst_15 : f32 to vector<1x128xf32>
    %49 = vector.extract_strided_slice %30 {offsets = [0, 256], sizes = [8, 128], strides = [1, 1]} : vector<8x1152xf32> to vector<8x128xf32>
    %50 = arith.addf %47, %49 : vector<8x128xf32>
    %51 = vector.extract_strided_slice %49 {offsets = [0, 0], sizes = [1, 128], strides = [1, 1]} : vector<8x128xf32> to vector<1x128xf32>
    %cst_16 = arith.constant 0.142857149 : f32
    %52 = vector.broadcast %cst_16 : f32 to vector<1x128xf32>
    %53 = arith.mulf %52, %51 : vector<1x128xf32>
    %54 = arith.addf %48, %53 : vector<1x128xf32>
    %55 = vector.extract_strided_slice %30 {offsets = [0, 384], sizes = [8, 128], strides = [1, 1]} : vector<8x1152xf32> to vector<8x128xf32>
    %56 = arith.addf %50, %55 : vector<8x128xf32>
    %57 = vector.extract_strided_slice %55 {offsets = [0, 0], sizes = [1, 128], strides = [1, 1]} : vector<8x128xf32> to vector<1x128xf32>
    %cst_17 = arith.constant 0.285714298 : f32
    %58 = vector.broadcast %cst_17 : f32 to vector<1x128xf32>
    %59 = arith.mulf %58, %57 : vector<1x128xf32>
    %60 = arith.addf %54, %59 : vector<1x128xf32>
    %61 = vector.extract_strided_slice %30 {offsets = [0, 512], sizes = [8, 128], strides = [1, 1]} : vector<8x1152xf32> to vector<8x128xf32>
    %62 = arith.addf %56, %61 : vector<8x128xf32>
    %63 = vector.extract_strided_slice %61 {offsets = [0, 0], sizes = [1, 128], strides = [1, 1]} : vector<8x128xf32> to vector<1x128xf32>
    %cst_18 = arith.constant 0.428571433 : f32
    %64 = vector.broadcast %cst_18 : f32 to vector<1x128xf32>
    %65 = arith.mulf %64, %63 : vector<1x128xf32>
    %66 = arith.addf %60, %65 : vector<1x128xf32>
    %67 = vector.extract_strided_slice %30 {offsets = [0, 640], sizes = [8, 128], strides = [1, 1]} : vector<8x1152xf32> to vector<8x128xf32>
    %68 = arith.addf %62, %67 : vector<8x128xf32>
    %69 = vector.extract_strided_slice %67 {offsets = [0, 0], sizes = [1, 128], strides = [1, 1]} : vector<8x128xf32> to vector<1x128xf32>
    %cst_19 = arith.constant 0.571428597 : f32
    %70 = vector.broadcast %cst_19 : f32 to vector<1x128xf32>
    %71 = arith.mulf %70, %69 : vector<1x128xf32>
    %72 = arith.addf %66, %71 : vector<1x128xf32>
    %73 = vector.extract_strided_slice %30 {offsets = [0, 768], sizes = [8, 128], strides = [1, 1]} : vector<8x1152xf32> to vector<8x128xf32>
    %74 = arith.addf %68, %73 : vector<8x128xf32>
    %75 = vector.extract_strided_slice %73 {offsets = [0, 0], sizes = [1, 128], strides = [1, 1]} : vector<8x128xf32> to vector<1x128xf32>
    %cst_20 = arith.constant 0.714285731 : f32
    %76 = vector.broadcast %cst_20 : f32 to vector<1x128xf32>
    %77 = arith.mulf %76, %75 : vector<1x128xf32>
    %78 = arith.addf %72, %77 : vector<1x128xf32>
    %79 = vector.extract_strided_slice %30 {offsets = [0, 896], sizes = [8, 128], strides = [1, 1]} : vector<8x1152xf32> to vector<8x128xf32>
    %80 = arith.addf %74, %79 : vector<8x128xf32>
    %81 = vector.extract_strided_slice %79 {offsets = [0, 0], sizes = [1, 128], strides = [1, 1]} : vector<8x128xf32> to vector<1x128xf32>
    %cst_21 = arith.constant 0.857142865 : f32
    %82 = vector.broadcast %cst_21 : f32 to vector<1x128xf32>
    %83 = arith.mulf %82, %81 : vector<1x128xf32>
    %84 = arith.addf %78, %83 : vector<1x128xf32>
    %85 = vector.extract_strided_slice %30 {offsets = [0, 1024], sizes = [8, 128], strides = [1, 1]} : vector<8x1152xf32> to vector<8x128xf32>
    %86 = arith.addf %80, %85 : vector<8x128xf32>
    %87 = vector.extract_strided_slice %85 {offsets = [0, 0], sizes = [1, 128], strides = [1, 1]} : vector<8x128xf32> to vector<1x128xf32>
    %cst_22 = arith.constant 1.000000e+00 : f32
    %88 = vector.broadcast %cst_22 : f32 to vector<1x128xf32>
    %89 = arith.mulf %88, %87 : vector<1x128xf32>
    %90 = arith.addf %84, %89 : vector<1x128xf32>
    %91 = vector.extract_strided_slice %86 {offsets = [0, 0], sizes = [1, 128], strides = [1, 1]} : vector<8x128xf32> to vector<1x128xf32>
    %cst_23 = arith.constant 1.000000e+00 : f32
    %92 = vector.broadcast %cst_23 : f32 to vector<1x128xf32>
    %93 = arith.divf %92, %91 : vector<1x128xf32>
    %94 = vector.extract_strided_slice %86 {offsets = [1, 0], sizes = [1, 128], strides = [1, 1]} : vector<8x128xf32> to vector<1x128xf32>
    %95 = arith.mulf %94, %93 : vector<1x128xf32>
    %cst_24 = arith.constant 3.200000e+01 : f32
    %96 = vector.broadcast %cst_24 : f32 to vector<1x128xf32>
    %97 = arith.mulf %95, %96 : vector<1x128xf32>
    %cst_25 = arith.constant 1.600000e+01 : f32
    %98 = vector.broadcast %cst_25 : f32 to vector<1x128xf32>
    %99 = arith.addf %97, %98 : vector<1x128xf32>
    %cst_26 = arith.constant 8.593750e+00 : f32
    %100 = vector.broadcast %cst_26 : f32 to vector<1x128xf32>
    %101 = arith.mulf %99, %100 : vector<1x128xf32>
    %102 = vector.extract_strided_slice %86 {offsets = [2, 0], sizes = [1, 128], strides = [1, 1]} : vector<8x128xf32> to vector<1x128xf32>
    %103 = arith.mulf %102, %93 : vector<1x128xf32>
    %cst_27 = arith.constant 3.200000e+01 : f32
    %104 = vector.broadcast %cst_27 : f32 to vector<1x128xf32>
    %105 = arith.mulf %103, %104 : vector<1x128xf32>
    %cst_28 = arith.constant 1.600000e+01 : f32
    %106 = vector.broadcast %cst_28 : f32 to vector<1x128xf32>
    %107 = arith.addf %105, %106 : vector<1x128xf32>
    %cst_29 = arith.constant 8.593750e+00 : f32
    %108 = vector.broadcast %cst_29 : f32 to vector<1x128xf32>
    %109 = arith.mulf %107, %108 : vector<1x128xf32>
    %110 = arith.mulf %90, %93 : vector<1x128xf32>
    %cst_30 = arith.constant 2.200000e+03 : f32
    %111 = vector.broadcast %cst_30 : f32 to vector<1x128xf32>
    %112 = arith.mulf %110, %111 : vector<1x128xf32>
    %cst_31 = arith.constant 0.000000e+00 : f32
    %113 = vector.broadcast %cst_31 : f32 to vector<3x128xf32>
    %114 = tpu.concatenate %40, %46, %101, %109, %112, %113 in 0 : vector<1x128xf32>, vector<1x128xf32>, vector<1x128xf32>, vector<1x128xf32>, vector<1x128xf32>, vector<3x128xf32> -> vector<8x128xf32>
    %c0_32 = arith.constant 0 : index
    %c0_33 = arith.constant 0 : index
    %c0_34 = arith.constant 0 : index
    %115 = vector.load %arg5[%c0_32, %c0_33, %c0_34] : memref<1x8x128xf32, #tpu.memory_space<vmem>>, vector<1x8x128xf32>
    %116 = vector.shape_cast %115 : vector<1x8x128xf32> to vector<8x128xf32>
    %117 = vector.shape_cast %114 : vector<8x128xf32> to vector<1x8x128xf32>
    tpu.vector_store %arg5[%c0_32, %c0_33, %c0_34], %117 {strides = array<i32>} : memref<1x8x128xf32, #tpu.memory_space<vmem>>, vector<1x8x128xf32>,
    return
  }
  func.func @transform_0(%arg0: i32) -> (i32, i32, i32) {
    %c0_i32 = arith.constant 0 : i32
    %c0_i32_0 = arith.constant 0 : i32
    %c0_i32_1 = arith.constant 0 : i32
    return %arg0, %c0_i32, %c0_i32_0 : i32, i32, i32
  }
  func.func @transform_1(%arg0: i32) -> (i32, i32) {
    %c0_i32 = arith.constant 0 : i32
    %c0_i32_0 = arith.constant 0 : i32
    %c0_i32_1 = arith.constant 0 : i32
    return %c0_i32, %c0_i32_0 : i32, i32
  }
  func.func @transform_2(%arg0: i32) -> (i32, i32) {
    %c0_i32 = arith.constant 0 : i32
    %c0_i32_0 = arith.constant 0 : i32
    %c0_i32_1 = arith.constant 0 : i32
    return %c0_i32, %c0_i32_0 : i32, i32
  }
  func.func @transform_3(%arg0: i32) -> (i32, i32) {
    %c0_i32 = arith.constant 0 : i32
    %c0_i32_0 = arith.constant 0 : i32
    %c0_i32_1 = arith.constant 0 : i32
    return %c0_i32, %c0_i32_0 : i32, i32
  }
  func.func @transform_4(%arg0: i32) -> (i32, i32, i32) {
    %c0_i32 = arith.constant 0 : i32
    %c0_i32_0 = arith.constant 0 : i32
    %c0_i32_1 = arith.constant 0 : i32
    return %arg0, %c0_i32, %c0_i32_0 : i32, i32, i32
  }
}

</mosaic_0001>

<bundles_post_ra>
// kernel: tpu_custom_call.1
= control target key start
LH: loop header
LB: loop body
LE: loop exit
PB: predicated region body
PF: predicated region fallthrough
CT: control target
= control target key end

     0   :  { %9 = vsyncpa [#allocation3], 0  ;;  %s9065_s0 = inlined_call_operand.vmem [shape: bf16[2,32,64], index: 0, kind: input, shape index: {}]   ;;  %s9066_s1 = inlined_call_operand.vmem [shape: bf16[1152,32], index: 1, kind: input, shape index: {}]   ;;  %s9067_s2 = inlined_call_operand.vmem [shape: f32[1152,1], index: 2, kind: input, shape index: {}]   ;;  %s9068_s3 = inlined_call_operand.vmem [shape: f32[8,64], index: 3, kind: input, shape index: {}]   ;;  %s9069_s4 = inlined_call_operand.hbm [shape: f32[2,8,128], index: 4, kind: output, shape index: {}]  }
   0x1   :  { %11 = vsyncpa [#allocation3 + $0x1], 0  ;;  %s5930_s15 = smov 0   ;;  %s5932_s16 = smov 0  }
   0x2   :  { %s5934_s17 = smov 0   ;;  %s5936_s18 = smov 0  }
   0x3 LB: > { %s5951_s19 = sadd.s32 4294967295, %s5898_s18   ;;  %s4483_s20 = sadd.s32 4294967294, %s5898_s18   ;;  %s5898_s18 = sphi %s5936_s18, %s9840_s18   ;;  %s5894_s17 = sphi %s5934_s17, %s9839_s17   ;;  %s5890_s16 = sphi %s5932_s16, %s9838_s16   ;;  %s5886_s15 = sphi %s5930_s15, %s9837_s15  }
   0x4   : > { %s5955_s21 = sadd.s32 1, %s5898_s18   ;;  %s113_s22 = sadd.s32 1, %s5894_s17 }
   0x5   : > { %s110_s23 = ssub.s32 %s5898_s18, %s5955_s21  ;;  %p123_p0 = scmp.ne.s32.totalorder %s5894_s17, %s5890_s16 }
   0x6   : > { %p111_p1 = scmp.eq.s32.totalorder %s110_s23, 0  ;;  %p124_p2 = scmp.eq.s32.totalorder %s5951_s19, 1 }
   0x7   : > { %p129_p3 = scmp.ne.s32.totalorder %s5890_s16, %s5886_s15  ;;  %p130_p4 = scmp.eq.s32.totalorder %s4483_s20, 1 }
   0x8   : > { %s5966_s24 = scalar_select %p111_p1, %s5894_s17, %s113_s22  }
   0x9   : > { %p5968_p5 = por %p124_p2, %p123_p0  ;;  %p5972_p6 = por %p130_p4, %p129_p3 }
   0xa   : > { %p4486_p7 = scmp.ge.s32.totalorder %s5898_s18, 1  ;;  %p165_p8 = scmp.lt.s32.totalorder %s5898_s18, 3 }
   0xc   : > { %p166_p9 = pnand %p4486_p7, %p165_p8 }
   0xe   : > { %169 = sbr.rel (%p166_p9) target bundleno = 1378 (0x562), region = 36 }
  0x15   : > { %v343_v0 = vld [vmem:[%s9067_s2 + $0x10] sm:$0xff]  ;;  %v341_v1 = vld [vmem:[%s9067_s2] sm:$0xff]  ;;  %p191_p10 = scmp.lt.s32.totalorder %s5951_s19, 1  ;;  %v5900_v2 = vmov 0   ;;  %v344_v3 = vld [vmem:[%s9067_s2 + $0x18] sm:$0xff]  ;;  %vm1582_vm0 = vcmask 261120  }
  0x16   : > { %5468 = vset.pattern.permute.xlu1 %v5900_v2  ;;  %5467 = vset.pattern.permute.xlu0 %v5900_v2  ;;  %v342_v4 = vld [vmem:[%s9067_s2 + $0x8] sm:$0xff]  ;;  %v5471_v5 = vld [vmem:[%s9066_s1] sm:$0xff]   ;;  %v348_v10 = vld [vmem:[%s9067_s2 + $0x38] sm:$0xff]  ;;  %vm2408_vm1 = vcmask 523264   ;;  %vm5902_vm3 = vmmov 0   ;;  %s188_s23 = sand.u32 1, %s5890_s16  }
  0x17   : > { %502 = vperm.xlu1 %5468, %v343_v0   ;;  %492 = vperm.xlu0 %5467, %v341_v1   ;;  %s192_s9 = scalar_select %p191_p10, %s5951_s19, 1  ;;  %v346_v6 = vld [vmem:[%s9067_s2 + $0x28] sm:$0xff]  ;;  %v345_v7 = vld [vmem:[%s9067_s2 + $0x20] sm:$0xff]  ;;  %v347_v11 = vld [vmem:[%s9067_s2 + $0x30] sm:$0xff]  ;;  %vm4399_vm4 = vcmask 1040384   ;;  %vm4401_vm5 = vcmask 1041408  }
  0x18   : > { %5021 = vmatprep.mubr.msk.bf16.mxu0 %vm1582_vm0, %v5471_v5  ;;  %v5472_v12 = vld [vmem:[%s9066_s1 + $0x8] sm:$0xff]   ;;  %v5473_v13 = vld [vmem:[%s9066_s1 + $0x10] sm:$0xff]   ;;  %v349_v15 = vld [vmem:[%s9067_s2 + $0x40] sm:$0xff]  ;;  %s4487_s27 = sshll.u32 %s188_s23, 3  ;;  %vm4403_vm6 = vcmask 1042432   ;;  %vm4405_vm7 = vcmask 1043456  }
  0x19   : > { %s4789_s12 = sshll.u32 %s192_s9, 4  ;;  %v350_v14 = vld [vmem:[%s9067_s2 + $0x48] sm:$0xff]  ;;  %v352_v16 = vld [vmem:[%s9067_s2 + $0x58] sm:$0xff]  ;;  %v351_v17 = vld [vmem:[%s9067_s2 + $0x50] sm:$0xff]  ;;  %s4786_s28 = sshll.u32 %s5951_s19, 7  ;;  %vm4407_vm8 = vcmask 1044480  }
  0x1a   : > { %s195_s20 = scalar_lea.vmem %s9065_s0, %s4789_s12  ;;  %v5474_v18 = vld [vmem:[%s9066_s1 + $0x18] sm:$0xff]   ;;  %v5475_v19 = vld [vmem:[%s9066_s1 + $0x20] sm:$0xff]   ;;  %v354_v20 = vld [vmem:[%s9067_s2 + $0x68] sm:$0xff]  ;;  %s190_s29 = scalar_lea.vmem [#allocation2], %s4487_s27 }
  0x1b   : > { %507 = vperm.xlu1 %5468, %v344_v3   ;;  %497 = vperm.xlu0 %5467, %v342_v4   ;;  %v5469_v8 = vld [vmem:[%s195_s20] sm:$0xff]   ;;  %v5470_v9 = vld [vmem:[%s195_s20 + $0x8] sm:$0xff]   ;;  %v356_v22 = vld [vmem:[%s9067_s2 + $0x78] sm:$0xff]  ;;  %s4424_s30 = sshll.u32 %s190_s29, 4  ;;  %s9021_s7 = scalar_lea.hbm %s9069_s4, %s4786_s28  ;;  %s9023_s30 = int_to_ptr.vmem [resolvable:$true] %s4424_s30 }
  0x1c   : > { %5017 = vmatprep.subr.bf16.mxu0 %v5469_v8  ;;  %v353_v21 = vld [vmem:[%s9067_s2 + $0x60] sm:$0xff]  ;;  %v355_v23 = vld [vmem:[%s9067_s2 + $0x70] sm:$0xff]  ;;  %v5476_v24 = vld [vmem:[%s9066_s1 + $0x28] sm:$0xff]   ;;  %s4411_s19 = scalar_lea.sflag [#allocation3], %s188_s23  ;;  %s5836_s8 = scalar_lea.vmem %s9023_s30, 128 }
  0x1d   : > { %5018 = vmatpush3.bf16.msra.mxu0 %v5469_v8  ;;  %v5477_v25 = vld [vmem:[%s9066_s1 + $0x30] sm:$0xff]   ;;  %v358_v26 = vld [vmem:[%s9067_s2 + $0x88] sm:$0xff]  ;;  %v357_v27 = vld [vmem:[%s9067_s2 + $0x80] sm:$0xff]  ;;  %p5837_p11 = scmp.ne.s32.totalorder %s9023_s30, %s5836_s8  ;;  %s5904_s9 = smov [#allocation2]  }
  0x1e   : > { %5019 = vmatprep.subr.bf16.mxu0 %v5470_v9  ;;  %v360_v28 = vld [vmem:[%s9067_s2 + $0x98] sm:$0xff]  ;;  %v359_v29 = vld [vmem:[%s9067_s2 + $0x90] sm:$0xff]  ;;  %v5479_v31 = vld [vmem:[%s9066_s1 + $0x40] sm:$0xff]   ;;  %s5840_s10 = sshll.u32 %s5904_s9, 4  ;;  %s5841_s10 = int_to_ptr.vmem [resolvable:$false] %s5840_s10 }
  0x1f   : > { %517 = vperm.xlu1 %5468, %v346_v6   ;;  %512 = vperm.xlu0 %5467, %v345_v7   ;;  %v5478_v30 = vld [vmem:[%s9066_s1 + $0x38] sm:$0xff]   ;;  %v362_v32 = vld [vmem:[%s9067_s2 + $0xa8] sm:$0xff]  ;;  %v361_v33 = vld [vmem:[%s9067_s2 + $0xa0] sm:$0xff]  ;;  %p5838_p12 = pnand %p5837_p11, %p5968_p5  ;;  %s5842_s11 = scalar_lea.vmem %s5841_s10, 256 }
  0x20   : > { %v364_v34 = vld [vmem:[%s9067_s2 + $0xb8] sm:$0xff]  ;;  %v363_v35 = vld [vmem:[%s9067_s2 + $0xb0] sm:$0xff]  ;;  %v5480_v36 = vld [vmem:[%s9066_s1 + $0x48] sm:$0xff]   ;;  %p5843_p0 = scmp.lt.s32.totalorder %s9023_s30, %s5841_s10  ;;  %p5844_p1 = scmp.lt.s32.totalorder %s5842_s11, %s5836_s8 }
  0x21   : > { %5020 = vmatpush3.bf16.msra.mxu0 %v5470_v9  ;;  %v5481_v37 = vld [vmem:[%s9066_s1 + $0x50] sm:$0xff]   ;;  %v366_v38 = vld [vmem:[%s9067_s2 + $0xc8] sm:$0xff]  ;;  %v365_v39 = vld [vmem:[%s9067_s2 + $0xc0] sm:$0xff]  ;;  %p5839_p13 = pneg %p5838_p12 }
  0x22   : > { %v368_v40 = vld [vmem:[%s9067_s2 + $0xd8] sm:$0xff]  ;;  %v367_v41 = vld [vmem:[%s9067_s2 + $0xd0] sm:$0xff]  ;;  %v5483_v43 = vld [vmem:[%s9066_s1 + $0x60] sm:$0xff]   ;;  %p5845_p2 = por %p5844_p1, %p5843_p0 }
  0x23   : > { %527 = vperm.xlu1 %5468, %v348_v10   ;;  %522 = vperm.xlu0 %5467, %v347_v11   ;;  %v5482_v42 = vld [vmem:[%s9066_s1 + $0x58] sm:$0xff]   ;;  %v370_v44 = vld [vmem:[%s9067_s2 + $0xe8] sm:$0xff]  ;;  %v369_v45 = vld [vmem:[%s9067_s2 + $0xe0] sm:$0xff] }
  0x24   : > { %5022 = vmatmul.mubr.msk.bf16.vlgmr.msra.gmra.mrb[0].mxu0 %vm1582_vm0, %v5472_v12  ;;  %v372_v46 = vld [vmem:[%s9067_s2 + $0xf8] sm:$0xff]  ;;  %v371_v47 = vld [vmem:[%s9067_s2 + $0xf0] sm:$0xff]  ;;  %v5484_v48 = vld [vmem:[%s9066_s1 + $0x68] sm:$0xff]   ;;  %p5846_p3 = pnand %p5845_p2, %p5839_p13 }
  0x25   : > { %5025 = vmatprep.mubr.msk.bf16.mxu0 %vm1582_vm0, %v5473_v13  ;;  %v5485_v49 = vld [vmem:[%s9066_s1 + $0x70] sm:$0xff]   ;;  %v374_v50 = vld [vmem:[%s9067_s2 + $0x108] sm:$0xff]  ;;  %v373_v51 = vld [vmem:[%s9067_s2 + $0x100] sm:$0xff] }
  0x26   : > { %v376_v52 = vld [vmem:[%s9067_s2 + $0x118] sm:$0xff]  ;;  %v375_v53 = vld [vmem:[%s9067_s2 + $0x110] sm:$0xff]  ;;  %v5487_v55 = vld [vmem:[%s9066_s1 + $0x80] sm:$0xff]  }
  0x27   : > { %537 = vperm.xlu1 %5468, %v350_v14   ;;  %532 = vperm.xlu0 %5467, %v349_v15   ;;  %v5486_v54 = vld [vmem:[%s9066_s1 + $0x78] sm:$0xff]   ;;  %v378_v56 = vld [vmem:[%s9067_s2 + $0x128] sm:$0xff]  ;;  %v377_v57 = vld [vmem:[%s9067_s2 + $0x120] sm:$0xff] }
  0x28   : > { %v380_v58 = vld [vmem:[%s9067_s2 + $0x138] sm:$0xff]  ;;  %v379_v59 = vld [vmem:[%s9067_s2 + $0x130] sm:$0xff]  ;;  %v5488_v60 = vld [vmem:[%s9066_s1 + $0x88] sm:$0xff]  }
  0x29   : > { %v5489_v61 = vld [vmem:[%s9066_s1 + $0x90] sm:$0xff]   ;;  %v382_v62 = vld [vmem:[%s9067_s2 + $0x148] sm:$0xff]  ;;  %v381_v63 = vld [vmem:[%s9067_s2 + $0x140] sm:$0xff] }
  0x2a   : > { %v384_v0 = vld [vmem:[%s9067_s2 + $0x158] sm:$0xff]  ;;  %v383_v1 = vld [vmem:[%s9067_s2 + $0x150] sm:$0xff]  ;;  %v5491_v3 = vld [vmem:[%s9066_s1 + $0xa0] sm:$0xff]  }
  0x2b   : > { %547 = vperm.xlu1 %5468, %v352_v16   ;;  %542 = vperm.xlu0 %5467, %v351_v17   ;;  %v5490_v2 = vld [vmem:[%s9066_s1 + $0x98] sm:$0xff]   ;;  %v386_v4 = vld [vmem:[%s9067_s2 + $0x168] sm:$0xff]  ;;  %v385_v5 = vld [vmem:[%s9067_s2 + $0x160] sm:$0xff] }
  0x2c   : > { %5026 = vmatmul.mubr.msk.bf16.gmra.mrb[4].mxu0 %vm1582_vm0, %v5474_v18  ;;  %v388_v6 = vld [vmem:[%s9067_s2 + $0x178] sm:$0xff]  ;;  %v387_v7 = vld [vmem:[%s9067_s2 + $0x170] sm:$0xff]  ;;  %v5492_v8 = vld [vmem:[%s9066_s1 + $0xa8] sm:$0xff]  }
  0x2d   : > { %5029 = vmatprep.mubr.msk.bf16.mxu0 %vm1582_vm0, %v5475_v19  ;;  %v390_v9 = vld [vmem:[%s9067_s2 + $0x188] sm:$0xff]  ;;  %v5493_v10 = vld [vmem:[%s9066_s1 + $0xb0] sm:$0xff]   ;;  %v389_v11 = vld [vmem:[%s9067_s2 + $0x180] sm:$0xff] }
  0x2e   : > { %v392_v12 = vld [vmem:[%s9067_s2 + $0x198] sm:$0xff]  ;;  %v391_v13 = vld [vmem:[%s9067_s2 + $0x190] sm:$0xff]  ;;  %v5495_v15 = vld [vmem:[%s9066_s1 + $0xc0] sm:$0xff]  }
  0x2f   : > { %557 = vperm.xlu1 %5468, %v354_v20   ;;  %552 = vperm.xlu0 %5467, %v353_v21   ;;  %v5494_v14 = vld [vmem:[%s9066_s1 + $0xb8] sm:$0xff]   ;;  %v394_v16 = vld [vmem:[%s9067_s2 + $0x1a8] sm:$0xff]  ;;  %v393_v17 = vld [vmem:[%s9067_s2 + $0x1a0] sm:$0xff] }
  0x30   : > { %v396_v18 = vld [vmem:[%s9067_s2 + $0x1b8] sm:$0xff]  ;;  %v395_v19 = vld [vmem:[%s9067_s2 + $0x1b0] sm:$0xff]  ;;  %v5496_v20 = vld [vmem:[%s9066_s1 + $0xc8] sm:$0xff]  }
  0x31   : > { %v5497_v21 = vld [vmem:[%s9066_s1 + $0xd0] sm:$0xff]   ;;  %vm8211_vm2 = vmpackc.low %vm2408_vm1, %vm2408_vm1 }
  0x33   : > { %567 = vperm.xlu1 %5468, %v356_v22   ;;  %562 = vperm.xlu0 %5467, %v355_v23   ;;  %v398_v22 = vld [vmem:[%s9067_s2 + $0x1c8] sm:$0xff]  ;;  %v397_v23 = vld [vmem:[%s9067_s2 + $0x1c0] sm:$0xff] }
  0x34   : > { %5030 = vmatmul.mubr.msk.bf16.gmra.mrb[8].mxu0 %vm1582_vm0, %v5476_v24  ;;  %v400_v24 = vld [vmem:[%s9067_s2 + $0x1d8] sm:$0xff] }
  0x35   : > { %5033 = vmatprep.mubr.msk.bf16.mxu0 %vm1582_vm0, %v5477_v25  ;;  %v399_v25 = vld [vmem:[%s9067_s2 + $0x1d0] sm:$0xff] }
  0x37   : > { %577 = vperm.xlu1 %5468, %v358_v26   ;;  %572 = vperm.xlu0 %5467, %v357_v27   ;;  %v5498_v26 = vld [vmem:[%s9066_s1 + $0xd8] sm:$0xff]   ;;  %v5499_v27 = vld [vmem:[%s9066_s1 + $0xe0] sm:$0xff]  }
  0x3b   : > { %587 = vperm.xlu1 %5468, %v360_v28   ;;  %582 = vperm.xlu0 %5467, %v359_v29   ;;  %v402_v28 = vld [vmem:[%s9067_s2 + $0x1e8] sm:$0xff]  ;;  %v401_v29 = vld [vmem:[%s9067_s2 + $0x1e0] sm:$0xff] }
  0x3c   : > { %5034 = vmatmul.mubr.msk.bf16.gmra.mrb[12].mxu0 %vm1582_vm0, %v5478_v30  ;;  %v404_v30 = vld [vmem:[%s9067_s2 + $0x1f8] sm:$0xff] }
  0x3d   : > { %5037 = vmatprep.mubr.msk.bf16.mxu0 %vm1582_vm0, %v5479_v31  ;;  %v403_v31 = vld [vmem:[%s9067_s2 + $0x1f0] sm:$0xff] }
  0x3f   : > { %597 = vperm.xlu1 %5468, %v362_v32   ;;  %592 = vperm.xlu0 %5467, %v361_v33   ;;  %v5500_v32 = vld [vmem:[%s9066_s1 + $0xe8] sm:$0xff]   ;;  %v5501_v33 = vld [vmem:[%s9066_s1 + $0xf0] sm:$0xff]  }
  0x43   : > { %607 = vperm.xlu1 %5468, %v364_v34   ;;  %602 = vperm.xlu0 %5467, %v363_v35   ;;  %v406_v34 = vld [vmem:[%s9067_s2 + $0x208] sm:$0xff]  ;;  %v405_v35 = vld [vmem:[%s9067_s2 + $0x200] sm:$0xff] }
  0x44   : > { %5038 = vmatmul.mubr.msk.bf16.gmra.mrb[16].mxu0 %vm1582_vm0, %v5480_v36 }
  0x45   : > { %5041 = vmatprep.mubr.msk.bf16.mxu0 %vm1582_vm0, %v5481_v37 }
  0x47   : > { %617 = vperm.xlu1 %5468, %v366_v38   ;;  %612 = vperm.xlu0 %5467, %v365_v39   ;;  %v408_v38 = vld [vmem:[%s9067_s2 + $0x218] sm:$0xff]  ;;  %v407_v39 = vld [vmem:[%s9067_s2 + $0x210] sm:$0xff] }
  0x4b   : > { %627 = vperm.xlu1 %5468, %v368_v40   ;;  %622 = vperm.xlu0 %5467, %v367_v41   ;;  %v5502_v40 = vld [vmem:[%s9066_s1 + $0xf8] sm:$0xff]  }
  0x4c   : > { %5042 = vmatmul.mubr.msk.bf16.gmra.mrb[20].mxu0 %vm1582_vm0, %v5482_v42 }
  0x4d   : > { %5045 = vmatprep.mubr.msk.bf16.mxu0 %vm1582_vm0, %v5483_v43  ;;  %v5503_v43 = vld [vmem:[%s9066_s1 + $0x100] sm:$0xff]  }
  0x4f   : > { %637 = vperm.xlu1 %5468, %v370_v44   ;;  %632 = vperm.xlu0 %5467, %v369_v45   ;;  %v410_v44 = vld [vmem:[%s9067_s2 + $0x228] sm:$0xff]  ;;  %v409_v45 = vld [vmem:[%s9067_s2 + $0x220] sm:$0xff] }
  0x53   : > { %647 = vperm.xlu1 %5468, %v372_v46   ;;  %642 = vperm.xlu0 %5467, %v371_v47  }
  0x54   : > { %5046 = vmatmul.mubr.msk.bf16.gmra.mrb[24].mxu0 %vm1582_vm0, %v5484_v48  ;;  %v412_v48 = vld [vmem:[%s9067_s2 + $0x238] sm:$0xff] }
  0x55   : > { %5049 = vmatprep.mubr.msk.bf16.mxu0 %vm1582_vm0, %v5485_v49  ;;  %v411_v49 = vld [vmem:[%s9067_s2 + $0x230] sm:$0xff] }
  0x57   : > { %657 = vperm.xlu1 %5468, %v374_v50   ;;  %652 = vperm.xlu0 %5467, %v373_v51   ;;  %v5504_v50 = vld [vmem:[%s9066_s1 + $0x108] sm:$0xff]  }
  0x5b   : > { %667 = vperm.xlu1 %5468, %v376_v52   ;;  %662 = vperm.xlu0 %5467, %v375_v53   ;;  %v5505_v53 = vld [vmem:[%s9066_s1 + $0x110] sm:$0xff]  }
  0x5c   : > { %5050 = vmatmul.mubr.msk.bf16.gmra.mrb[28].mxu0 %vm1582_vm0, %v5486_v54  ;;  %v421_v54 = vld [vmem:[%s9067_s2 + $0x280] sm:$0xff] }
  0x5d   : > { %5053 = vmatprep.mubr.msk.bf16.mxu0 %vm1582_vm0, %v5487_v55  ;;  %v413_v55 = vld [vmem:[%s9067_s2 + $0x240] sm:$0xff] }
  0x5f   : > { %677 = vperm.xlu1 %5468, %v378_v56   ;;  %672 = vperm.xlu0 %5467, %v377_v57  }
  0x63   : > { %687 = vperm.xlu1 %5468, %v380_v58   ;;  %682 = vperm.xlu0 %5467, %v379_v59   ;;  %v437_v58 = vld [vmem:[%s9067_s2 + $0x300] sm:$0xff]  ;;  %v422_v59 = vld [vmem:[%s9067_s2 + $0x288] sm:$0xff] }
  0x64   : > { %5054 = vmatmul.mubr.msk.bf16.gmra.mrb[32].mxu0 %vm1582_vm0, %v5488_v60  ;;  %v5506_v60 = vld [vmem:[%s9066_s1 + $0x118] sm:$0xff]  }
  0x65   : > { %5057 = vmatprep.mubr.msk.bf16.mxu0 %vm1582_vm0, %v5489_v61 }
  0x67   : > { %697 = vperm.xlu1 %5468, %v382_v62   ;;  %692 = vperm.xlu0 %5467, %v381_v63   ;;  %v5507_v63 = vld [vmem:[%s9066_s1 + $0x120] sm:$0xff]  }
  0x6b   : > { %707 = vperm.xlu1 %5468, %v384_v0   ;;  %702 = vperm.xlu0 %5467, %v383_v1   ;;  %v453_v0 = vld [vmem:[%s9067_s2 + $0x380] sm:$0xff]  ;;  %v438_v1 = vld [vmem:[%s9067_s2 + $0x308] sm:$0xff] }
  0x6c   : > { %5058 = vmatmul.mubr.msk.bf16.gmra.mrb[36].mxu0 %vm1582_vm0, %v5490_v2 }
  0x6d   : > { %5061 = vmatprep.mubr.msk.bf16.mxu0 %vm1582_vm0, %v5491_v3 }
  0x6f   : > { %717 = vperm.xlu1 %5468, %v386_v4   ;;  %712 = vperm.xlu0 %5467, %v385_v5   ;;  %v469_v4 = vld [vmem:[%s9067_s2 + $0x400] sm:$0xff]  ;;  %v454_v5 = vld [vmem:[%s9067_s2 + $0x388] sm:$0xff] }
  0x73   : > { %727 = vperm.xlu1 %5468, %v388_v6   ;;  %722 = vperm.xlu0 %5467, %v387_v7   ;;  %v5508_v6 = vld [vmem:[%s9066_s1 + $0x128] sm:$0xff]  }
  0x74   : > { %5062 = vmatmul.mubr.msk.bf16.gmra.mrb[40].mxu0 %vm1582_vm0, %v5492_v8 }
  0x75   : > { %5065 = vmatprep.mubr.msk.bf16.mxu0 %vm1582_vm0, %v5493_v10  ;;  %v423_v10 = vld [vmem:[%s9067_s2 + $0x290] sm:$0xff] }
  0x77   : > { %737 = vperm.xlu1 %5468, %v390_v9   ;;  %732 = vperm.xlu0 %5467, %v389_v11   ;;  %v5509_v9 = vld [vmem:[%s9066_s1 + $0x130] sm:$0xff]   ;;  %v470_v11 = vld [vmem:[%s9067_s2 + $0x408] sm:$0xff] }
  0x7b   : > { %747 = vperm.xlu1 %5468, %v392_v12   ;;  %742 = vperm.xlu0 %5467, %v391_v13  }
  0x7c   : > { %5066 = vmatmul.mubr.msk.bf16.gmra.mrb[44].mxu0 %vm1582_vm0, %v5494_v14  ;;  %v439_v14 = vld [vmem:[%s9067_s2 + $0x310] sm:$0xff] }
  0x7d   : > { %5069 = vmatprep.mubr.msk.bf16.mxu0 %vm1582_vm0, %v5495_v15  ;;  %v424_v15 = vld [vmem:[%s9067_s2 + $0x298] sm:$0xff] }
  0x7f   : > { %757 = vperm.xlu1 %5468, %v394_v16   ;;  %752 = vperm.xlu0 %5467, %v393_v17   ;;  %v5510_v16 = vld [vmem:[%s9066_s1 + $0x138] sm:$0xff]  }
  0x83   : > { %767 = vperm.xlu1 %5468, %v396_v18   ;;  %762 = vperm.xlu0 %5467, %v395_v19   ;;  %v5511_v19 = vld [vmem:[%s9066_s1 + $0x140] sm:$0xff]  }
  0x84   : > { %5070 = vmatmul.mubr.msk.bf16.gmra.mrb[48].mxu0 %vm1582_vm0, %v5496_v20  ;;  %v455_v20 = vld [vmem:[%s9067_s2 + $0x390] sm:$0xff] }
  0x85   : > { %5073 = vmatprep.mubr.msk.bf16.mxu0 %vm1582_vm0, %v5497_v21  ;;  %v440_v21 = vld [vmem:[%s9067_s2 + $0x318] sm:$0xff] }
  0x87   : > { %777 = vperm.xlu1 %5468, %v398_v22   ;;  %772 = vperm.xlu0 %5467, %v397_v23  }
  0x8b   : > { %787 = vperm.xlu1 %5468, %v400_v24   ;;  %782 = vperm.xlu0 %5467, %v399_v25   ;;  %v471_v24 = vld [vmem:[%s9067_s2 + $0x410] sm:$0xff]  ;;  %v456_v25 = vld [vmem:[%s9067_s2 + $0x398] sm:$0xff] }
  0x8c   : > { %5074 = vmatmul.mubr.msk.bf16.gmra.mrb[52].mxu0 %vm1582_vm0, %v5498_v26  ;;  %v5512_v26 = vld [vmem:[%s9066_s1 + $0x148] sm:$0xff]  }
  0x8d   : > { %5077 = vmatprep.mubr.msk.bf16.mxu0 %vm1582_vm0, %v5499_v27 }
  0x8f   : > { %797 = vperm.xlu1 %5468, %v402_v28   ;;  %792 = vperm.xlu0 %5467, %v401_v29   ;;  %v5513_v29 = vld [vmem:[%s9066_s1 + $0x150] sm:$0xff]  }
  0x93   : > { %807 = vperm.xlu1 %5468, %v404_v30   ;;  %802 = vperm.xlu0 %5467, %v403_v31   ;;  %v425_v30 = vld [vmem:[%s9067_s2 + $0x2a0] sm:$0xff]  ;;  %v472_v31 = vld [vmem:[%s9067_s2 + $0x418] sm:$0xff] }
  0x94   : > { %5078 = vmatmul.mubr.msk.bf16.gmra.mrb[56].mxu0 %vm1582_vm0, %v5500_v32 }
  0x95   : > { %5081 = vmatprep.mubr.msk.bf16.mxu0 %vm1582_vm0, %v5501_v33 }
  0x96   : > { %v6304_v36 = vpop.permute.xlu1 %502  ;;  %v6306_v37 = vpop.permute.xlu0 %492 }
  0x97   : > { %817 = vperm.xlu1 %5468, %v406_v34   ;;  %812 = vperm.xlu0 %5467, %v405_v35   ;;  %v441_v34 = vld [vmem:[%s9067_s2 + $0x320] sm:$0xff]  ;;  %v426_v35 = vld [vmem:[%s9067_s2 + $0x2a8] sm:$0xff] }
  0x9a   : > { %v6318_v41 = vpop.permute.xlu1 %507  ;;  %v6320_v42 = vpop.permute.xlu0 %497 }
  0x9b   : > { %827 = vperm.xlu1 %5468, %v408_v38   ;;  %822 = vperm.xlu0 %5467, %v407_v39   ;;  %v5514_v38 = vld [vmem:[%s9066_s1 + $0x158] sm:$0xff]  }
  0x9c   : > { %5082 = vmatmul.mubr.msk.bf16.gmra.mrb[60].mxu0 %vm1582_vm0, %v5502_v40 }
  0x9d   : > { %5085 = vmatprep.mubr.msk.bf16.mxu0 %vm1582_vm0, %v5503_v43  ;;  %v5515_v43 = vld [vmem:[%s9066_s1 + $0x160] sm:$0xff]  }
  0x9e   : > { %v6332_v46 = vpop.permute.xlu1 %517  ;;  %v6334_v47 = vpop.permute.xlu0 %512 }
  0x9f   : > { %9245 = vst [vmem:[#allocation5_spill] sm:$0xff] %v6332_v46  ;;  %9246 = vst [vmem:[#allocation6_spill] sm:$0xff] %v6334_v47  ;;  %837 = vperm.xlu1 %5468, %v410_v44   ;;  %832 = vperm.xlu0 %5467, %v409_v45   ;;  %v457_v44 = vld [vmem:[%s9067_s2 + $0x3a0] sm:$0xff]  ;;  %v442_v45 = vld [vmem:[%s9067_s2 + $0x328] sm:$0xff] }
  0xa2   : > { %v6346_v51 = vpop.permute.xlu1 %527  ;;  %v6348_v52 = vpop.permute.xlu0 %522 }
  0xa3   : > { %9247 = vst [vmem:[#allocation7_spill] sm:$0xff] %v6346_v51  ;;  %9248 = vst [vmem:[#allocation8_spill] sm:$0xff] %v6348_v52  ;;  %847 = vperm.xlu1 %5468, %v412_v48   ;;  %842 = vperm.xlu0 %5467, %v411_v49   ;;  %v435_v52 = vld [vmem:[%s9067_s2 + $0x2f0] sm:$0xff] }
  0xa4   : > { %5086 = vmatmul.mubr.msk.bf16.gmra.mrb[64].mxu0 %vm1582_vm0, %v5504_v50  ;;  %v473_v50 = vld [vmem:[%s9067_s2 + $0x420] sm:$0xff] }
  0xa5   : > { %5089 = vmatprep.mubr.msk.bf16.mxu0 %vm1582_vm0, %v5505_v53  ;;  %v458_v53 = vld [vmem:[%s9067_s2 + $0x3a8] sm:$0xff] }
  0xa6   : > { %v6360_v56 = vpop.permute.xlu1 %537  ;;  %v6362_v57 = vpop.permute.xlu0 %532 }
  0xa7   : > { %9249 = vst [vmem:[#allocation9_spill] sm:$0xff] %v6360_v56  ;;  %9250 = vst [vmem:[#allocation10_spill] sm:$0xff] %v6362_v57  ;;  %892 = vperm.xlu1 %5468, %v421_v54   ;;  %852 = vperm.xlu0 %5467, %v413_v55   ;;  %v5516_v54 = vld [vmem:[%s9066_s1 + $0x168] sm:$0xff]  }
  0xaa   : > { %v6374_v61 = vpop.permute.xlu1 %547  ;;  %v6376_v62 = vpop.permute.xlu0 %542 }
  0xab   : > { %9251 = vst [vmem:[#allocation11_spill] sm:$0xff] %v6374_v61  ;;  %9252 = vst [vmem:[#allocation12_spill] sm:$0xff] %v6376_v62  ;;  %972 = vperm.xlu1 %5468, %v437_v58   ;;  %897 = vperm.xlu0 %5467, %v422_v59   ;;  %v5517_v59 = vld [vmem:[%s9066_s1 + $0x170] sm:$0xff]   ;;  %v417_v61 = vld [vmem:[%s9067_s2 + $0x260] sm:$0xff] }
  0xac   : > { %5090 = vmatmul.mubr.msk.bf16.gmra.mrb[68].mxu0 %vm1582_vm0, %v5506_v60  ;;  %v427_v60 = vld [vmem:[%s9067_s2 + $0x2b0] sm:$0xff] }
  0xad   : > { %5093 = vmatprep.mubr.msk.bf16.mxu0 %vm1582_vm0, %v5507_v63  ;;  %v474_v63 = vld [vmem:[%s9067_s2 + $0x428] sm:$0xff] }
  0xae   : > { %v6388_v2 = vpop.permute.xlu1 %557  ;;  %v6390_v3 = vpop.permute.xlu0 %552 }
  0xaf   : > { %9253 = vst [vmem:[#allocation13_spill] sm:$0xff] %v6388_v2  ;;  %9254 = vst [vmem:[#allocation14_spill] sm:$0xff] %v6390_v3  ;;  %1052 = vperm.xlu1 %5468, %v453_v0   ;;  %977 = vperm.xlu0 %5467, %v438_v1  }
  0xb2   : > { %v6402_v7 = vpop.permute.xlu1 %567  ;;  %v6404_v8 = vpop.permute.xlu0 %562 }
  0xb3   : > { %9255 = vst [vmem:[#allocation15_spill] sm:$0xff] %v6402_v7  ;;  %9256 = vst [vmem:[#allocation16_spill] sm:$0xff] %v6404_v8  ;;  %1132 = vperm.xlu1 %5468, %v469_v4   ;;  %1057 = vperm.xlu0 %5467, %v454_v5   ;;  %v443_v4 = vld [vmem:[%s9067_s2 + $0x330] sm:$0xff]  ;;  %v428_v5 = vld [vmem:[%s9067_s2 + $0x2b8] sm:$0xff] }
  0xb4   : > { %5094 = vmatmul.mubr.msk.bf16.gmra.mrb[72].mxu0 %vm1582_vm0, %v5508_v6  ;;  %v5518_v6 = vld [vmem:[%s9066_s1 + $0x178] sm:$0xff]   ;;  %v447_v7 = vld [vmem:[%s9067_s2 + $0x350] sm:$0xff] }
  0xb5   : > { %5097 = vmatprep.mubr.msk.bf16.mxu0 %vm1582_vm0, %v5509_v9 }
  0xb6   : > { %v6416_v12 = vpop.permute.xlu1 %577  ;;  %v6418_v13 = vpop.permute.xlu0 %572 }
  0xb7   : > { %902 = vperm.xlu1 %5468, %v423_v10   ;;  %1137 = vperm.xlu0 %5467, %v470_v11   ;;  %v5519_v11 = vld [vmem:[%s9066_s1 + $0x180] sm:$0xff]  }
  0xba   : > { %v6430_v17 = vpop.permute.xlu1 %587  ;;  %v6432_v18 = vpop.permute.xlu0 %582 }
  0xbb   : > { %982 = vperm.xlu1 %5468, %v439_v14   ;;  %907 = vperm.xlu0 %5467, %v424_v15   ;;  %v459_v14 = vld [vmem:[%s9067_s2 + $0x3b0] sm:$0xff]  ;;  %v444_v15 = vld [vmem:[%s9067_s2 + $0x338] sm:$0xff] }
  0xbc   : > { %5098 = vmatmul.mubr.msk.bf16.gmra.mrb[76].mxu0 %vm1582_vm0, %v5510_v16 }
  0xbd   : > { %5101 = vmatprep.mubr.msk.bf16.mxu0 %vm1582_vm0, %v5511_v19 }
  0xbe   : > { %v6444_v22 = vpop.permute.xlu1 %597  ;;  %v6446_v23 = vpop.permute.xlu0 %592 }
  0xbf   : > { %1062 = vperm.xlu1 %5468, %v455_v20   ;;  %987 = vperm.xlu0 %5467, %v440_v21   ;;  %v414_v20 = vld [vmem:[%s9067_s2 + $0x248] sm:$0xff]  ;;  %v460_v21 = vld [vmem:[%s9067_s2 + $0x3b8] sm:$0xff] }
  0xc2   : > { %v6458_v27 = vpop.permute.xlu1 %607  ;;  %v6460_v28 = vpop.permute.xlu0 %602 }
  0xc3   : > { %1142 = vperm.xlu1 %5468, %v471_v24   ;;  %1067 = vperm.xlu0 %5467, %v456_v25   ;;  %v5520_v24 = vld [vmem:[%s9066_s1 + $0x188] sm:$0xff]  }
  0xc4   : > { %5102 = vmatmul.mubr.msk.bf16.gmra.mrb[80].mxu0 %vm1582_vm0, %v5512_v26 }
  0xc5   : > { %5105 = vmatprep.mubr.msk.bf16.mxu0 %vm1582_vm0, %v5513_v29  ;;  %v5521_v29 = vld [vmem:[%s9066_s1 + $0x190] sm:$0xff]  }
  0xc6   : > { %v6472_v32 = vpop.permute.xlu1 %617  ;;  %v6474_v33 = vpop.permute.xlu0 %612 }
  0xc7   : > { %9257 = vst [vmem:[#allocation17_spill] sm:$0xff] %v6472_v32  ;;  %9258 = vst [vmem:[#allocation18_spill] sm:$0xff] %v6474_v33  ;;  %912 = vperm.xlu1 %5468, %v425_v30   ;;  %1147 = vperm.xlu0 %5467, %v472_v31   ;;  %v476_v30 = vld [vmem:[%s9067_s2 + $0x438] sm:$0xff]  ;;  %v475_v31 = vld [vmem:[%s9067_s2 + $0x430] sm:$0xff] }
  0xc8   : > { %v468_v32 = vld [vmem:[%s9067_s2 + $0x3f8] sm:$0xff] }
  0xca   : > { %v6486_v39 = vpop.permute.xlu1 %627  ;;  %v6488_v40 = vpop.permute.xlu0 %622 }
  0xcb   : > { %9259 = vst [vmem:[#allocation19_spill] sm:$0xff] %v6486_v39  ;;  %9260 = vst [vmem:[#allocation20_spill] sm:$0xff] %v6488_v40  ;;  %992 = vperm.xlu1 %5468, %v441_v34   ;;  %917 = vperm.xlu0 %5467, %v426_v35   ;;  %v481_v39 = vld [vmem:[%s9067_s2 + $0x460] sm:$0xff] }
  0xcc   : > { %5106 = vmatmul.mubr.msk.bf16.gmra.mrb[84].mxu0 %vm1582_vm0, %v5514_v38  ;;  %v430_v38 = vld [vmem:[%s9067_s2 + $0x2c8] sm:$0xff] }
  0xcd   : > { %5109 = vmatprep.mubr.msk.bf16.mxu0 %vm1582_vm0, %v5515_v43  ;;  %v429_v43 = vld [vmem:[%s9067_s2 + $0x2c0] sm:$0xff] }
  0xce   : > { %v6500_v48 = vpop.permute.xlu1 %637  ;;  %v6502_v49 = vpop.permute.xlu0 %632 }
  0xcf   : > { %9261 = vst [vmem:[#allocation21_spill] sm:$0xff] %v6500_v48  ;;  %9262 = vst [vmem:[#allocation22_spill] sm:$0xff] %v6502_v49  ;;  %1072 = vperm.xlu1 %5468, %v457_v44   ;;  %997 = vperm.xlu0 %5467, %v442_v45   ;;  %v5522_v44 = vld [vmem:[%s9066_s1 + $0x198] sm:$0xff]   ;;  %v479_v48 = vld [vmem:[%s9067_s2 + $0x450] sm:$0xff] }
  0xd2   : > { %v6514_v55 = vpop.permute.xlu1 %647  ;;  %v6516_v58 = vpop.permute.xlu0 %642 }
  0xd3   : > { %9263 = vst [vmem:[#allocation23_spill] sm:$0xff] %v6514_v55  ;;  %9264 = vst [vmem:[#allocation24_spill] sm:$0xff] %v6516_v58  ;;  %1152 = vperm.xlu1 %5468, %v473_v50   ;;  %1077 = vperm.xlu0 %5467, %v458_v53   ;;  %v5523_v53 = vld [vmem:[%s9066_s1 + $0x1a0] sm:$0xff]  }
  0xd4   : > { %5110 = vmatmul.mubr.msk.bf16.gmra.mrb[88].mxu0 %vm1582_vm0, %v5516_v54  ;;  %v446_v54 = vld [vmem:[%s9067_s2 + $0x348] sm:$0xff] }
  0xd5   : > { %5113 = vmatprep.mubr.msk.bf16.mxu0 %vm1582_vm0, %v5517_v59  ;;  %v445_v59 = vld [vmem:[%s9067_s2 + $0x340] sm:$0xff] }
  0xd6   : > { %v6528_v0 = vpop.permute.xlu1 %657  ;;  %v6530_v1 = vpop.permute.xlu0 %652 }
  0xd7   : > { %922 = vperm.xlu1 %5468, %v427_v60   ;;  %1157 = vperm.xlu0 %5467, %v474_v63  }
  0xda   : > { %v6542_v9 = vpop.permute.xlu1 %667  ;;  %v6544_v10 = vpop.permute.xlu0 %662 }
  0xdb   : > { %1002 = vperm.xlu1 %5468, %v443_v4   ;;  %927 = vperm.xlu0 %5467, %v428_v5   ;;  %v462_v4 = vld [vmem:[%s9067_s2 + $0x3c8] sm:$0xff]  ;;  %v461_v5 = vld [vmem:[%s9067_s2 + $0x3c0] sm:$0xff] }
  0xdc   : > { %5114 = vmatmul.mubr.msk.bf16.gmra.mrb[92].mxu0 %vm1582_vm0, %v5518_v6  ;;  %v5524_v6 = vld [vmem:[%s9066_s1 + $0x1a8] sm:$0xff]  }
  0xdd   : > { %5117 = vmatprep.mubr.msk.bf16.mxu0 %vm1582_vm0, %v5519_v11 }
  0xde   : > { %v6556_v16 = vpop.permute.xlu1 %677  ;;  %v6558_v19 = vpop.permute.xlu0 %672 }
  0xdf   : > { %1082 = vperm.xlu1 %5468, %v459_v14   ;;  %1007 = vperm.xlu0 %5467, %v444_v15   ;;  %v5525_v15 = vld [vmem:[%s9066_s1 + $0x1b0] sm:$0xff]  }
  0xe2   : > { %v6570_v25 = vpop.permute.xlu1 %687  ;;  %v6572_v26 = vpop.permute.xlu0 %682 }
  0xe3   : > { %857 = vperm.xlu1 %5468, %v414_v20   ;;  %1087 = vperm.xlu0 %5467, %v460_v21   ;;  %v416_v20 = vld [vmem:[%s9067_s2 + $0x258] sm:$0xff]  ;;  %v415_v21 = vld [vmem:[%s9067_s2 + $0x250] sm:$0xff] }
  0xe4   : > { %5118 = vmatmul.mubr.msk.bf16.gmra.mrb[96].mxu0 %vm1582_vm0, %v5520_v24 }
  0xe5   : > { %5121 = vmatprep.mubr.msk.bf16.mxu0 %vm1582_vm0, %v5521_v29 }
  0xe6   : > { %v6584_v34 = vpop.permute.xlu1 %697  ;;  %v6586_v35 = vpop.permute.xlu0 %692 }
  0xe7   : > { %9265 = vst [vmem:[#allocation25_spill] sm:$0xff] %v6584_v34  ;;  %9266 = vst [vmem:[#allocation26_spill] sm:$0xff] %v6586_v35  ;;  %1167 = vperm.xlu1 %5468, %v476_v30   ;;  %1162 = vperm.xlu0 %5467, %v475_v31   ;;  %v478_v31 = vld [vmem:[%s9067_s2 + $0x448] sm:$0xff]  ;;  %v451_v34 = vld [vmem:[%s9067_s2 + $0x370] sm:$0xff] }
  0xea   : > { %v6598_v45 = vpop.permute.xlu1 %707  ;;  %v6600_v50 = vpop.permute.xlu0 %702 }
  0xeb   : > { %9267 = vst [vmem:[#allocation27_spill] sm:$0xff] %v6598_v45  ;;  %9268 = vst [vmem:[#allocation28_spill] sm:$0xff] %v6600_v50  ;;  %937 = vperm.xlu1 %5468, %v430_v38   ;;  %932 = vperm.xlu0 %5467, %v429_v43   ;;  %v477_v38 = vld [vmem:[%s9067_s2 + $0x440] sm:$0xff] }
  0xec   : > { %5122 = vmatmul.mubr.msk.bf16.gmra.mrb[100].mxu0 %vm1582_vm0, %v5522_v44  ;;  %v5526_v44 = vld [vmem:[%s9066_s1 + $0x1b8] sm:$0xff]  }
  0xed   : > { %5125 = vmatprep.mubr.msk.bf16.mxu0 %vm1582_vm0, %v5523_v53 }
  0xee   : > { %v6612_v60 = vpop.permute.xlu1 %717  ;;  %v6614_v63 = vpop.permute.xlu0 %712 }
  0xef   : > { %9269 = vst [vmem:[#allocation29_spill] sm:$0xff] %v6612_v60  ;;  %9270 = vst [vmem:[#allocation30_spill] sm:$0xff] %v6614_v63  ;;  %1017 = vperm.xlu1 %5468, %v446_v54   ;;  %1012 = vperm.xlu0 %5467, %v445_v59   ;;  %v5527_v59 = vld [vmem:[%s9066_s1 + $0x1c0] sm:$0xff]   ;;  %v480_v63 = vld [vmem:[%s9067_s2 + $0x458] sm:$0xff] }
  0xf2   : > { %v6626_v11 = vpop.permute.xlu1 %727  ;;  %v6628_v14 = vpop.permute.xlu0 %722 }
  0xf3   : > { %9271 = vst [vmem:[#allocation31_spill] sm:$0xff] %v6626_v11  ;;  %9272 = vst [vmem:[#allocation32_spill] sm:$0xff] %v6628_v14  ;;  %1097 = vperm.xlu1 %5468, %v462_v4   ;;  %1092 = vperm.xlu0 %5467, %v461_v5   ;;  %v464_v11 = vld [vmem:[%s9067_s2 + $0x3d8] sm:$0xff]  ;;  %v463_v14 = vld [vmem:[%s9067_s2 + $0x3d0] sm:$0xff] }
  0xf4   : > { %5126 = vmatmul.mubr.msk.bf16.gmra.mrb[104].mxu0 %vm1582_vm0, %v5524_v6  ;;  %v432_v6 = vld [vmem:[%s9067_s2 + $0x2d8] sm:$0xff] }
  0xf5   : > { %5129 = vmatprep.mubr.msk.bf16.mxu0 %vm1582_vm0, %v5525_v15  ;;  %v431_v15 = vld [vmem:[%s9067_s2 + $0x2d0] sm:$0xff] }
  0xf6   : > { %v6640_v24 = vpop.permute.xlu1 %737  ;;  %v6642_v29 = vpop.permute.xlu0 %732 }
  0xf7   : > { %867 = vperm.xlu1 %5468, %v416_v20   ;;  %862 = vperm.xlu0 %5467, %v415_v21   ;;  %v6645_v30 = vpop.f32.mrb[0].mxu0 }
  0xf8   : > { %v6653_v43 = vpop.f32.mrb[1].mxu0 }
  0xf9   : > { %v6665_v4 = vpop.f32.mrb[2].mxu0 }
  0xfa   : > { %v6658_v53 = vpop.permute.xlu1 %747  ;;  %v6660_v54 = vpop.permute.xlu0 %742 }
  0xfb   : > { %1177 = vperm.xlu1 %5468, %v478_v31   ;;  %1172 = vperm.xlu0 %5467, %v477_v38   ;;  %v6667_v5 = vpop.f32.mrb[3].mxu0  ;;  %v448_v38 = vld [vmem:[%s9067_s2 + $0x358] sm:$0xff] }
  0xfc   : > { %5130 = vmatmul.mubr.msk.bf16.gmra.mrb[108].mxu0 %vm1582_vm0, %v5526_v44  ;;  %v5528_v44 = vld [vmem:[%s9066_s1 + $0x1c8] sm:$0xff]  }
  0xfd   : > { %5133 = vmatprep.mubr.msk.bf16.mxu0 %vm1582_vm0, %v5527_v59 }
  0xfe   : > { %v6676_v20 = vpop.permute.xlu1 %757  ;;  %v6678_v21 = vpop.permute.xlu0 %752 }
  0xff   : > { %947 = vperm.xlu1 %5468, %v432_v6   ;;  %942 = vperm.xlu0 %5467, %v431_v15   ;;  %v6681_v31 = vpop.f32.mrb[4].mxu0  ;;  %v5529_v6 = vld [vmem:[%s9066_s1 + $0x1d0] sm:$0xff]  }
 0x100   : > { %9273 = vst [vmem:[#allocation33_spill] sm:$0xff] %v6681_v31  ;;  %v6689_v8 = vpop.f32.mrb[5].mxu0  ;;  %v436_v31 = vld [vmem:[%s9067_s2 + $0x2f8] sm:$0xff] }
 0x101   : > { %9274 = vst [vmem:[#allocation34_spill] sm:$0xff] %v6689_v8  ;;  %v6701_v15 = vpop.f32.mrb[6].mxu0 }
 0x102   : > { %v6694_v2 = vpop.permute.xlu1 %767  ;;  %v6696_v59 = vpop.permute.xlu0 %762  ;;  %9275 = vst [vmem:[#allocation35_spill] sm:$0xff] %v6701_v15 }
 0x103   : > { %1027 = vperm.xlu1 %5468, %v448_v38   ;;  %1022 = vperm.xlu0 %5467, %v447_v7   ;;  %v6703_v3 = vpop.f32.mrb[7].mxu0  ;;  %v418_v38 = vld [vmem:[%s9067_s2 + $0x268] sm:$0xff] }
 0x104   : > { %9276 = vst [vmem:[#allocation36_spill] sm:$0xff] %v6703_v3  ;;  %5134 = vmatmul.mubr.msk.bf16.gmra.mrb[112].mxu0 %vm1582_vm0, %v5528_v44  ;;  %v5530_v44 = vld [vmem:[%s9066_s1 + $0x1d8] sm:$0xff]  }
 0x105   : > { %5137 = vmatprep.mubr.msk.bf16.mxu0 %vm1582_vm0, %v5529_v6  ;;  %v5542_v3 = vld [vmem:[%s9066_s1 + $0x238] sm:$0xff]  }
 0x106   : > { %v6712_v55 = vpop.permute.xlu1 %777  ;;  %v6714_v58 = vpop.permute.xlu0 %772 }
 0x107   : > { %9277 = vst [vmem:[#allocation37_spill] sm:$0xff] %v6712_v55  ;;  %9278 = vst [vmem:[#allocation38_spill] sm:$0xff] %v6714_v58  ;;  %1107 = vperm.xlu1 %5468, %v464_v11   ;;  %1102 = vperm.xlu0 %5467, %v463_v14   ;;  %v6717_v7 = vpop.f32.mrb[8].mxu0  ;;  %v5531_v14 = vld [vmem:[%s9066_s1 + $0x1e0] sm:$0xff]  }
 0x108   : > { %9279 = vst [vmem:[#allocation39_spill] sm:$0xff] %v6717_v7  ;;  %v6725_v62 = vpop.f32.mrb[9].mxu0 }
 0x109   : > { %9280 = vst [vmem:[#allocation40_spill] sm:$0xff] %v6725_v62  ;;  %v6737_v6 = vpop.f32.mrb[10].mxu0 }
 0x10a   : > { %v6730_v60 = vpop.permute.xlu1 %787  ;;  %v6732_v11 = vpop.permute.xlu0 %782  ;;  %9283 = vst [vmem:[#allocation43_spill] sm:$0xff] %v6737_v6  ;;  %v433_v6 = vld [vmem:[%s9067_s2 + $0x2e0] sm:$0xff] }
 0x10b   : > { %9281 = vst [vmem:[#allocation41_spill] sm:$0xff] %v6730_v60  ;;  %9282 = vst [vmem:[#allocation42_spill] sm:$0xff] %v6732_v11  ;;  %877 = vperm.xlu1 %5468, %v418_v38   ;;  %872 = vperm.xlu0 %5467, %v417_v61   ;;  %v6739_v7 = vpop.f32.mrb[11].mxu0  ;;  %v434_v38 = vld [vmem:[%s9067_s2 + $0x2e8] sm:$0xff]  ;;  %v420_v60 = vld [vmem:[%s9067_s2 + $0x278] sm:$0xff] }
 0x10c   : > { %9284 = vst [vmem:[#allocation44_spill] sm:$0xff] %v6739_v7  ;;  %5138 = vmatmul.mubr.msk.bf16.gmra.mrb[116].mxu0 %vm1582_vm0, %v5530_v44  ;;  %v5532_v44 = vld [vmem:[%s9066_s1 + $0x1e8] sm:$0xff]   ;;  %v419_v11 = vld [vmem:[%s9067_s2 + $0x270] sm:$0xff] }
 0x10d   : > { %5141 = vmatprep.mubr.msk.bf16.mxu0 %vm1582_vm0, %v5531_v14 }
 0x10e   : > { %v6748_v49 = vpop.permute.xlu1 %797  ;;  %v6750_v56 = vpop.permute.xlu0 %792 }
 0x10f   : > { %9285 = vst [vmem:[#allocation45_spill] sm:$0xff] %v6748_v49  ;;  %9286 = vst [vmem:[#allocation46_spill] sm:$0xff] %v6750_v56  ;;  %1187 = vperm.xlu1 %5468, %v480_v63   ;;  %1182 = vperm.xlu0 %5467, %v479_v48   ;;  %v6753_v61 = vpop.f32.mrb[12].mxu0  ;;  %v5533_v48 = vld [vmem:[%s9066_s1 + $0x1f0] sm:$0xff]  }
 0x110   : > { %9287 = vst [vmem:[#allocation47_spill] sm:$0xff] %v6753_v61  ;;  %v6761_v7 = vpop.f32.mrb[13].mxu0 }
 0x111   : > { %9288 = vst [vmem:[#allocation48_spill] sm:$0xff] %v6761_v7  ;;  %v6773_v14 = vpop.f32.mrb[14].mxu0  ;;  %v450_v7 = vld [vmem:[%s9067_s2 + $0x368] sm:$0xff] }
 0x112   : > { %v6766_v49 = vpop.permute.xlu1 %807  ;;  %v6768_v63 = vpop.permute.xlu0 %802  ;;  %9291 = vst [vmem:[#allocation51_spill] sm:$0xff] %v6773_v14  ;;  %v465_v14 = vld [vmem:[%s9067_s2 + $0x3e0] sm:$0xff] }
 0x113   : > { %9289 = vst [vmem:[#allocation49_spill] sm:$0xff] %v6766_v49  ;;  %9290 = vst [vmem:[#allocation50_spill] sm:$0xff] %v6768_v63  ;;  %957 = vperm.xlu1 %5468, %v434_v38   ;;  %952 = vperm.xlu0 %5467, %v433_v6   ;;  %v6775_v61 = vpop.f32.mrb[15].mxu0  ;;  %v449_v49 = vld [vmem:[%s9067_s2 + $0x360] sm:$0xff]  ;;  %v466_v38 = vld [vmem:[%s9067_s2 + $0x3e8] sm:$0xff] }
 0x114   : > { %9292 = vst [vmem:[#allocation52_spill] sm:$0xff] %v6775_v61  ;;  %5142 = vmatmul.mubr.msk.bf16.gmra.mrb[120].mxu0 %vm1582_vm0, %v5532_v44  ;;  %v5534_v44 = vld [vmem:[%s9066_s1 + $0x1f8] sm:$0xff]  }
 0x115   : > { %5145 = vmatprep.mubr.msk.bf16.mxu0 %vm1582_vm0, %v5533_v48 }
 0x116   : > { %v6784_v63 = vpop.permute.xlu1 %817  ;;  %v6786_v56 = vpop.permute.xlu0 %812 }
 0x117   : > { %1037 = vperm.xlu1 %5468, %v450_v7   ;;  %1032 = vperm.xlu0 %5467, %v449_v49   ;;  %v6789_v6 = vpop.f32.mrb[16].mxu0  ;;  %v5535_v49 = vld [vmem:[%s9066_s1 + $0x200] sm:$0xff]  }
 0x118   : > { %v6797_v61 = vpop.f32.mrb[17].mxu0 }
 0x119   : > { %v6809_v48 = vpop.f32.mrb[18].mxu0 }
 0x11a   : > { %v6802_v62 = vpop.permute.xlu1 %827  ;;  %v6804_v7 = vpop.permute.xlu0 %822 }
 0x11b   : > { %1117 = vperm.xlu1 %5468, %v466_v38   ;;  %1112 = vperm.xlu0 %5467, %v465_v14   ;;  %v6811_v57 = vpop.f32.mrb[19].mxu0  ;;  %v482_v38 = vld [vmem:[%s9067_s2 + $0x468] sm:$0xff] }
 0x11c   : > { %5146 = vmatmul.mubr.msk.bf16.gmra.mrb[124].mxu0 %vm1582_vm0, %v5534_v44  ;;  %v5536_v44 = vld [vmem:[%s9066_s1 + $0x208] sm:$0xff]  }
 0x11d   : > { %5149 = vmatprep.mubr.msk.bf16.mxu0 %vm1582_vm0, %v5535_v49 }
 0x11e   : > { %v6820_v45 = vpop.permute.xlu1 %837  ;;  %v6822_v50 = vpop.permute.xlu0 %832 }
 0x11f   : > { %887 = vperm.xlu1 %5468, %v420_v60   ;;  %882 = vperm.xlu0 %5467, %v419_v11   ;;  %v6825_v14 = vpop.f32.mrb[20].mxu0  ;;  %v5537_v11 = vld [vmem:[%s9066_s1 + $0x210] sm:$0xff]  }
 0x120   : > { %v6833_v40 = vpop.f32.mrb[21].mxu0 }
 0x121   : > { %v6845_v49 = vpop.f32.mrb[22].mxu0 }
 0x122   : > { %v6838_v15 = vpop.permute.xlu1 %847  ;;  %v6840_v60 = vpop.permute.xlu0 %842 }
 0x123   : > { %9293 = vst [vmem:[#allocation53_spill] sm:$0xff] %v6838_v15  ;;  %9294 = vst [vmem:[#allocation54_spill] sm:$0xff] %v6840_v60  ;;  %1197 = vperm.xlu1 %5468, %v482_v38   ;;  %1192 = vperm.xlu0 %5467, %v481_v39   ;;  %v6847_v51 = vpop.f32.mrb[23].mxu0  ;;  %v452_v38 = vld [vmem:[%s9067_s2 + $0x378] sm:$0xff] }
 0x124   : > { %5150 = vmatmul.mubr.msk.bf16.gmra.mrb[128].mxu0 %vm1582_vm0, %v5536_v44  ;;  %v5538_v44 = vld [vmem:[%s9066_s1 + $0x218] sm:$0xff]  }
 0x125   : > { %5153 = vmatprep.mubr.msk.bf16.mxu0 %vm1582_vm0, %v5537_v11 }
 0x126   : > { %v6856_v55 = vpop.permute.xlu1 %892  ;;  %v6858_v58 = vpop.permute.xlu0 %852 }
 0x127   : > { %9295 = vst [vmem:[#allocation55_spill] sm:$0xff] %v6856_v55  ;;  %9296 = vst [vmem:[#allocation56_spill] sm:$0xff] %v6858_v58  ;;  %967 = vperm.xlu1 %5468, %v436_v31   ;;  %962 = vperm.xlu0 %5467, %v435_v52   ;;  %v6861_v39 = vpop.f32.mrb[24].mxu0  ;;  %v5539_v52 = vld [vmem:[%s9066_s1 + $0x220] sm:$0xff]  }
 0x128   : > { %9297 = vst [vmem:[#allocation57_spill] sm:$0xff] %v6861_v39  ;;  %v6869_v35 = vpop.f32.mrb[25].mxu0 }
 0x129   : > { %9298 = vst [vmem:[#allocation58_spill] sm:$0xff] %v6869_v35  ;;  %v6881_v11 = vpop.f32.mrb[26].mxu0 }
 0x12a   : > { %v6874_v58 = vpop.permute.xlu1 %972  ;;  %v6876_v31 = vpop.permute.xlu0 %897  ;;  %9301 = vst [vmem:[#allocation61_spill] sm:$0xff] %v6881_v11  ;;  %v483_v11 = vld [vmem:[%s9067_s2 + $0x470] sm:$0xff] }
 0x12b   : > { %9299 = vst [vmem:[#allocation59_spill] sm:$0xff] %v6874_v58  ;;  %9300 = vst [vmem:[#allocation60_spill] sm:$0xff] %v6876_v31  ;;  %1047 = vperm.xlu1 %5468, %v452_v38   ;;  %1042 = vperm.xlu0 %5467, %v451_v34   ;;  %v6883_v39 = vpop.f32.mrb[27].mxu0  ;;  %v467_v58 = vld [vmem:[%s9067_s2 + $0x3f0] sm:$0xff]  ;;  %v484_v38 = vld [vmem:[%s9067_s2 + $0x478] sm:$0xff] }
 0x12c   : > { %9302 = vst [vmem:[#allocation62_spill] sm:$0xff] %v6883_v39  ;;  %5154 = vmatmul.mubr.msk.bf16.gmra.mrb[132].mxu0 %vm1582_vm0, %v5538_v44  ;;  %v5540_v44 = vld [vmem:[%s9066_s1 + $0x228] sm:$0xff]  }
 0x12d   : > { %5157 = vmatprep.mubr.msk.bf16.mxu0 %vm1582_vm0, %v5539_v52 }
 0x12e   : > { %v6892_v35 = vpop.permute.xlu1 %1052  ;;  %v6894_v33 = vpop.permute.xlu0 %977 }
 0x12f   : > { %9303 = vst [vmem:[#allocation63_spill] sm:$0xff] %v6892_v35  ;;  %9304 = vst [vmem:[#allocation64_spill] sm:$0xff] %v6894_v33  ;;  %1127 = vperm.xlu1 %5468, %v468_v32   ;;  %1122 = vperm.xlu0 %5467, %v467_v58   ;;  %v6897_v34 = vpop.f32.mrb[28].mxu0  ;;  %v5541_v58 = vld [vmem:[%s9066_s1 + $0x230] sm:$0xff]  }
 0x130   : > { %9305 = vst [vmem:[#allocation65_spill] sm:$0xff] %v6897_v34  ;;  %v6905_v39 = vpop.f32.mrb[29].mxu0 }
 0x131   : > { %9306 = vst [vmem:[#allocation66_spill] sm:$0xff] %v6905_v39  ;;  %v6917_v52 = vpop.f32.mrb[30].mxu0 }
 0x132   : > { %v6910_v35 = vpop.permute.xlu1 %1132  ;;  %v6912_v32 = vpop.permute.xlu0 %1057  ;;  %9309 = vst [vmem:[#allocation69_spill] sm:$0xff] %v6917_v52 }
 0x133   : > { %9307 = vst [vmem:[#allocation67_spill] sm:$0xff] %v6910_v35  ;;  %9308 = vst [vmem:[#allocation68_spill] sm:$0xff] %v6912_v32  ;;  %1207 = vperm.xlu1 %5468, %v484_v38   ;;  %1202 = vperm.xlu0 %5467, %v483_v11   ;;  %v6919_v34 = vpop.f32.mrb[31].mxu0 }
 0x134   : > { %9310 = vst [vmem:[#allocation70_spill] sm:$0xff] %v6919_v34  ;;  %5158 = vmatmul.mubr.msk.bf16.gmra.mrb[136].mxu0 %vm1582_vm0, %v5540_v44 }
 0x135   : > { %5161 = vmatprep.mubr.msk.bf16.mxu0 %vm1582_vm0, %v5541_v58 }
 0x136   : > { %v6922_v39 = vpop.permute.xlu1 %902  ;;  %v6924_v33 = vpop.permute.xlu0 %1137 }
 0x137   : > { %9311 = vst [vmem:[#allocation71_spill] sm:$0xff] %v6922_v39  ;;  %9312 = vst [vmem:[#allocation72_spill] sm:$0xff] %v6924_v33  ;;  %v5055_v35 = vpop.f32.mrb[32].mxu0 }
 0x138   : > { %v1961_v32 = vpop.f32.mrb[33].mxu0 }
 0x139   : > { %v5056_v52 = vpop.f32.mrb[34].mxu0 }
 0x13a   : > { %v6930_v38 = vpop.permute.xlu1 %982  ;;  %v6932_v11 = vpop.permute.xlu0 %907 }
 0x13b   : > { %9313 = vst [vmem:[#allocation73_spill] sm:$0xff] %v6930_v38  ;;  %9314 = vst [vmem:[#allocation74_spill] sm:$0xff] %v6932_v11  ;;  %v1964_v34 = vpop.f32.mrb[35].mxu0 }
 0x13c   : > { %5162 = vmatmul.mubr.msk.bf16.gmra.mrb[140].mxu0 %vm1582_vm0, %v5542_v3 }
 0x13e   : > { %v6935_v44 = vpop.permute.xlu1 %1062  ;;  %v6937_v46 = vpop.permute.xlu0 %987 }
 0x13f   : > { %9315 = vst [vmem:[#allocation75_spill] sm:$0xff] %v6935_v44  ;;  %9316 = vst [vmem:[#allocation76_spill] sm:$0xff] %v6937_v46  ;;  %v6939_v33 = vpop.f32.mrb[36].mxu0 }
 0x140   : > { %v6941_v58 = vpop.f32.mrb[37].mxu0 }
 0x141   : > { %v6947_v31 = vpop.f32.mrb[38].mxu0 }
 0x142   : > { %v6943_v8 = vpop.permute.xlu1 %1142  ;;  %v6945_v47 = vpop.permute.xlu0 %1067 }
 0x143   : > { %9317 = vst [vmem:[#allocation77_spill] sm:$0xff] %v6943_v8  ;;  %9318 = vst [vmem:[#allocation78_spill] sm:$0xff] %v6945_v47  ;;  %v6949_v38 = vpop.f32.mrb[39].mxu0  ;;  %v6969_v47 = vadd.f32 %v6797_v61, %v6418_v13 }
 0x145   : > { %9325 = vst [vmem:[#allocation85_spill] sm:$0xff] %v6969_v47 }
 0x146   : > { %v6951_v11 = vpop.permute.xlu1 %912  ;;  %v6953_v55 = vpop.permute.xlu0 %1147 }
 0x147   : > { %9319 = vst [vmem:[#allocation79_spill] sm:$0xff] %v6951_v11  ;;  %9320 = vst [vmem:[#allocation80_spill] sm:$0xff] %v6953_v55  ;;  %v6955_v3 = vpop.f32.mrb[40].mxu0 }
 0x148   : > { %9321 = vst [vmem:[#allocation81_spill] sm:$0xff] %v6955_v3  ;;  %v6957_v44 = vpop.f32.mrb[41].mxu0  ;;  %v6978_v3 = vadd.f32 %v1961_v32, %v6530_v1  ;;  %v6997_v1 = vadd.f32 %v1964_v34, %v6528_v0  ;;  %v7013_v0 = vadd.f32 %v6809_v48, %v6430_v17 }
 0x149   : > { %v6963_v15 = vpop.f32.mrb[42].mxu0 }
 0x14a   : > { %v6959_v46 = vpop.permute.xlu1 %992  ;;  %v6961_v39 = vpop.permute.xlu0 %917  ;;  %9323 = vst [vmem:[#allocation83_spill] sm:$0xff] %v6963_v15  ;;  %9328 = vst [vmem:[#allocation88_spill] sm:$0xff] %v6978_v3  ;;  %v2457_v15 = vsel %vm2408_vm1, %v6969_v47, -inf  ;;  %v2505_v32 = vsel %vm2408_vm1, %v6978_v3, -inf  ;;  %v7003_v47 = vadd.f32 %v6789_v6, %v6432_v18  ;;  %v2508_v3 = vsel %vm2408_vm1, %v6997_v1, -inf }
 0x14b   : > { %9322 = vst [vmem:[#allocation82_spill] sm:$0xff] %v6959_v46  ;;  %v6965_v8 = vpop.f32.mrb[43].mxu0  ;;  %9332 = vst [vmem:[#allocation92_spill] sm:$0xff] %v6997_v1  ;;  %v2466_v48 = vsel %vm2408_vm1, %v7013_v0, -inf  ;;  %v7032_v1 = vadd.f32 %v5055_v35, %v6544_v10 }
 0x14c   : > { %9324 = vst [vmem:[#allocation84_spill] sm:$0xff] %v6965_v8  ;;  %v6986_v8 = vadd.f32 %v6811_v57, %v6416_v12  ;;  %9333 = vst [vmem:[#allocation93_spill] sm:$0xff] %v7003_v47 }
 0x14d   : > { %9334 = vst [vmem:[#allocation94_spill] sm:$0xff] %v7013_v0  ;;  %9337 = vst [vmem:[#allocation97_spill] sm:$0xff] %v7032_v1  ;;  %v2511_v35 = vsel %vm2408_vm1, %v7032_v1, -inf }
 0x14e   : > { %v6971_v60 = vpop.permute.xlu1 %1072  ;;  %v6973_v11 = vpop.permute.xlu0 %997  ;;  %9329 = vst [vmem:[#allocation89_spill] sm:$0xff] %v6986_v8 }
 0x14f   : > { %9326 = vst [vmem:[#allocation86_spill] sm:$0xff] %v6971_v60  ;;  %v6975_v55 = vpop.f32.mrb[44].mxu0 }
 0x150   : > { %9327 = vst [vmem:[#allocation87_spill] sm:$0xff] %v6975_v55  ;;  %v6980_v46 = vpop.f32.mrb[45].mxu0 }
 0x151   : > { %v6992_v60 = vpop.f32.mrb[46].mxu0 }
 0x152   : > { %v6988_v13 = vpop.permute.xlu1 %1152  ;;  %v6990_v61 = vpop.permute.xlu0 %1077  ;;  %2458 = vmax.xlane.f32.xlu0 %v2457_v15  ;;  %9330 = vst [vmem:[#allocation90_spill] sm:$0xff] %v6992_v60  ;;  %v2460_v15 = vsel %vm2408_vm1, %v6986_v8, -inf }
 0x153   : > { %v6994_v55 = vpop.f32.mrb[47].mxu0 }
 0x154   : > { %9331 = vst [vmem:[#allocation91_spill] sm:$0xff] %v6994_v55 }
 0x156   : > { %v7005_v57 = vpop.permute.xlu1 %922  ;;  %v7007_v12 = vpop.permute.xlu0 %1157  ;;  %2506 = vmax.xlane.f32.xlu0 %v2505_v32  ;;  %v2463_v32 = vsel %vm2408_vm1, %v7003_v47, -inf }
 0x157   : > { %2461 = vmax.xlane.f32.xlu1 %v2460_v15  ;;  %v5071_v60 = vpop.f32.mrb[48].mxu0 }
 0x158   : > { %v2025_v34 = vpop.f32.mrb[49].mxu0  ;;  %v7046_v0 = vadd.f32 %v5071_v60, %v6660_v54  ;;  %v7063_v54 = vadd.f32 %v6653_v43, %v6306_v37  ;;  %v7083_v43 = vadd.f32 %v6833_v40, %v6446_v23  ;;  %v7099_v23 = vadd.f32 %v6941_v58, %v6558_v19 }
 0x159   : > { %v7020_v6 = vadd.f32 %v2025_v34, %v6642_v29  ;;  %v5072_v8 = vpop.f32.mrb[50].mxu0 }
 0x15a   : > { %v7017_v18 = vpop.permute.xlu0 %927  ;;  %2509 = vmax.xlane.f32.xlu0 %v2508_v3  ;;  %v7024_v15 = vpop.permute.xlu1 %1002  ;;  %9339 = vst [vmem:[#allocation99_spill] sm:$0xff] %v7046_v0  ;;  %9341 = vst [vmem:[#allocation101_spill] sm:$0xff] %v7063_v54  ;;  %v2559_v60 = vsel %vm2408_vm1, %v7046_v0, -inf }
 0x15b   : > { %9335 = vst [vmem:[#allocation95_spill] sm:$0xff] %v7020_v6  ;;  %2464 = vmax.xlane.f32.xlu1 %v2463_v32  ;;  %v2028_v55 = vpop.f32.mrb[51].mxu0  ;;  %v2553_v3 = vsel %vm2408_vm1, %v7020_v6, -inf  ;;  %v7041_v32 = vadd.f32 %v5056_v52, %v6542_v9  ;;  %v7057_v52 = vadd.f32 %v5072_v8, %v6658_v53  ;;  %v7073_v8 = vadd.f32 %v6667_v5, %v6320_v42 }
 0x15c   : > { %v7027_v17 = vadd.f32 %v2028_v55, %v6640_v24  ;;  %9343 = vst [vmem:[#allocation103_spill] sm:$0xff] %v7083_v43  ;;  %v7093_v5 = vadd.f32 %v6847_v51, %v6444_v22  ;;  %9345 = vst [vmem:[#allocation105_spill] sm:$0xff] %v7099_v23  ;;  %v7111_v51 = vadd.f32 %v6949_v38, %v6556_v16 }
 0x15d   : > { %9338 = vst [vmem:[#allocation98_spill] sm:$0xff] %v7041_v32  ;;  %9340 = vst [vmem:[#allocation100_spill] sm:$0xff] %v7057_v52  ;;  %v2562_v37 = vsel %vm2408_vm1, %v7057_v52, -inf }
 0x15e   : > { %9336 = vst [vmem:[#allocation96_spill] sm:$0xff] %v7027_v17  ;;  %v7034_v29 = vpop.permute.xlu0 %1007  ;;  %2467 = vmax.xlane.f32.xlu0 %v2466_v48  ;;  %v2556_v24 = vsel %vm2408_vm1, %v7027_v17, -inf  ;;  %v7048_v10 = vpop.permute.xlu1 %1082  ;;  %v2514_v17 = vsel %vm2408_vm1, %v7041_v32, -inf  ;;  %9342 = vst [vmem:[#allocation102_spill] sm:$0xff] %v7073_v8  ;;  %v2412_v32 = vsel %vm2408_vm1, %v7073_v8, -inf  ;;  %v2472_v19 = vsel %vm2408_vm1, %v7093_v5, -inf }
 0x15f   : > { %2554 = vmax.xlane.f32.xlu1 %v2553_v3  ;;  %v7038_v34 = vpop.f32.mrb[52].mxu0  ;;  %9344 = vst [vmem:[#allocation104_spill] sm:$0xff] %v7093_v5  ;;  %9347 = vst [vmem:[#allocation107_spill] sm:$0xff] %v7111_v51 }
 0x160   : > { %v2041_v55 = vpop.f32.mrb[53].mxu0 }
 0x161   : > { %v7054_v3 = vpop.f32.mrb[54].mxu0  ;;  %v7118_v58 = vadd.f32 %v2041_v55, %v6678_v21  ;;  %v2520_v21 = vsel %vm2408_vm1, %v7111_v51, -inf }
 0x162   : > { %2557 = vmax.xlane.f32.xlu0 %v2556_v24  ;;  %v7052_v48 = vpop.permute.xlu0 %1087  ;;  %v2044_v9 = vpop.f32.mrb[55].mxu0 }
 0x163   : > { %2512 = vmax.xlane.f32.xlu1 %v2511_v35  ;;  %v7067_v24 = vpop.permute.xlu1 %857  ;;  %9348 = vst [vmem:[#allocation108_spill] sm:$0xff] %v7118_v58  ;;  %v7129_v16 = vadd.f32 %v2044_v9, %v6676_v20  ;;  %v2565_v55 = vsel %vm2408_vm1, %v7118_v58, -inf }
 0x165   : > { %9350 = vst [vmem:[#allocation110_spill] sm:$0xff] %v7129_v16 }
 0x166   : > { %2515 = vmax.xlane.f32.xlu0 %v2514_v17  ;;  %v7075_v53 = vpop.permute.xlu0 %1162  ;;  %v2409_v17 = vsel %vm2408_vm1, %v7063_v54, -inf }
 0x167   : > { %2560 = vmax.xlane.f32.xlu1 %v2559_v60  ;;  %v7069_v1 = vpop.f32.mrb[56].mxu0  ;;  %v7101_v40 = vpop.permute.xlu1 %1167 }
 0x168   : > { %v7077_v35 = vpop.f32.mrb[57].mxu0 }
 0x169   : > { %v7087_v60 = vpop.f32.mrb[58].mxu0 }
 0x16a   : > { %2563 = vmax.xlane.f32.xlu0 %v2562_v37  ;;  %v7089_v42 = vpop.f32.mrb[59].mxu0  ;;  %v2469_v37 = vsel %vm2408_vm1, %v7083_v43, -inf  ;;  %v2568_v43 = vsel %vm2408_vm1, %v7129_v16, -inf  ;;  %v7161_v16 = vadd.f32 %v6645_v30, %v6304_v36 }
 0x16b   : > { %2410 = vmax.xlane.f32.xlu1 %v2409_v17  ;;  %v7105_v17 = vpop.permute.xlu0 %932 }
 0x16c   : > { %9355 = vst [vmem:[#allocation115_spill] sm:$0xff] %v7161_v16 }
 0x16e   : > { %2413 = vmax.xlane.f32.xlu0 %v2412_v32  ;;  %v2517_v32 = vsel %vm2408_vm1, %v7099_v23, -inf }
 0x16f   : > { %2470 = vmax.xlane.f32.xlu1 %v2469_v37  ;;  %v7107_v52 = vpop.f32.mrb[60].mxu0  ;;  %v7124_v37 = vpop.permute.xlu1 %937 }
 0x170   : > { %9346 = vst [vmem:[#allocation106_spill] sm:$0xff] %v7107_v52  ;;  %v7113_v22 = vpop.f32.mrb[61].mxu0  ;;  %v7131_v38 = vpop.permute.xlu0 %1012  ;;  %v9407_v52 = vld [vmem:[#allocation37_spill] sm:$0xff] }
 0x171   : > { %v7122_v0 = vpop.f32.mrb[62].mxu0 }
 0x172   : > { %2473 = vmax.xlane.f32.xlu0 %v2472_v19  ;;  %9349 = vst [vmem:[#allocation109_spill] sm:$0xff] %v7122_v0  ;;  %v7126_v6 = vpop.f32.mrb[63].mxu0  ;;  %v9401_v0 = vld [vmem:[#allocation84_spill] sm:$0xff] }
 0x173   : > { %2518 = vmax.xlane.f32.xlu1 %v2517_v32  ;;  %v7142_v20 = vpop.permute.xlu1 %1017 }
 0x174   : > { %v7144_v9 = vpop.permute.xlu0 %1092 }
 0x176   : > { %2521 = vmax.xlane.f32.xlu0 %v2520_v21 }
 0x177   : > { %2566 = vmax.xlane.f32.xlu1 %v2565_v55  ;;  %v5087_v19 = vpop.f32.mrb[64].mxu0 }
 0x178   : > { %v7138_v32 = vadd.f32 %v5087_v19, %v6804_v7  ;;  %v2089_v5 = vpop.f32.mrb[65].mxu0 }
 0x179   : > { %v7147_v47 = vadd.f32 %v2089_v5, %v6786_v56  ;;  %v5088_v21 = vpop.f32.mrb[66].mxu0  ;;  %v7165_v5 = vpop.permute.xlu1 %1097 }
 0x17a   : > { %9351 = vst [vmem:[#allocation111_spill] sm:$0xff] %v7138_v32  ;;  %2569 = vmax.xlane.f32.xlu0 %v2568_v43  ;;  %v2607_v55 = vsel %vm2408_vm1, %v7138_v32, -inf  ;;  %v7152_v58 = vadd.f32 %v5088_v21, %v6802_v62  ;;  %v2092_v7 = vpop.f32.mrb[67].mxu0  ;;  %v7167_v21 = vpop.permute.xlu0 %862 }
 0x17b   : > { %9352 = vst [vmem:[#allocation112_spill] sm:$0xff] %v7147_v47  ;;  %2608 = vmax.xlane.f32.xlu1 %v2607_v55  ;;  %v7155_v19 = vadd.f32 %v2092_v7, %v6784_v63  ;;  %v2601_v56 = vsel %vm2408_vm1, %v7147_v47, -inf  ;;  %v7171_v63 = vadd.f32 %v6665_v4, %v6318_v41  ;;  %v7189_v4 = vadd.f32 %v6825_v14, %v6460_v28 }
 0x17c   : > { %9353 = vst [vmem:[#allocation113_spill] sm:$0xff] %v7152_v58  ;;  %v2610_v43 = vsel %vm2408_vm1, %v7152_v58, -inf  ;;  %v7207_v28 = vadd.f32 %v6939_v33, %v6572_v26  ;;  %v7227_v26 = vadd.f32 %v7038_v34, %v6696_v59  ;;  %v9366_v59 = vld [vmem:[#allocation54_spill] sm:$0xff] }
 0x17d   : > { %9354 = vst [vmem:[#allocation114_spill] sm:$0xff] %v7155_v19  ;;  %9356 = vst [vmem:[#allocation116_spill] sm:$0xff] %v7171_v63  ;;  %v2604_v7 = vsel %vm2408_vm1, %v7155_v19, -inf  ;;  %v2418_v41 = vsel %vm2408_vm1, %v7171_v63, -inf }
 0x17e   : > { %2611 = vmax.xlane.f32.xlu0 %v2610_v43  ;;  %v2415_v43 = vsel %vm2408_vm1, %v7161_v16, -inf  ;;  %9359 = vst [vmem:[#allocation119_spill] sm:$0xff] %v7189_v4  ;;  %9361 = vst [vmem:[#allocation121_spill] sm:$0xff] %v7207_v28  ;;  %v9388_v16 = vld [vmem:[#allocation36_spill] sm:$0xff] }
 0x17f   : > { %v5091_v62 = vpop.f32.mrb[68].mxu0  ;;  %2602 = vmax.xlane.f32.xlu1 %v2601_v56  ;;  %v7180_v56 = vpop.permute.xlu1 %867  ;;  %9363 = vst [vmem:[#allocation123_spill] sm:$0xff] %v7227_v26 }
 0x180   : > { %v2105_v55 = vpop.f32.mrb[69].mxu0  ;;  %v7244_v34 = vadd.f32 %v5091_v62, %v9366_v59 }
 0x181   : > { %v7176_v36 = vadd.f32 %v2105_v55, %v6822_v50  ;;  %v5092_v30 = vpop.f32.mrb[70].mxu0  ;;  %v7191_v50 = vpop.permute.xlu0 %1172 }
 0x182   : > { %2605 = vmax.xlane.f32.xlu0 %v2604_v7  ;;  %v2108_v32 = vpop.f32.mrb[71].mxu0  ;;  %9367 = vst [vmem:[#allocation54_spill] sm:$0xff] %v7244_v34  ;;  %v2619_v62 = vsel %vm2408_vm1, %v7244_v34, -inf  ;;  %v9375_v34 = vld [vmem:[#allocation74_spill] sm:$0xff] }
 0x183   : > { %9357 = vst [vmem:[#allocation117_spill] sm:$0xff] %v7176_v36  ;;  %2416 = vmax.xlane.f32.xlu1 %v2415_v43  ;;  %v7183_v58 = vadd.f32 %v2108_v32, %v6820_v45  ;;  %v2613_v55 = vsel %vm2408_vm1, %v7176_v36, -inf  ;;  %v7201_v45 = vadd.f32 %v6845_v49, %v6458_v27  ;;  %v7221_v49 = vadd.f32 %v6947_v31, %v6570_v25 }
 0x184   : > { %v7237_v25 = vadd.f32 %v7054_v3, %v6694_v2  ;;  %v9369_v2 = vld [vmem:[#allocation53_spill] sm:$0xff] }
 0x185   : > { %9358 = vst [vmem:[#allocation118_spill] sm:$0xff] %v7183_v58  ;;  %9360 = vst [vmem:[#allocation120_spill] sm:$0xff] %v7201_v45  ;;  %v2616_v32 = vsel %vm2408_vm1, %v7183_v58, -inf  ;;  %v7217_v27 = vpop.permute.xlu0 %942  ;;  %v2478_v33 = vsel %vm2408_vm1, %v7201_v45, -inf  ;;  %v2526_v45 = vsel %vm2408_vm1, %v7221_v49, -inf  ;;  %v7255_v3 = vadd.f32 %v5092_v30, %v9369_v2  ;;  %v9373_v2 = vld [vmem:[#allocation55_spill] sm:$0xff] }
 0x186   : > { %2419 = vmax.xlane.f32.xlu0 %v2418_v41  ;;  %v2475_v41 = vsel %vm2408_vm1, %v7189_v4, -inf  ;;  %9362 = vst [vmem:[#allocation122_spill] sm:$0xff] %v7221_v49  ;;  %9365 = vst [vmem:[#allocation125_spill] sm:$0xff] %v7237_v25  ;;  %v2574_v49 = vsel %vm2408_vm1, %v7237_v25, -inf }
 0x187   : > { %v7195_v7 = vpop.f32.mrb[72].mxu0  ;;  %2614 = vmax.xlane.f32.xlu1 %v2613_v55  ;;  %v7213_v55 = vpop.permute.xlu1 %1177  ;;  %9370 = vst [vmem:[#allocation53_spill] sm:$0xff] %v7255_v3  ;;  %v2622_v30 = vsel %vm2408_vm1, %v7255_v3, -inf }
 0x188   : > { %v7197_v43 = vpop.f32.mrb[73].mxu0 }
 0x189   : > { %v7209_v14 = vpop.f32.mrb[74].mxu0 }
 0x18a   : > { %2617 = vmax.xlane.f32.xlu0 %v2616_v32  ;;  %v7215_v47 = vpop.f32.mrb[75].mxu0  ;;  %v2523_v32 = vsel %vm2408_vm1, %v7207_v28, -inf }
 0x18b   : > { %2476 = vmax.xlane.f32.xlu1 %v2475_v41  ;;  %v7239_v31 = vpop.permute.xlu1 %947 }
 0x18e   : > { %2479 = vmax.xlane.f32.xlu0 %v2478_v33  ;;  %v7246_v33 = vpop.permute.xlu0 %1022 }
 0x18f   : > { %v7231_v19 = vpop.f32.mrb[76].mxu0  ;;  %2524 = vmax.xlane.f32.xlu1 %v2523_v32  ;;  %v2571_v32 = vsel %vm2408_vm1, %v7227_v26, -inf  ;;  %v7261_v59 = vpop.permute.xlu1 %1027  ;;  %v9371_v26 = vld [vmem:[#allocation71_spill] sm:$0xff] }
 0x190   : > { %9364 = vst [vmem:[#allocation124_spill] sm:$0xff] %v7231_v19  ;;  %v7233_v41 = vpop.f32.mrb[77].mxu0 }
 0x191   : > { %v7248_v4 = vpop.f32.mrb[78].mxu0 }
 0x192   : > { %9368 = vst [vmem:[#allocation126_spill] sm:$0xff] %v7248_v4  ;;  %2527 = vmax.xlane.f32.xlu0 %v2526_v45  ;;  %v7252_v28 = vpop.f32.mrb[79].mxu0  ;;  %v7263_v45 = vpop.permute.xlu0 %1102 }
 0x193   : > { %2572 = vmax.xlane.f32.xlu1 %v2571_v32  ;;  %v7278_v23 = vpop.permute.xlu1 %1107 }
 0x196   : > { %2575 = vmax.xlane.f32.xlu0 %v2574_v49 }
 0x197   : > { %v5103_v58 = vpop.f32.mrb[80].mxu0  ;;  %2620 = vmax.xlane.f32.xlu1 %v2619_v62 }
 0x198   : > { %v7266_v51 = vadd.f32 %v5103_v58, %v9371_v26  ;;  %v2153_v32 = vpop.f32.mrb[81].mxu0  ;;  %v9377_v58 = vld [vmem:[#allocation60_spill] sm:$0xff] }
 0x199   : > { %v7271_v63 = vadd.f32 %v2153_v32, %v9373_v2  ;;  %v5104_v49 = vpop.f32.mrb[82].mxu0  ;;  %v7285_v32 = vpop.permute.xlu0 %872 }
 0x19a   : > { %9372 = vst [vmem:[#allocation71_spill] sm:$0xff] %v7266_v51  ;;  %2623 = vmax.xlane.f32.xlu0 %v2622_v30  ;;  %v2655_v25 = vsel %vm2408_vm1, %v7266_v51, -inf  ;;  %v7276_v36 = vadd.f32 %v5104_v49, %v9375_v34  ;;  %v2156_v62 = vpop.f32.mrb[83].mxu0 }
 0x19b   : > { %9374 = vst [vmem:[#allocation55_spill] sm:$0xff] %v7271_v63  ;;  %2656 = vmax.xlane.f32.xlu1 %v2655_v25  ;;  %v7281_v26 = vadd.f32 %v2156_v62, %v9377_v58  ;;  %v2649_v30 = vsel %vm2408_vm1, %v7271_v63, -inf  ;;  %v9380_v62 = vld [vmem:[#allocation79_spill] sm:$0xff] }
 0x19c   : > { %9376 = vst [vmem:[#allocation74_spill] sm:$0xff] %v7276_v36  ;;  %v2658_v3 = vsel %vm2408_vm1, %v7276_v36, -inf  ;;  %v7299_v36 = vpop.permute.xlu1 %877 }
 0x19d   : > { %9378 = vst [vmem:[#allocation60_spill] sm:$0xff] %v7281_v26  ;;  %v2652_v49 = vsel %vm2408_vm1, %v7281_v26, -inf }
 0x19e   : > { %2659 = vmax.xlane.f32.xlu0 %v2658_v3 }
 0x19f   : > { %v5107_v2 = vpop.f32.mrb[84].mxu0  ;;  %2650 = vmax.xlane.f32.xlu1 %v2649_v30 }
 0x1a0   : > { %v7290_v34 = vadd.f32 %v5107_v2, %v7005_v57  ;;  %v2169_v25 = vpop.f32.mrb[85].mxu0  ;;  %v7304_v57 = vpop.permute.xlu0 %1182 }
 0x1a1   : > { %v7295_v58 = vadd.f32 %v2169_v25, %v9380_v62  ;;  %v5108_v51 = vpop.f32.mrb[86].mxu0  ;;  %v9384_v62 = vld [vmem:[#allocation6_spill] sm:$0xff] }
 0x1a2   : > { %9379 = vst [vmem:[#allocation127_spill] sm:$0xff] %v7290_v34  ;;  %2653 = vmax.xlane.f32.xlu0 %v2652_v49  ;;  %v2667_v3 = vsel %vm2408_vm1, %v7290_v34, -inf  ;;  %v7302_v63 = vadd.f32 %v5108_v51, %v7017_v18  ;;  %v2172_v30 = vpop.f32.mrb[87].mxu0  ;;  %v9385_v49 = vld [vmem:[#allocation34_spill] sm:$0xff] }
 0x1a3   : > { %9381 = vst [vmem:[#allocation79_spill] sm:$0xff] %v7295_v58  ;;  %2668 = vmax.xlane.f32.xlu1 %v2667_v3  ;;  %v7307_v2 = vadd.f32 %v2172_v30, %v6961_v39  ;;  %v7313_v26 = vadd.f32 %v9385_v49, %v9384_v62  ;;  %v2661_v34 = vsel %vm2408_vm1, %v7295_v58, -inf  ;;  %v9387_v3 = vld [vmem:[#allocation5_spill] sm:$0xff]  ;;  %v7325_v30 = vpop.permute.xlu1 %1187  ;;  %v9390_v62 = vld [vmem:[#allocation18_spill] sm:$0xff] }
 0x1a4   : > { %9382 = vst [vmem:[#allocation128_spill] sm:$0xff] %v7302_v63  ;;  %v2670_v25 = vsel %vm2408_vm1, %v7302_v63, -inf  ;;  %v7323_v39 = vadd.f32 %v9388_v16, %v9387_v3  ;;  %v9391_v49 = vld [vmem:[#allocation58_spill] sm:$0xff]  ;;  %v7333_v8 = vpop.permute.xlu0 %952  ;;  %v9393_v16 = vld [vmem:[#allocation17_spill] sm:$0xff] }
 0x1a5   : > { %9383 = vst [vmem:[#allocation129_spill] sm:$0xff] %v7307_v2  ;;  %9386 = vst [vmem:[#allocation6_spill] sm:$0xff] %v7313_v26  ;;  %v2664_v63 = vsel %vm2408_vm1, %v7307_v2, -inf  ;;  %v9394_v3 = vld [vmem:[#allocation62_spill] sm:$0xff] }
 0x1a6   : > { %2671 = vmax.xlane.f32.xlu0 %v2670_v25  ;;  %9389 = vst [vmem:[#allocation34_spill] sm:$0xff] %v7323_v39  ;;  %v7331_v25 = vadd.f32 %v9391_v49, %v9390_v62  ;;  %v7343_v4 = vadd.f32 %v9394_v3, %v9393_v16  ;;  %v2424_v2 = vsel %vm2408_vm1, %v7323_v39, -inf  ;;  %v9396_v62 = vld [vmem:[#allocation26_spill] sm:$0xff]  ;;  %v9400_v3 = vld [vmem:[#allocation25_spill] sm:$0xff] }
 0x1a7   : > { %v7317_v18 = vpop.f32.mrb[88].mxu0  ;;  %2662 = vmax.xlane.f32.xlu1 %v2661_v34  ;;  %v2421_v34 = vsel %vm2408_vm1, %v7313_v26, -inf  ;;  %v7349_v49 = vadd.f32 %v6957_v44, %v9396_v62  ;;  %v7353_v19 = vpop.permute.xlu1 %957  ;;  %v7363_v39 = vadd.f32 %v9401_v0, %v9400_v3  ;;  %v7379_v0 = vadd.f32 %v7089_v42, %v9407_v52  ;;  %v9413_v42 = vld [vmem:[#allocation59_spill] sm:$0xff] }
 0x1a8   : > { %v7319_v51 = vpop.f32.mrb[89].mxu0  ;;  %9392 = vst [vmem:[#allocation5_spill] sm:$0xff] %v7331_v25  ;;  %9395 = vst [vmem:[#allocation36_spill] sm:$0xff] %v7343_v4  ;;  %v2484_v44 = vsel %vm2408_vm1, %v7343_v4, -inf }
 0x1a9   : > { %v7335_v58 = vpop.f32.mrb[90].mxu0  ;;  %9397 = vst [vmem:[#allocation18_spill] sm:$0xff] %v7349_v49  ;;  %9402 = vst [vmem:[#allocation62_spill] sm:$0xff] %v7363_v39  ;;  %v2532_v4 = vsel %vm2408_vm1, %v7363_v39, -inf  ;;  %v2580_v52 = vsel %vm2408_vm1, %v7379_v0, -inf  ;;  %v9415_v39 = vld [vmem:[#allocation76_spill] sm:$0xff] }
 0x1aa   : > { %2665 = vmax.xlane.f32.xlu0 %v2664_v63  ;;  %v7339_v54 = vpop.f32.mrb[91].mxu0  ;;  %v2481_v63 = vsel %vm2408_vm1, %v7331_v25, -inf }
 0x1ab   : > { %2422 = vmax.xlane.f32.xlu1 %v2421_v34  ;;  %v7357_v34 = vpop.permute.xlu0 %1032  ;;  %v7381_v3 = vpop.permute.xlu1 %1037 }
 0x1ac   : > { %9399 = vst [vmem:[#allocation17_spill] sm:$0xff] %v7357_v34  ;;  %9409 = vst [vmem:[#allocation37_spill] sm:$0xff] %v7381_v3 }
 0x1ae   : > { %2425 = vmax.xlane.f32.xlu0 %v2424_v2  ;;  %v9403_v2 = vld [vmem:[#allocation38_spill] sm:$0xff] }
 0x1af   : > { %v7355_v26 = vpop.f32.mrb[92].mxu0  ;;  %2482 = vmax.xlane.f32.xlu1 %v2481_v63  ;;  %v7369_v62 = vadd.f32 %v7077_v35, %v9403_v2  ;;  %v2529_v63 = vsel %vm2408_vm1, %v7349_v49, -inf  ;;  %9408 = vst [vmem:[#allocation38_spill] sm:$0xff] %v7379_v0  ;;  %v7385_v35 = vpop.permute.xlu0 %1112  ;;  %v9411_v49 = vld [vmem:[#allocation73_spill] sm:$0xff]  ;;  %v9418_v0 = vld [vmem:[#allocation64_spill] sm:$0xff] }
 0x1b0   : > { %9398 = vst [vmem:[#allocation58_spill] sm:$0xff] %v7355_v26  ;;  %v7359_v16 = vpop.f32.mrb[93].mxu0  ;;  %9410 = vst [vmem:[#allocation130_spill] sm:$0xff] %v7385_v35 }
 0x1b1   : > { %9404 = vst [vmem:[#allocation26_spill] sm:$0xff] %v7369_v62  ;;  %v7371_v25 = vpop.f32.mrb[94].mxu0 }
 0x1b2   : > { %9405 = vst [vmem:[#allocation25_spill] sm:$0xff] %v7371_v25  ;;  %2485 = vmax.xlane.f32.xlu0 %v2484_v44  ;;  %v7375_v26 = vpop.f32.mrb[95].mxu0  ;;  %v2577_v44 = vsel %vm2408_vm1, %v7369_v62, -inf }
 0x1b3   : > { %9406 = vst [vmem:[#allocation84_spill] sm:$0xff] %v7375_v26  ;;  %2530 = vmax.xlane.f32.xlu1 %v2529_v63 }
 0x1b6   : > { %2533 = vmax.xlane.f32.xlu0 %v2532_v4 }
 0x1b7   : > { %v5119_v2 = vpop.f32.mrb[96].mxu0  ;;  %2578 = vmax.xlane.f32.xlu1 %v2577_v44  ;;  %v7402_v44 = vpop.permute.xlu1 %1117 }
 0x1b8   : > { %v7390_v25 = vadd.f32 %v5119_v2, %v9411_v49  ;;  %v2217_v63 = vpop.f32.mrb[97].mxu0  ;;  %v7404_v49 = vpop.permute.xlu0 %882 }
 0x1b9   : > { %v5120_v34 = vpop.f32.mrb[98].mxu0  ;;  %v7395_v3 = vadd.f32 %v2217_v63, %v9413_v42  ;;  %9417 = vst [vmem:[#allocation131_spill] sm:$0xff] %v7404_v49 }
 0x1ba   : > { %9412 = vst [vmem:[#allocation73_spill] sm:$0xff] %v7390_v25  ;;  %v7398_v26 = vadd.f32 %v5120_v34, %v9415_v39  ;;  %2581 = vmax.xlane.f32.xlu0 %v2580_v52  ;;  %v2220_v4 = vpop.f32.mrb[99].mxu0  ;;  %v2703_v62 = vsel %vm2408_vm1, %v7390_v25, -inf }
 0x1bb   : > { %9414 = vst [vmem:[#allocation59_spill] sm:$0xff] %v7395_v3  ;;  %2704 = vmax.xlane.f32.xlu1 %v2703_v62  ;;  %v7409_v35 = vadd.f32 %v2220_v4, %v9418_v0  ;;  %v2697_v39 = vsel %vm2408_vm1, %v7395_v3, -inf  ;;  %v7416_v42 = vpop.permute.xlu1 %887  ;;  %v9423_v0 = vld [vmem:[#allocation82_spill] sm:$0xff] }
 0x1bc   : > { %9416 = vst [vmem:[#allocation76_spill] sm:$0xff] %v7398_v26  ;;  %v2706_v2 = vsel %vm2408_vm1, %v7398_v26, -inf  ;;  %9421 = vst [vmem:[#allocation133_spill] sm:$0xff] %v7416_v42  ;;  %v7420_v26 = vpop.permute.xlu0 %1192 }
 0x1bd   : > { %9419 = vst [vmem:[#allocation64_spill] sm:$0xff] %v7409_v35  ;;  %v2700_v25 = vsel %vm2408_vm1, %v7409_v35, -inf  ;;  %9422 = vst [vmem:[#allocation134_spill] sm:$0xff] %v7420_v26  ;;  %v9427_v35 = vld [vmem:[#allocation56_spill] sm:$0xff] }
 0x1be   : > { %2707 = vmax.xlane.f32.xlu0 %v2706_v2  ;;  %v7437_v26 = vadd.f32 %v7197_v43, %v9427_v35  ;;  %v7459_v35 = vadd.f32 %v7319_v51, %v7105_v17 }
 0x1bf   : > { %v5123_v34 = vpop.f32.mrb[100].mxu0  ;;  %2698 = vmax.xlane.f32.xlu1 %v2697_v39 }
 0x1c0   : > { %v7414_v63 = vadd.f32 %v5123_v34, %v7024_v15  ;;  %v2233_v52 = vpop.f32.mrb[101].mxu0  ;;  %9428 = vst [vmem:[#allocation56_spill] sm:$0xff] %v7437_v26  ;;  %9432 = vst [vmem:[#allocation140_spill] sm:$0xff] %v7459_v35 }
 0x1c1   : > { %v5124_v62 = vpop.f32.mrb[102].mxu0  ;;  %v7423_v4 = vadd.f32 %v2233_v52, %v9423_v0 }
 0x1c2   : > { %9420 = vst [vmem:[#allocation132_spill] sm:$0xff] %v7414_v63  ;;  %v7426_v2 = vadd.f32 %v5124_v62, %v7034_v29  ;;  %2701 = vmax.xlane.f32.xlu0 %v2700_v25  ;;  %v2236_v39 = vpop.f32.mrb[103].mxu0  ;;  %v2715_v15 = vsel %vm2408_vm1, %v7414_v63, -inf  ;;  %v7441_v25 = vpop.permute.xlu1 %1197  ;;  %v9436_v63 = vld [vmem:[#allocation33_spill] sm:$0xff] }
 0x1c3   : > { %9424 = vst [vmem:[#allocation82_spill] sm:$0xff] %v7423_v4  ;;  %2716 = vmax.xlane.f32.xlu1 %v2715_v15  ;;  %v7433_v3 = vadd.f32 %v2236_v39, %v6973_v11  ;;  %v2709_v29 = vsel %vm2408_vm1, %v7423_v4, -inf  ;;  %9429 = vst [vmem:[#allocation137_spill] sm:$0xff] %v7441_v25  ;;  %v7445_v62 = vpop.permute.xlu0 %962  ;;  %v7451_v11 = vadd.f32 %v7215_v47, %v7067_v24  ;;  %v9445_v4 = vld [vmem:[#allocation57_spill] sm:$0xff] }
 0x1c4   : > { %9425 = vst [vmem:[#allocation135_spill] sm:$0xff] %v7426_v2  ;;  %v2718_v34 = vsel %vm2408_vm1, %v7426_v2, -inf  ;;  %9430 = vst [vmem:[#allocation138_spill] sm:$0xff] %v7445_v62  ;;  %v7469_v47 = vadd.f32 %v7339_v54, %v7124_v37  ;;  %v9435_v2 = vld [vmem:[#allocation8_spill] sm:$0xff]  ;;  %v9440_v54 = vld [vmem:[#allocation7_spill] sm:$0xff] }
 0x1c5   : > { %9426 = vst [vmem:[#allocation136_spill] sm:$0xff] %v7433_v3  ;;  %9431 = vst [vmem:[#allocation139_spill] sm:$0xff] %v7451_v11  ;;  %v2712_v43 = vsel %vm2408_vm1, %v7433_v3, -inf  ;;  %v2628_v24 = vsel %vm2408_vm1, %v7451_v11, -inf  ;;  %v7475_v17 = vadd.f32 %v9436_v63, %v9435_v2  ;;  %v9441_v37 = vld [vmem:[#allocation35_spill] sm:$0xff]  ;;  %v9444_v2 = vld [vmem:[#allocation20_spill] sm:$0xff] }
 0x1c6   : > { %2719 = vmax.xlane.f32.xlu0 %v2718_v34  ;;  %v2625_v34 = vsel %vm2408_vm1, %v7437_v26, -inf  ;;  %9434 = vst [vmem:[#allocation142_spill] sm:$0xff] %v7469_v47  ;;  %v7487_v3 = vadd.f32 %v9441_v37, %v9440_v54  ;;  %v2676_v63 = vsel %vm2408_vm1, %v7469_v47, -inf  ;;  %v9449_v37 = vld [vmem:[#allocation19_spill] sm:$0xff] }
 0x1c7   : > { %v7443_v52 = vpop.f32.mrb[104].mxu0  ;;  %2710 = vmax.xlane.f32.xlu1 %v2709_v29  ;;  %v7465_v29 = vpop.permute.xlu1 %967  ;;  %9437 = vst [vmem:[#allocation8_spill] sm:$0xff] %v7475_v17 }
 0x1c8   : > { %v7447_v0 = vpop.f32.mrb[105].mxu0  ;;  %9433 = vst [vmem:[#allocation141_spill] sm:$0xff] %v7465_v29  ;;  %v7477_v51 = vpop.permute.xlu0 %1042  ;;  %9442 = vst [vmem:[#allocation7_spill] sm:$0xff] %v7487_v3  ;;  %v2430_v47 = vsel %vm2408_vm1, %v7487_v3, -inf  ;;  %v9455_v29 = vld [vmem:[#allocation63_spill] sm:$0xff] }
 0x1c9   : > { %v7453_v39 = vpop.f32.mrb[106].mxu0  ;;  %9438 = vst [vmem:[#allocation33_spill] sm:$0xff] %v7477_v51 }
 0x1ca   : > { %2713 = vmax.xlane.f32.xlu0 %v2712_v43  ;;  %v7461_v15 = vpop.f32.mrb[107].mxu0  ;;  %v2673_v43 = vsel %vm2408_vm1, %v7459_v35, -inf }
 0x1cb   : > { %2626 = vmax.xlane.f32.xlu1 %v2625_v34 }
 0x1cc   : > { %v7503_v54 = vpop.permute.xlu0 %1122 }
 0x1cd   : > { %9448 = vst [vmem:[#allocation144_spill] sm:$0xff] %v7503_v54 }
 0x1ce   : > { %2629 = vmax.xlane.f32.xlu0 %v2628_v24  ;;  %v7495_v24 = vadd.f32 %v9445_v4, %v9444_v2  ;;  %v9452_v2 = vld [vmem:[#allocation75_spill] sm:$0xff] }
 0x1cf   : > { %v7481_v34 = vpop.f32.mrb[108].mxu0  ;;  %2674 = vmax.xlane.f32.xlu1 %v2673_v43  ;;  %v2427_v43 = vsel %vm2408_vm1, %v7475_v17, -inf }
 0x1d0   : > { %9439 = vst [vmem:[#allocation143_spill] sm:$0xff] %v7481_v34  ;;  %v7483_v26 = vpop.f32.mrb[109].mxu0  ;;  %9446 = vst [vmem:[#allocation20_spill] sm:$0xff] %v7495_v24  ;;  %v7501_v34 = vpop.permute.xlu1 %1047  ;;  %v2487_v4 = vsel %vm2408_vm1, %v7495_v24, -inf  ;;  %v9459_v24 = vld [vmem:[#allocation68_spill] sm:$0xff] }
 0x1d1   : > { %v7489_v11 = vpop.f32.mrb[110].mxu0  ;;  %9447 = vst [vmem:[#allocation57_spill] sm:$0xff] %v7501_v34 }
 0x1d2   : > { %9443 = vst [vmem:[#allocation35_spill] sm:$0xff] %v7489_v11  ;;  %2677 = vmax.xlane.f32.xlu0 %v2676_v63  ;;  %v7497_v35 = vpop.f32.mrb[111].mxu0  ;;  %v9450_v11 = vld [vmem:[#allocation61_spill] sm:$0xff] }
 0x1d3   : > { %2428 = vmax.xlane.f32.xlu1 %v2427_v43  ;;  %v7507_v51 = vadd.f32 %v9450_v11, %v9449_v37  ;;  %v7520_v37 = vpop.permute.xlu0 %1202 }
 0x1d4   : > { %v7516_v43 = vpop.permute.xlu1 %1127 }
 0x1d5   : > { %9451 = vst [vmem:[#allocation19_spill] sm:$0xff] %v7507_v51  ;;  %9454 = vst [vmem:[#allocation75_spill] sm:$0xff] %v7516_v43  ;;  %v2490_v11 = vsel %vm2408_vm1, %v7507_v51, -inf }
 0x1d6   : > { %2431 = vmax.xlane.f32.xlu0 %v2430_v47  ;;  %v9457_v47 = vld [vmem:[#allocation78_spill] sm:$0xff] }
 0x1d7   : > { %v5135_v63 = vpop.f32.mrb[112].mxu0  ;;  %2488 = vmax.xlane.f32.xlu1 %v2487_v4 }
 0x1d8   : > { %v7514_v17 = vadd.f32 %v5135_v63, %v9452_v2  ;;  %v2281_v34 = vpop.f32.mrb[113].mxu0 }
 0x1d9   : > { %v5136_v54 = vpop.f32.mrb[114].mxu0  ;;  %v7523_v3 = vadd.f32 %v2281_v34, %v9455_v29  ;;  %v7537_v34 = vpop.permute.xlu1 %1207 }
 0x1da   : > { %9453 = vst [vmem:[#allocation61_spill] sm:$0xff] %v7514_v17  ;;  %v7526_v62 = vadd.f32 %v5136_v54, %v9457_v47  ;;  %2491 = vmax.xlane.f32.xlu0 %v2490_v11  ;;  %v2284_v4 = vpop.f32.mrb[115].mxu0  ;;  %v2751_v63 = vsel %vm2408_vm1, %v7514_v17, -inf }
 0x1db   : > { %9456 = vst [vmem:[#allocation63_spill] sm:$0xff] %v7523_v3  ;;  %2752 = vmax.xlane.f32.xlu1 %v2751_v63  ;;  %v7533_v43 = vadd.f32 %v2284_v4, %v9459_v24  ;;  %v2745_v29 = vsel %vm2408_vm1, %v7523_v3, -inf }
 0x1dc   : > { %9458 = vst [vmem:[#allocation78_spill] sm:$0xff] %v7526_v62  ;;  %v2754_v2 = vsel %vm2408_vm1, %v7526_v62, -inf  ;;  %v9462_v62 = vld [vmem:[#allocation86_spill] sm:$0xff] }
 0x1dd   : > { %9460 = vst [vmem:[#allocation68_spill] sm:$0xff] %v7533_v43  ;;  %v2748_v17 = vsel %vm2408_vm1, %v7533_v43, -inf }
 0x1de   : > { %2755 = vmax.xlane.f32.xlu0 %v2754_v2 }
 0x1df   : > { %v2459_v51 = vpop.xlane.xlu0 %2458  ;;  %v5139_v54 = vpop.f32.mrb[116].mxu0  ;;  %2746 = vmax.xlane.f32.xlu1 %v2745_v29 }
 0x1e0   : > { %v7540_v11 = vadd.f32 %v5139_v54, %v7048_v10  ;;  %v2297_v47 = vpop.f32.mrb[117].mxu0 }
 0x1e1   : > { %v5140_v63 = vpop.f32.mrb[118].mxu0  ;;  %v7545_v24 = vadd.f32 %v2297_v47, %v9462_v62  ;;  %v9466_v62 = vld [vmem:[#allocation28_spill] sm:$0xff]  ;;  %v9467_v47 = vld [vmem:[#allocation81_spill] sm:$0xff] }
 0x1e2   : > { %9461 = vst [vmem:[#allocation145_spill] sm:$0xff] %v7540_v11  ;;  %v7548_v4 = vadd.f32 %v5140_v63, %v7052_v48  ;;  %2749 = vmax.xlane.f32.xlu0 %v2748_v17  ;;  %v2300_v3 = vpop.f32.mrb[119].mxu0  ;;  %v2763_v29 = vsel %vm2408_vm1, %v7540_v11, -inf  ;;  %v7559_v42 = vadd.f32 %v9467_v47, %v9466_v62 }
 0x1e3   : > { %9463 = vst [vmem:[#allocation86_spill] sm:$0xff] %v7545_v24  ;;  %v2507_v2 = vpop.xlane.xlu0 %2506  ;;  %2764 = vmax.xlane.f32.xlu1 %v2763_v29  ;;  %v7555_v43 = vadd.f32 %v2300_v3, %v6990_v61  ;;  %v2757_v17 = vsel %vm2408_vm1, %v7545_v24, -inf  ;;  %v9469_v29 = vld [vmem:[#allocation27_spill] sm:$0xff] }
 0x1e4   : > { %9464 = vst [vmem:[#allocation146_spill] sm:$0xff] %v7548_v4  ;;  %v2841_v25 = vmax.f32 %v2459_v51, %v2507_v2  ;;  %v2462_v10 = vpop.xlane.xlu1 %2461  ;;  %v2766_v54 = vsel %vm2408_vm1, %v7548_v4, -inf  ;;  %9468 = vst [vmem:[#allocation28_spill] sm:$0xff] %v7559_v42  ;;  %v9470_v4 = vld [vmem:[#allocation83_spill] sm:$0xff]  ;;  %v2535_v47 = vsel %vm2408_vm1, %v7559_v42, -inf }
 0x1e5   : > { %9465 = vst [vmem:[#allocation147_spill] sm:$0xff] %v7555_v43  ;;  %v7567_v49 = vadd.f32 %v9470_v4, %v9469_v29  ;;  %v2760_v3 = vsel %vm2408_vm1, %v7555_v43, -inf  ;;  %v7583_v4 = vadd.f32 %v7461_v15, %v7142_v20  ;;  %v9474_v43 = vld [vmem:[#allocation42_spill] sm:$0xff] }
 0x1e6   : > { %2767 = vmax.xlane.f32.xlu0 %v2766_v54  ;;  %v7575_v54 = vadd.f32 %v7447_v0, %v7131_v38  ;;  %v7589_v38 = vadd.f32 %v7069_v1, %v9474_v43 }
 0x1e7   : > { %v2510_v48 = vpop.xlane.xlu0 %2509  ;;  %v7563_v51 = vpop.f32.mrb[120].mxu0  ;;  %2758 = vmax.xlane.f32.xlu1 %v2757_v17  ;;  %9471 = vst [vmem:[#allocation81_spill] sm:$0xff] %v7567_v49  ;;  %9473 = vst [vmem:[#allocation83_spill] sm:$0xff] %v7583_v4  ;;  %v2538_v29 = vsel %vm2408_vm1, %v7567_v49, -inf  ;;  %v2724_v43 = vsel %vm2408_vm1, %v7583_v4, -inf }
 0x1e8   : > { %v2842_v63 = vmax.f32 %v2462_v10, %v2510_v48  ;;  %v2465_v11 = vpop.xlane.xlu1 %2464  ;;  %v2313_v2 = vpop.f32.mrb[121].mxu0  ;;  %9472 = vst [vmem:[#allocation27_spill] sm:$0xff] %v7575_v54  ;;  %9475 = vst [vmem:[#allocation42_spill] sm:$0xff] %v7589_v38 }
 0x1e9   : > { %v7569_v61 = vpop.f32.mrb[122].mxu0 }
 0x1ea   : > { %2761 = vmax.xlane.f32.xlu0 %v2760_v3  ;;  %v2316_v10 = vpop.f32.mrb[123].mxu0  ;;  %v2721_v3 = vsel %vm2408_vm1, %v7575_v54, -inf }
 0x1eb   : > { %v2468_v62 = vpop.xlane.xlu0 %2467  ;;  %2536 = vmax.xlane.f32.xlu1 %v2535_v47 }
 0x1ec   : > { %v2555_v48 = vpop.xlane.xlu1 %2554 }
 0x1ed   : > { %v7579_v17 = vmax.f32 %v2841_v25, %v2555_v48  ;;  %v9476_v48 = vld [vmem:[#allocation41_spill] sm:$0xff] }
 0x1ee   : > { %2539 = vmax.xlane.f32.xlu0 %v2538_v29  ;;  %v7601_v49 = vadd.f32 %v7087_v60, %v9476_v48  ;;  %v7608_v29 = vadd.f32 %v2313_v2, %v7144_v9  ;;  %v7617_v48 = vadd.f32 %v2316_v10, %v7165_v5 }
 0x1ef   : > { %v2558_v0 = vpop.xlane.xlu0 %2557  ;;  %v7595_v47 = vpop.f32.mrb[124].mxu0  ;;  %2722 = vmax.xlane.f32.xlu1 %v2721_v3 }
 0x1f0   : > { %v7593_v24 = vmax.f32 %v2842_v63, %v2558_v0  ;;  %v2513_v25 = vpop.xlane.xlu1 %2512  ;;  %v7597_v15 = vpop.f32.mrb[125].mxu0  ;;  %9477 = vst [vmem:[#allocation41_spill] sm:$0xff] %v7601_v49  ;;  %9478 = vst [vmem:[#allocation148_spill] sm:$0xff] %v7608_v29  ;;  %v2586_v42 = vsel %vm2408_vm1, %v7601_v49, -inf  ;;  %v2769_v2 = vsel %vm2408_vm1, %v7608_v29, -inf  ;;  %v2772_v10 = vsel %vm2408_vm1, %v7617_v48, -inf }
 0x1f1   : > { %v2843_v20 = vmax.f32 %v2465_v11, %v2513_v25  ;;  %v7603_v1 = vpop.f32.mrb[126].mxu0  ;;  %v2583_v11 = vsel %vm2408_vm1, %v7589_v38, -inf  ;;  %9479 = vst [vmem:[#allocation149_spill] sm:$0xff] %v7617_v48  ;;  %v9486_v29 = vld [vmem:[#allocation72_spill] sm:$0xff] }
 0x1f2   : > { %2725 = vmax.xlane.f32.xlu0 %v2724_v43  ;;  %v7610_v0 = vpop.f32.mrb[127].mxu0 }
 0x1f3   : > { %v2516_v63 = vpop.xlane.xlu0 %2515  ;;  %2584 = vmax.xlane.f32.xlu1 %v2583_v11 }
 0x1f4   : > { %v2844_v3 = vmax.f32 %v2468_v62, %v2516_v63  ;;  %v2561_v25 = vpop.xlane.xlu1 %2560  ;;  %v9480_v63 = vld [vmem:[#allocation77_spill] sm:$0xff] }
 0x1f5   : > { %v7614_v60 = vmax.f32 %v2843_v20, %v2561_v25  ;;  %v9482_v25 = vld [vmem:[#allocation67_spill] sm:$0xff] }
 0x1f6   : > { %2587 = vmax.xlane.f32.xlu0 %v2586_v42  ;;  %v9484_v42 = vld [vmem:[#allocation80_spill] sm:$0xff] }
 0x1f7   : > { %v2564_v9 = vpop.xlane.xlu0 %2563  ;;  %v5151_v62 = vpop.f32.mrb[128].mxu0  ;;  %2770 = vmax.xlane.f32.xlu1 %v2769_v2 }
 0x1f8   : > { %v7623_v43 = vmax.f32 %v2844_v3, %v2564_v9  ;;  %v7625_v4 = vpop.xlane.xlu1 %2410  ;;  %v7628_v20 = vadd.f32 %v5151_v62, %v9480_v63  ;;  %v2345_v11 = vpop.f32.mrb[129].mxu0 }
 0x1f9   : > { %v5152_v5 = vpop.f32.mrb[130].mxu0  ;;  %v7633_v49 = vadd.f32 %v2345_v11, %v9482_v25 }
 0x1fa   : > { %9481 = vst [vmem:[#allocation77_spill] sm:$0xff] %v7628_v20  ;;  %v7636_v38 = vadd.f32 %v5152_v5, %v9484_v42  ;;  %2773 = vmax.xlane.f32.xlu0 %v2772_v10  ;;  %v2348_v9 = vpop.f32.mrb[131].mxu0  ;;  %v2799_v2 = vsel %vm2408_vm1, %v7628_v20, -inf }
 0x1fb   : > { %9483 = vst [vmem:[#allocation67_spill] sm:$0xff] %v7633_v49  ;;  %v7638_v3 = vpop.xlane.xlu0 %2413  ;;  %2800 = vmax.xlane.f32.xlu1 %v2799_v2  ;;  %v7645_v48 = vadd.f32 %v2348_v9, %v9486_v29  ;;  %v2793_v5 = vsel %vm2408_vm1, %v7633_v49, -inf }
 0x1fc   : > { %9485 = vst [vmem:[#allocation80_spill] sm:$0xff] %v7636_v38  ;;  %v2471_v62 = vpop.xlane.xlu1 %2470  ;;  %v2802_v63 = vsel %vm2408_vm1, %v7636_v38, -inf }
 0x1fd   : > { %9487 = vst [vmem:[#allocation72_spill] sm:$0xff] %v7645_v48  ;;  %v2796_v38 = vsel %vm2408_vm1, %v7645_v48, -inf }
 0x1fe   : > { %2803 = vmax.xlane.f32.xlu0 %v2802_v63 }
 0x1ff   : > { %v2474_v11 = vpop.xlane.xlu0 %2473  ;;  %v5155_v25 = vpop.f32.mrb[132].mxu0  ;;  %2794 = vmax.xlane.f32.xlu1 %v2793_v5 }
 0x200   : > { %v2519_v10 = vpop.xlane.xlu1 %2518  ;;  %v7650_v54 = vadd.f32 %v5155_v25, %v7075_v53  ;;  %v2361_v20 = vpop.f32.mrb[133].mxu0 }
 0x201   : > { %v2845_v42 = vmax.f32 %v2471_v62, %v2519_v10  ;;  %v5156_v2 = vpop.f32.mrb[134].mxu0  ;;  %v7655_v29 = vadd.f32 %v2361_v20, %v6988_v13 }
 0x202   : > { %9488 = vst [vmem:[#allocation150_spill] sm:$0xff] %v7650_v54  ;;  %v7658_v9 = vadd.f32 %v5156_v2, %v7101_v40  ;;  %2797 = vmax.xlane.f32.xlu0 %v2796_v38  ;;  %v2364_v49 = vpop.f32.mrb[135].mxu0  ;;  %v2811_v62 = vsel %vm2408_vm1, %v7650_v54, -inf  ;;  %v7671_v40 = vadd.f32 %v7195_v7, %v7167_v21  ;;  %v9509_v54 = vld [vmem:[#allocation21_spill] sm:$0xff] }
 0x203   : > { %9489 = vst [vmem:[#allocation151_spill] sm:$0xff] %v7655_v29  ;;  %v2522_v63 = vpop.xlane.xlu0 %2521  ;;  %2812 = vmax.xlane.f32.xlu1 %v2811_v62  ;;  %v7667_v13 = vadd.f32 %v2364_v49, %v7007_v12  ;;  %v2805_v20 = vsel %vm2408_vm1, %v7655_v29, -inf  ;;  %v7683_v12 = vadd.f32 %v7209_v14, %v7180_v56  ;;  %v9515_v29 = vld [vmem:[#allocation91_spill] sm:$0xff] }
 0x204   : > { %9490 = vst [vmem:[#allocation152_spill] sm:$0xff] %v7658_v9  ;;  %v2846_v5 = vmax.f32 %v2474_v11, %v2522_v63  ;;  %v2567_v53 = vpop.xlane.xlu1 %2566  ;;  %v2814_v25 = vsel %vm2408_vm1, %v7658_v9, -inf  ;;  %9492 = vst [vmem:[#allocation154_spill] sm:$0xff] %v7671_v40 }
 0x205   : > { %v7662_v10 = vmax.f32 %v2845_v42, %v2567_v53  ;;  %9491 = vst [vmem:[#allocation153_spill] sm:$0xff] %v7667_v13  ;;  %9493 = vst [vmem:[#allocation155_spill] sm:$0xff] %v7683_v12  ;;  %v2808_v49 = vsel %vm2408_vm1, %v7667_v13, -inf  ;;  %v2631_v53 = vsel %vm2408_vm1, %v7671_v40, -inf }
 0x206   : > { %2815 = vmax.xlane.f32.xlu0 %v2814_v25 }
 0x207   : > { %v2570_v38 = vpop.xlane.xlu0 %2569  ;;  %v7677_v2 = vpop.f32.mrb[136].mxu0  ;;  %2806 = vmax.xlane.f32.xlu1 %v2805_v20  ;;  %v2634_v20 = vsel %vm2408_vm1, %v7683_v12, -inf  ;;  %v9499_v12 = vld [vmem:[#allocation10_spill] sm:$0xff] }
 0x208   : > { %v7675_v11 = vmax.f32 %v2846_v5, %v2570_v38  ;;  %v2377_v42 = vpop.f32.mrb[137].mxu0  ;;  %v7679_v63 = vpop.xlane.xlu1 %2608 }
 0x209   : > { %v7687_v7 = vpop.f32.mrb[138].mxu0  ;;  %v7692_v62 = vadd.f32 %v2377_v42, %v7191_v50  ;;  %v7711_v42 = vadd.f32 %v7317_v18, %v7217_v27  ;;  %v7728_v27 = vadd.f32 %v7335_v58, %v7239_v31  ;;  %v9503_v58 = vld [vmem:[#allocation9_spill] sm:$0xff] }
 0x20a   : > { %2809 = vmax.xlane.f32.xlu0 %v2808_v49  ;;  %v2380_v5 = vpop.f32.mrb[139].mxu0 }
 0x20b   : > { %9494 = vst [vmem:[#allocation156_spill] sm:$0xff] %v7692_v62  ;;  %v7696_v25 = vpop.xlane.xlu0 %2611  ;;  %2632 = vmax.xlane.f32.xlu1 %v2631_v53  ;;  %v7703_v38 = vadd.f32 %v2380_v5, %v7213_v55  ;;  %9496 = vst [vmem:[#allocation158_spill] sm:$0xff] %v7711_v42  ;;  %v2817_v49 = vsel %vm2408_vm1, %v7692_v62, -inf }
 0x20c   : > { %v7700_v14 = vpop.xlane.xlu1 %2602  ;;  %9498 = vst [vmem:[#allocation160_spill] sm:$0xff] %v7728_v27 }
 0x20d   : > { %9495 = vst [vmem:[#allocation157_spill] sm:$0xff] %v7703_v38 }
 0x20e   : > { %2635 = vmax.xlane.f32.xlu0 %v2634_v20  ;;  %v2820_v20 = vsel %vm2408_vm1, %v7703_v38, -inf  ;;  %v9504_v38 = vld [vmem:[#allocation44_spill] sm:$0xff] }
 0x20f   : > { %v7715_v53 = vpop.xlane.xlu0 %2605  ;;  %v5163_v56 = vpop.f32.mrb[140].mxu0  ;;  %2818 = vmax.xlane.f32.xlu1 %v2817_v49  ;;  %v9500_v49 = vld [vmem:[#allocation40_spill] sm:$0xff]  ;;  %v7749_v9 = vadd.f32 %v9504_v38, %v9503_v58  ;;  %v9514_v38 = vld [vmem:[#allocation29_spill] sm:$0xff] }
 0x210   : > { %v7720_v5 = vadd.f32 %v5163_v56, %v7520_v37  ;;  %v7722_v50 = vpop.f32.mrb[141].mxu0  ;;  %v7724_v21 = vpop.xlane.xlu1 %2416  ;;  %v7734_v40 = vadd.f32 %v9500_v49, %v9499_v12  ;;  %v2679_v56 = vsel %vm2408_vm1, %v7711_v42, -inf  ;;  %v9510_v12 = vld [vmem:[#allocation70_spill] sm:$0xff]  ;;  %v7779_v48 = vadd.f32 %v9515_v29, %v9514_v38 }
 0x211   : > { %v5164_v18 = vpop.f32.mrb[142].mxu0  ;;  %9505 = vst [vmem:[#allocation9_spill] sm:$0xff] %v7749_v9  ;;  %v7767_v13 = vadd.f32 %v9510_v12, %v9509_v54  ;;  %v7791_v29 = vadd.f32 %v7453_v39, %v7261_v59 }
 0x212   : > { %9497 = vst [vmem:[#allocation159_spill] sm:$0xff] %v7720_v5  ;;  %9501 = vst [vmem:[#allocation10_spill] sm:$0xff] %v7734_v40  ;;  %v7737_v55 = vadd.f32 %v5164_v18, %v7537_v34  ;;  %2821 = vmax.xlane.f32.xlu0 %v2820_v20  ;;  %v7739_v37 = vpop.f32.mrb[143].mxu0  ;;  %v2682_v34 = vsel %vm2408_vm1, %v7728_v27, -inf  ;;  %v9506_v18 = vld [vmem:[#allocation22_spill] sm:$0xff]  ;;  %v2436_v27 = vsel %vm2408_vm1, %v7749_v9, -inf  ;;  %v7785_v9 = vadd.f32 %v7443_v52, %v7246_v33 }
 0x213   : > { %v7743_v62 = vpop.xlane.xlu0 %2419  ;;  %2680 = vmax.xlane.f32.xlu1 %v2679_v56  ;;  %v9507_v20 = vld [vmem:[#allocation66_spill] sm:$0xff]  ;;  %v2433_v56 = vsel %vm2408_vm1, %v7734_v40, -inf  ;;  %9511 = vst [vmem:[#allocation22_spill] sm:$0xff] %v7767_v13  ;;  %9516 = vst [vmem:[#allocation21_spill] sm:$0xff] %v7779_v48  ;;  %v2496_v12 = vsel %vm2408_vm1, %v7767_v13, -inf  ;;  %v2544_v38 = vsel %vm2408_vm1, %v7779_v48, -inf }
 0x214   : > { %9502 = vst [vmem:[#allocation40_spill] sm:$0xff] %v7737_v55  ;;  %v7745_v31 = vpop.xlane.xlu1 %2614  ;;  %v7757_v49 = vadd.f32 %v9507_v20, %v9506_v18  ;;  %v9512_v18 = vld [vmem:[#allocation30_spill] sm:$0xff]  ;;  %9517 = vst [vmem:[#allocation70_spill] sm:$0xff] %v7785_v9  ;;  %v2727_v52 = vsel %vm2408_vm1, %v7785_v9, -inf }
 0x215   : > { %9518 = vst [vmem:[#allocation30_spill] sm:$0xff] %v7791_v29 }
 0x216   : > { %9508 = vst [vmem:[#allocation44_spill] sm:$0xff] %v7757_v49  ;;  %2683 = vmax.xlane.f32.xlu0 %v2682_v34  ;;  %v7773_v34 = vadd.f32 %v6980_v46, %v9512_v18  ;;  %v2493_v20 = vsel %vm2408_vm1, %v7757_v49, -inf }
 0x217   : > { %v7761_v42 = vpop.xlane.xlu0 %2617  ;;  %2434 = vmax.xlane.f32.xlu1 %v2433_v56 }
 0x218   : > { %v2477_v58 = vpop.xlane.xlu1 %2476  ;;  %9513 = vst [vmem:[#allocation66_spill] sm:$0xff] %v7773_v34  ;;  %v2541_v46 = vsel %vm2408_vm1, %v7773_v34, -inf }
 0x21a   : > { %2437 = vmax.xlane.f32.xlu0 %v2436_v27 }
 0x21b   : > { %v2480_v56 = vpop.xlane.xlu0 %2479  ;;  %2494 = vmax.xlane.f32.xlu1 %v2493_v20 }
 0x21c   : > { %v2525_v40 = vpop.xlane.xlu1 %2524 }
 0x21d   : > { %v2847_v54 = vmax.f32 %v2477_v58, %v2525_v40  ;;  %v9519_v58 = vld [vmem:[#allocation46_spill] sm:$0xff] }
 0x21e   : > { %2497 = vmax.xlane.f32.xlu0 %v2496_v12  ;;  %v7797_v33 = vadd.f32 %v7113_v22, %v9519_v58  ;;  %v7809_v22 = vadd.f32 %v7563_v51, %v7263_v45  ;;  %v7826_v51 = vadd.f32 %v7233_v41, %v7285_v32  ;;  %v9529_v41 = vmax.f32 %v7579_v17, %v7700_v14 }
 0x21f   : > { %v2528_v27 = vpop.xlane.xlu0 %2527  ;;  %2542 = vmax.xlane.f32.xlu1 %v2541_v46  ;;  %v7859_v14 = vadd.f32 %v7687_v7, %v7325_v30  ;;  %v9534_v30 = vld [vmem:[#allocation84_spill] sm:$0xff] }
 0x220   : > { %v2848_v18 = vmax.f32 %v2480_v56, %v2528_v27  ;;  %v2573_v20 = vpop.xlane.xlu1 %2572  ;;  %9520 = vst [vmem:[#allocation29_spill] sm:$0xff] %v7797_v33  ;;  %v9521_v27 = vld [vmem:[#allocation45_spill] sm:$0xff]  ;;  %9523 = vst [vmem:[#allocation46_spill] sm:$0xff] %v7809_v22  ;;  %v7875_v7 = vadd.f32 %v9534_v30, %v7353_v19  ;;  %v9540_v19 = vmax.f32 %v7675_v11, %v7761_v42  ;;  %v9551_v30 = vld [vmem:[#allocation87_spill] sm:$0xff] }
 0x221   : > { %v2863_v40 = vmax.f32 %v2847_v54, %v2573_v20  ;;  %v7803_v59 = vadd.f32 %v7126_v6, %v9521_v27  ;;  %v2730_v54 = vsel %vm2408_vm1, %v7791_v29, -inf  ;;  %v2589_v20 = vsel %vm2408_vm1, %v7797_v33, -inf  ;;  %9526 = vst [vmem:[#allocation161_spill] sm:$0xff] %v7826_v51  ;;  %9532 = vst [vmem:[#allocation164_spill] sm:$0xff] %v7859_v14  ;;  %v9599_v33 = vld [vmem:[#allocation75_spill] sm:$0xff] }
 0x222   : > { %2545 = vmax.xlane.f32.xlu0 %v2544_v38  ;;  %v7815_v6 = vadd.f32 %v7569_v61, %v7278_v23  ;;  %v9527_v23 = vmax.f32 %v7623_v43, %v7696_v25  ;;  %v7848_v27 = vadd.f32 %v7677_v2, %v7304_v57  ;;  %v2637_v43 = vsel %vm2408_vm1, %v7826_v51, -inf  ;;  %9535 = vst [vmem:[#allocation84_spill] sm:$0xff] %v7875_v7 }
 0x223   : > { %v2576_v12 = vpop.xlane.xlu0 %2575  ;;  %2728 = vmax.xlane.f32.xlu1 %v2727_v52  ;;  %9522 = vst [vmem:[#allocation91_spill] sm:$0xff] %v7803_v59  ;;  %v2592_v45 = vsel %vm2408_vm1, %v7803_v59, -inf  ;;  %v7867_v2 = vadd.f32 %v7359_v16, %v7333_v8  ;;  %v2826_v8 = vsel %vm2408_vm1, %v7859_v14, -inf  ;;  %v9537_v16 = vld [vmem:[#allocation12_spill] sm:$0xff]  ;;  %v9595_v59 = vld [vmem:[#allocation35_spill] sm:$0xff] }
 0x224   : > { %v2864_v56 = vmax.f32 %v2848_v18, %v2576_v12  ;;  %v2621_v46 = vpop.xlane.xlu1 %2620  ;;  %9524 = vst [vmem:[#allocation45_spill] sm:$0xff] %v7815_v6  ;;  %v2775_v12 = vsel %vm2408_vm1, %v7809_v22, -inf  ;;  %9530 = vst [vmem:[#allocation163_spill] sm:$0xff] %v7848_v27  ;;  %v9570_v22 = vld [vmem:[#allocation124_spill] sm:$0xff] }
 0x225   : > { %v2879_v39 = vmax.f32 %v2863_v40, %v2621_v46  ;;  %v9525_v40 = vmax.f32 %v7614_v60, %v7679_v63  ;;  %v7837_v63 = vadd.f32 %v7252_v28, %v7299_v36  ;;  %v2778_v46 = vsel %vm2408_vm1, %v7815_v6, -inf  ;;  %9533 = vst [vmem:[#allocation165_spill] sm:$0xff] %v7867_v2  ;;  %v9569_v6 = vld [vmem:[#allocation131_spill] sm:$0xff] }
 0x226   : > { %2731 = vmax.xlane.f32.xlu0 %v2730_v54  ;;  %v9531_v36 = vmax.f32 %v7593_v24, %v7715_v53  ;;  %v2823_v24 = vsel %vm2408_vm1, %v7848_v27, -inf }
 0x227   : > { %v2624_v38 = vpop.xlane.xlu0 %2623  ;;  %2590 = vmax.xlane.f32.xlu1 %v2589_v20  ;;  %9528 = vst [vmem:[#allocation162_spill] sm:$0xff] %v7837_v63  ;;  %v2640_v57 = vsel %vm2408_vm1, %v7837_v63, -inf }
 0x228   : > { %v2880_v18 = vmax.f32 %v2864_v56, %v2624_v38  ;;  %v2657_v58 = vpop.xlane.xlu1 %2656 }
 0x229   : > { %v7820_v52 = vmax.f32 %v9525_v40, %v2657_v58  ;;  %v9538_v40 = vld [vmem:[#allocation39_spill] sm:$0xff] }
 0x22a   : > { %2593 = vmax.xlane.f32.xlu0 %v2592_v45  ;;  %v7886_v45 = vadd.f32 %v9538_v40, %v9537_v16 }
 0x22b   : > { %v2660_v56 = vpop.xlane.xlu0 %2659  ;;  %2776 = vmax.xlane.f32.xlu1 %v2775_v12 }
 0x22c   : > { %v7833_v61 = vmax.f32 %v9527_v23, %v2660_v56  ;;  %v2651_v60 = vpop.xlane.xlu1 %2650  ;;  %9539 = vst [vmem:[#allocation12_spill] sm:$0xff] %v7886_v45  ;;  %v9542_v23 = vld [vmem:[#allocation43_spill] sm:$0xff] }
 0x22d   : > { %v7842_v32 = vmax.f32 %v9529_v41, %v2651_v60  ;;  %v2688_v41 = vsel %vm2408_vm1, %v7875_v7, -inf  ;;  %v9573_v7 = vld [vmem:[#allocation126_spill] sm:$0xff] }
 0x22e   : > { %2779 = vmax.xlane.f32.xlu0 %v2778_v46  ;;  %v9544_v46 = vld [vmem:[#allocation24_spill] sm:$0xff] }
 0x22f   : > { %v2654_v25 = vpop.xlane.xlu0 %2653  ;;  %2638 = vmax.xlane.f32.xlu1 %v2637_v43  ;;  %v9545_v43 = vld [vmem:[#allocation65_spill] sm:$0xff] }
 0x230   : > { %v7855_v28 = vmax.f32 %v9531_v36, %v2654_v25  ;;  %v2669_v17 = vpop.xlane.xlu1 %2668  ;;  %v7905_v25 = vadd.f32 %v9545_v43, %v9544_v46  ;;  %v2439_v36 = vsel %vm2408_vm1, %v7886_v45, -inf }
 0x231   : > { %v7861_v54 = vmax.f32 %v2879_v39, %v2669_v17  ;;  %v9536_v39 = vmax.f32 %v7662_v10, %v7745_v31  ;;  %v9541_v31 = vld [vmem:[#allocation11_spill] sm:$0xff] }
 0x232   : > { %2641 = vmax.xlane.f32.xlu0 %v2640_v57  ;;  %v7899_v60 = vadd.f32 %v9542_v23, %v9541_v31  ;;  %9546 = vst [vmem:[#allocation11_spill] sm:$0xff] %v7905_v25  ;;  %v9547_v17 = vld [vmem:[#allocation23_spill] sm:$0xff]  ;;  %v9548_v57 = vld [vmem:[#allocation69_spill] sm:$0xff] }
 0x233   : > { %v2672_v53 = vpop.xlane.xlu0 %2671  ;;  %2824 = vmax.xlane.f32.xlu1 %v2823_v24  ;;  %v7915_v24 = vadd.f32 %v9548_v57, %v9547_v17  ;;  %v9556_v23 = vld [vmem:[#allocation17_spill] sm:$0xff] }
 0x234   : > { %v7871_v20 = vmax.f32 %v2880_v18, %v2672_v53  ;;  %v2663_v38 = vpop.xlane.xlu1 %2662  ;;  %v2685_v18 = vsel %vm2408_vm1, %v7867_v2, -inf  ;;  %9543 = vst [vmem:[#allocation39_spill] sm:$0xff] %v7899_v60  ;;  %v2442_v53 = vsel %vm2408_vm1, %v7899_v60, -inf  ;;  %v9558_v17 = vld [vmem:[#allocation37_spill] sm:$0xff]  ;;  %v9580_v2 = vld [vmem:[#allocation58_spill] sm:$0xff] }
 0x235   : > { %v7880_v58 = vmax.f32 %v9536_v39, %v2663_v38  ;;  %9549 = vst [vmem:[#allocation43_spill] sm:$0xff] %v7915_v24  ;;  %v9550_v38 = vld [vmem:[#allocation32_spill] sm:$0xff]  ;;  %v2502_v31 = vsel %vm2408_vm1, %v7915_v24, -inf  ;;  %v7947_v57 = vadd.f32 %v7497_v35, %v9558_v17  ;;  %v9566_v17 = vld [vmem:[#allocation130_spill] sm:$0xff]  ;;  %v9582_v24 = vld [vmem:[#allocation141_spill] sm:$0xff] }
 0x236   : > { %2827 = vmax.xlane.f32.xlu0 %v2826_v8  ;;  %v7921_v39 = vadd.f32 %v9551_v30, %v9550_v38  ;;  %v2499_v8 = vsel %vm2408_vm1, %v7905_v25, -inf  ;;  %v9560_v38 = vld [vmem:[#allocation50_spill] sm:$0xff]  ;;  %v9583_v25 = vld [vmem:[#allocation25_spill] sm:$0xff] }
 0x237   : > { %v2666_v12 = vpop.xlane.xlu0 %2665  ;;  %2686 = vmax.xlane.f32.xlu1 %v2685_v18  ;;  %v9553_v18 = vld [vmem:[#allocation31_spill] sm:$0xff]  ;;  %9559 = vst [vmem:[#allocation69_spill] sm:$0xff] %v7947_v57  ;;  %v9561_v30 = vld [vmem:[#allocation106_spill] sm:$0xff] }
 0x238   : > { %v7893_v56 = vmax.f32 %v9540_v19, %v2666_v12  ;;  %v7895_v10 = vpop.xlane.xlu1 %2422  ;;  %9552 = vst [vmem:[#allocation24_spill] sm:$0xff] %v7921_v39  ;;  %v9554_v12 = vld [vmem:[#allocation90_spill] sm:$0xff]  ;;  %v2547_v46 = vsel %vm2408_vm1, %v7921_v39, -inf  ;;  %v9589_v39 = vld [vmem:[#allocation52_spill] sm:$0xff] }
 0x239   : > { %v7931_v19 = vadd.f32 %v9554_v12, %v9553_v18 }
 0x23a   : > { %2689 = vmax.xlane.f32.xlu0 %v2688_v41  ;;  %v7937_v41 = vadd.f32 %v7483_v26, %v9556_v23  ;;  %v7953_v26 = vadd.f32 %v9561_v30, %v9560_v38  ;;  %v9564_v23 = vld [vmem:[#allocation109_spill] sm:$0xff]  ;;  %v7969_v38 = vadd.f32 %v7597_v15, %v9566_v17  ;;  %v7985_v15 = vadd.f32 %v9570_v22, %v9569_v6 }
 0x23b   : > { %v7909_v11 = vpop.xlane.xlu0 %2425  ;;  %2440 = vmax.xlane.f32.xlu1 %v2439_v36  ;;  %9555 = vst [vmem:[#allocation65_spill] sm:$0xff] %v7931_v19 }
 0x23c   : > { %v7911_v42 = vpop.xlane.xlu1 %2482  ;;  %9557 = vst [vmem:[#allocation23_spill] sm:$0xff] %v7937_v41  ;;  %9562 = vst [vmem:[#allocation32_spill] sm:$0xff] %v7953_v26  ;;  %v2643_v6 = vsel %vm2408_vm1, %v7985_v15, -inf }
 0x23d   : > { %9567 = vst [vmem:[#allocation31_spill] sm:$0xff] %v7969_v38  ;;  %9571 = vst [vmem:[#allocation17_spill] sm:$0xff] %v7985_v15  ;;  %v9588_v15 = vld [vmem:[#allocation13_spill] sm:$0xff] }
 0x23e   : > { %2443 = vmax.xlane.f32.xlu0 %v2442_v53  ;;  %v2550_v53 = vsel %vm2408_vm1, %v7931_v19, -inf  ;;  %v9586_v19 = vld [vmem:[#allocation48_spill] sm:$0xff] }
 0x23f   : > { %v7925_v16 = vpop.xlane.xlu0 %2485  ;;  %2500 = vmax.xlane.f32.xlu1 %v2499_v8  ;;  %v2733_v8 = vsel %vm2408_vm1, %v7937_v41, -inf  ;;  %v9591_v41 = vld [vmem:[#allocation33_spill] sm:$0xff] }
 0x240   : > { %v7927_v40 = vpop.xlane.xlu1 %2530 }
 0x242   : > { %2503 = vmax.xlane.f32.xlu0 %v2502_v31  ;;  %v9563_v31 = vld [vmem:[#allocation49_spill] sm:$0xff] }
 0x243   : > { %v7941_v43 = vpop.xlane.xlu0 %2533  ;;  %2548 = vmax.xlane.f32.xlu1 %v2547_v46  ;;  %v7963_v35 = vadd.f32 %v9564_v23, %v9563_v31  ;;  %v2736_v46 = vsel %vm2408_vm1, %v7947_v57, -inf  ;;  %v7979_v31 = vadd.f32 %v7610_v0, %v7402_v44  ;;  %v9592_v57 = vld [vmem:[#allocation143_spill] sm:$0xff] }
 0x244   : > { %v7943_v36 = vpop.xlane.xlu1 %2578 }
 0x245   : > { %9565 = vst [vmem:[#allocation87_spill] sm:$0xff] %v7963_v35  ;;  %9568 = vst [vmem:[#allocation90_spill] sm:$0xff] %v7979_v31  ;;  %v2598_v23 = vsel %vm2408_vm1, %v7963_v35, -inf  ;;  %v2784_v0 = vsel %vm2408_vm1, %v7979_v31, -inf  ;;  %v9575_v35 = vld [vmem:[#allocation134_spill] sm:$0xff] }
 0x246   : > { %2551 = vmax.xlane.f32.xlu0 %v2550_v53  ;;  %v2595_v53 = vsel %vm2408_vm1, %v7953_v26, -inf  ;;  %v9572_v26 = vld [vmem:[#allocation133_spill] sm:$0xff]  ;;  %v8001_v22 = vadd.f32 %v7722_v50, %v9575_v35  ;;  %v9579_v31 = vld [vmem:[#allocation138_spill] sm:$0xff] }
 0x247   : > { %v7957_v18 = vpop.xlane.xlu0 %2581  ;;  %2734 = vmax.xlane.f32.xlu1 %v2733_v8  ;;  %v7995_v44 = vadd.f32 %v9573_v7, %v9572_v26  ;;  %v8017_v50 = vadd.f32 %v9580_v2, %v9579_v31 }
 0x248   : > { %v7959_v12 = vpop.xlane.xlu1 %2704  ;;  %9576 = vst [vmem:[#allocation50_spill] sm:$0xff] %v8001_v22  ;;  %v2829_v35 = vsel %vm2408_vm1, %v8001_v22, -inf }
 0x249   : > { %9574 = vst [vmem:[#allocation37_spill] sm:$0xff] %v7995_v44  ;;  %v2646_v26 = vsel %vm2408_vm1, %v7995_v44, -inf  ;;  %9581 = vst [vmem:[#allocation49_spill] sm:$0xff] %v8017_v50  ;;  %v9585_v44 = vld [vmem:[#allocation14_spill] sm:$0xff]  ;;  %v2691_v31 = vsel %vm2408_vm1, %v8017_v50, -inf  ;;  %v9594_v50 = vld [vmem:[#allocation57_spill] sm:$0xff]  ;;  %v2907_v29 = vmax.f32 %v7820_v52, %v7959_v12 }
 0x24a   : > { %2737 = vmax.xlane.f32.xlu0 %v2736_v46  ;;  %v2781_v46 = vsel %vm2408_vm1, %v7969_v38, -inf  ;;  %v9577_v38 = vld [vmem:[#allocation137_spill] sm:$0xff]  ;;  %v8033_v2 = vadd.f32 %v9586_v19, %v9585_v44  ;;  %v8049_v19 = vadd.f32 %v9592_v57, %v9591_v41 }
 0x24b   : > { %v7973_v30 = vpop.xlane.xlu0 %2707  ;;  %2596 = vmax.xlane.f32.xlu1 %v2595_v53  ;;  %v8011_v7 = vadd.f32 %v7739_v37, %v9577_v38  ;;  %v8027_v37 = vadd.f32 %v9583_v25, %v9582_v24  ;;  %v8043_v25 = vadd.f32 %v9589_v39, %v9588_v15  ;;  %v8059_v39 = vadd.f32 %v9595_v59, %v9594_v50 }
 0x24c   : > { %v7975_v8 = vpop.xlane.xlu1 %2698  ;;  %9587 = vst [vmem:[#allocation130_spill] sm:$0xff] %v8033_v2  ;;  %9593 = vst [vmem:[#allocation124_spill] sm:$0xff] %v8049_v19  ;;  %v2445_v44 = vsel %vm2408_vm1, %v8033_v2, -inf  ;;  %v2739_v57 = vsel %vm2408_vm1, %v8049_v19, -inf  ;;  %v8075_v59 = vadd.f32 %v7603_v1, %v9599_v33  ;;  %v9602_v19 = vld [vmem:[#allocation16_spill] sm:$0xff]  ;;  %v2835_v1 = vsel %vm2408_vm1, %v7720_v5, -inf }
 0x24d   : > { %9578 = vst [vmem:[#allocation106_spill] sm:$0xff] %v8011_v7  ;;  %9584 = vst [vmem:[#allocation109_spill] sm:$0xff] %v8027_v37  ;;  %v2832_v38 = vsel %vm2408_vm1, %v8011_v7, -inf  ;;  %v2694_v24 = vsel %vm2408_vm1, %v8027_v37, -inf  ;;  %v2448_v15 = vsel %vm2408_vm1, %v8043_v25, -inf  ;;  %v9597_v37 = vld [vmem:[#allocation144_spill] sm:$0xff]  ;;  %v2905_v63 = vmax.f32 %v7842_v32, %v7975_v8 }
 0x24e   : > { %2599 = vmax.xlane.f32.xlu0 %v2598_v23  ;;  %9590 = vst [vmem:[#allocation131_spill] sm:$0xff] %v8043_v25  ;;  %9596 = vst [vmem:[#allocation133_spill] sm:$0xff] %v8059_v39  ;;  %v8065_v41 = vadd.f32 %v7595_v47, %v9597_v37  ;;  %v2742_v50 = vsel %vm2408_vm1, %v8059_v39, -inf  ;;  %v9603_v25 = vld [vmem:[#allocation47_spill] sm:$0xff] }
 0x24f   : > { %v7989_v17 = vpop.xlane.xlu0 %2701  ;;  %2782 = vmax.xlane.f32.xlu1 %v2781_v46  ;;  %9600 = vst [vmem:[#allocation134_spill] sm:$0xff] %v8075_v59  ;;  %v8087_v13 = vadd.f32 %v9603_v25, %v9602_v19  ;;  %v9605_v39 = vld [vmem:[#allocation15_spill] sm:$0xff] }
 0x250   : > { %v7991_v53 = vpop.xlane.xlu1 %2716  ;;  %9598 = vst [vmem:[#allocation126_spill] sm:$0xff] %v8065_v41  ;;  %v2787_v47 = vsel %vm2408_vm1, %v8065_v41, -inf  ;;  %v9606_v41 = vld [vmem:[#allocation51_spill] sm:$0xff]  ;;  %v2906_v51 = vmax.f32 %v7855_v28, %v7989_v17  ;;  %v2908_v28 = vmax.f32 %v7833_v61, %v7973_v30 }
 0x251   : > { %9604 = vst [vmem:[#allocation138_spill] sm:$0xff] %v8087_v13  ;;  %v8093_v2 = vadd.f32 %v9606_v41, %v9605_v39 }
 0x252   : > { %2785 = vmax.xlane.f32.xlu0 %v2784_v0 }
 0x253   : > { %v8005_v23 = vpop.xlane.xlu0 %2719  ;;  %2644 = vmax.xlane.f32.xlu1 %v2643_v6  ;;  %9607 = vst [vmem:[#allocation58_spill] sm:$0xff] %v8093_v2 }
 0x254   : > { %v8007_v46 = vpop.xlane.xlu1 %2710 }
 0x255   : > { %v2909_v52 = vmax.f32 %v7880_v58, %v8007_v46  ;;  %v2849_v58 = vmax.f32 %v7911_v42, %v7927_v40  ;;  %v2912_v42 = vmax.f32 %v7871_v20, %v8005_v23 }
 0x256   : > { %2647 = vmax.xlane.f32.xlu0 %v2646_v26 }
 0x257   : > { %v8021_v0 = vpop.xlane.xlu0 %2713  ;;  %2830 = vmax.xlane.f32.xlu1 %v2829_v35  ;;  %v2865_v30 = vmax.f32 %v2849_v58, %v7943_v36 }
 0x258   : > { %v8023_v6 = vpop.xlane.xlu1 %2626  ;;  %v2910_v61 = vmax.f32 %v7893_v56, %v8021_v0 }
 0x25a   : > { %2833 = vmax.xlane.f32.xlu0 %v2832_v38 }
 0x25b   : > { %v8037_v26 = vpop.xlane.xlu0 %2629  ;;  %2692 = vmax.xlane.f32.xlu1 %v2691_v31 }
 0x25c   : > { %v8039_v35 = vpop.xlane.xlu1 %2674 }
 0x25e   : > { %2695 = vmax.xlane.f32.xlu0 %v2694_v24 }
 0x25f   : > { %v8053_v38 = vpop.xlane.xlu0 %2677  ;;  %2446 = vmax.xlane.f32.xlu1 %v2445_v44 }
 0x260   : > { %v8055_v31 = vpop.xlane.xlu1 %2428 }
 0x262   : > { %2449 = vmax.xlane.f32.xlu0 %v2448_v15 }
 0x263   : > { %v8069_v24 = vpop.xlane.xlu0 %2431  ;;  %2740 = vmax.xlane.f32.xlu1 %v2739_v57  ;;  %v2790_v57 = vsel %vm2408_vm1, %v8075_v59, -inf  ;;  %v2451_v59 = vsel %vm2408_vm1, %v8087_v13, -inf }
 0x264   : > { %v8071_v44 = vpop.xlane.xlu1 %2488 }
 0x266   : > { %2743 = vmax.xlane.f32.xlu0 %v2742_v50 }
 0x267   : > { %v8081_v37 = vpop.xlane.xlu0 %2491  ;;  %2788 = vmax.xlane.f32.xlu1 %v2787_v47  ;;  %v2838_v47 = vsel %vm2408_vm1, %v7737_v55, -inf }
 0x268   : > { %9601 = vst [vmem:[#allocation137_spill] sm:$0xff] %v8081_v37  ;;  %v2753_v15 = vpop.xlane.xlu1 %2752 }
 0x26a   : > { %2791 = vmax.xlane.f32.xlu0 %v2790_v57  ;;  %v2454_v57 = vsel %vm2408_vm1, %v8093_v2, -inf }
 0x26b   : > { %v2756_v33 = vpop.xlane.xlu0 %2755  ;;  %2836 = vmax.xlane.f32.xlu1 %v2835_v1 }
 0x26c   : > { %v2747_v50 = vpop.xlane.xlu1 %2746 }
 0x26d   : > { %v2921_v48 = vmax.f32 %v2905_v63, %v2747_v50 }
 0x26e   : > { %2839 = vmax.xlane.f32.xlu0 %v2838_v47 }
 0x26f   : > { %v2750_v25 = vpop.xlane.xlu0 %2749  ;;  %2452 = vmax.xlane.f32.xlu1 %v2451_v59  ;;  %v9609_v50 = vld [vmem:[#allocation137_spill] sm:$0xff] }
 0x270   : > { %v2765_v19 = vpop.xlane.xlu1 %2764  ;;  %v2922_v45 = vmax.f32 %v2906_v51, %v2750_v25 }
 0x272   : > { %2455 = vmax.xlane.f32.xlu0 %v2454_v57 }
 0x273   : > { %v8101_v1 = vpop.xlane.xlu0 %2767 }
 0x274   : > { %v2759_v5 = vpop.xlane.xlu1 %2758  ;;  %v2928_v36 = vmax.f32 %v2912_v42, %v8101_v1 }
 0x277   : > { %v2762_v49 = vpop.xlane.xlu0 %2761 }
 0x278   : > { %v8103_v39 = vpop.xlane.xlu1 %2536 }
 0x27b   : > { %v8105_v41 = vpop.xlane.xlu0 %2539 }
 0x27c   : > { %v8107_v55 = vpop.xlane.xlu1 %2722  ;;  %v2852_v25 = vmax.f32 %v9609_v50, %v8105_v41 }
 0x27f   : > { %v8109_v47 = vpop.xlane.xlu0 %2725 }
 0x280   : > { %v8111_v13 = vpop.xlane.xlu1 %2584 }
 0x283   : > { %v8113_v59 = vpop.xlane.xlu0 %2587 }
 0x284   : > { %9608 = vst [vmem:[#allocation141_spill] sm:$0xff] %v8113_v59  ;;  %v8115_v7 = vpop.xlane.xlu1 %2770  ;;  %v2923_v59 = vmax.f32 %v2907_v29, %v2753_v15 }
 0x287   : > { %v8117_v2 = vpop.xlane.xlu0 %2773 }
 0x288   : > { %v2801_v57 = vpop.xlane.xlu1 %2800 }
 0x289   : > { %v2939_v63 = vmax.f32 %v2923_v59, %v2801_v57 }
 0x28b   : > { %v2804_v22 = vpop.xlane.xlu0 %2803 }
 0x28c   : > { %v2795_v34 = vpop.xlane.xlu1 %2794 }
 0x28d   : > { %v2937_v60 = vmax.f32 %v2921_v48, %v2795_v34  ;;  %v2924_v48 = vmax.f32 %v2908_v28, %v2756_v33 }
 0x28f   : > { %v2798_v14 = vpop.xlane.xlu0 %2797  ;;  %3035 = vperm.xlu1 %5468, %v2937_v60   ;;  %v2940_v29 = vmax.f32 %v2924_v48, %v2804_v22  ;;  %v2926_v60 = vmax.f32 %v2910_v61, %v2762_v49  ;;  %v2881_v49 = vmax.f32 %v2865_v30, %v8023_v6 }
 0x290   : > { %v2938_v27 = vmax.f32 %v2922_v45, %v2798_v14  ;;  %v2813_v9 = vpop.xlane.xlu1 %2812 }
 0x292   : > { %3040 = vperm.xlu0 %5467, %v2938_v27   ;;  %v2925_v27 = vmax.f32 %v2909_v52, %v2759_v5  ;;  %v2911_v5 = vmax.f32 %v7861_v54, %v7991_v53  ;;  %v2897_v54 = vmax.f32 %v2881_v49, %v8039_v35 }
 0x293   : > { %v2816_v37 = vpop.xlane.xlu0 %2815  ;;  %2955 = vperm.xlu1 %5468, %v7625_v4  }
 0x294   : > { %v2807_v32 = vpop.xlane.xlu1 %2806  ;;  %v2927_v8 = vmax.f32 %v2911_v5, %v2765_v19  ;;  %v2913_v53 = vmax.f32 %v2897_v54, %v8107_v55  ;;  %v2944_v0 = vmax.f32 %v2928_v36, %v2816_v37 }
 0x295   : > { %v2941_v14 = vmax.f32 %v2925_v27, %v2807_v32 }
 0x296   : > { %3045 = vperm.xlu0 %5467, %v2939_v63   ;;  %v2943_v56 = vmax.f32 %v2927_v8, %v2813_v9  ;;  %v2929_v20 = vmax.f32 %v2913_v53, %v8115_v7 }
 0x297   : > { %v2810_v34 = vpop.xlane.xlu0 %2809  ;;  %2960 = vperm.xlu1 %5468, %v7638_v3  }
 0x298   : > { %v8131_v51 = vpop.xlane.xlu1 %2632  ;;  %v2942_v12 = vmax.f32 %v2926_v60, %v2810_v34 }
 0x29a   : > { %2965 = vperm.xlu0 %5467, %v7724_v21  }
 0x29b   : > { %v8134_v4 = vpop.xlane.xlu0 %2635  ;;  %3050 = vperm.xlu1 %5468, %v2940_v29  }
 0x29c   : > { %v2819_v45 = vpop.xlane.xlu1 %2818 }
 0x29d   : > { %v2945_v23 = vmax.f32 %v2929_v20, %v2819_v45 }
 0x29e   : > { %3055 = vperm.xlu0 %5467, %v2941_v14  }
 0x29f   : > { %v2822_v3 = vpop.xlane.xlu0 %2821  ;;  %2970 = vperm.xlu1 %5468, %v7743_v62   ;;  %v2850_v62 = vmax.f32 %v7925_v16, %v7941_v43  ;;  %v9214_v16 = vmov 0.0|0.0  }
 0x2a0   : > { %v2681_v21 = vpop.xlane.xlu1 %2680  ;;  %5392 = vmatprep.subr.bf16.mxu0 %v9214_v16 }
 0x2a1   : > { %v2866_v40 = vmax.f32 %v2850_v62, %v7957_v18 }
 0x2a2   : > { %2975 = vperm.xlu0 %5467, %v7895_v10  }
 0x2a3   : > { %v2684_v17 = vpop.xlane.xlu0 %2683  ;;  %3060 = vperm.xlu1 %5468, %v2942_v12   ;;  %v2882_v46 = vmax.f32 %v2866_v40, %v8037_v26 }
 0x2a4   : > { %v2435_v22 = vpop.xlane.xlu1 %2434 }
 0x2a5   : > { %v2898_v43 = vmax.f32 %v2882_v46, %v8053_v38  ;;  %v2851_v38 = vmax.f32 %v8071_v44, %v8103_v39 }
 0x2a6   : > { %3065 = vperm.xlu0 %5467, %v2943_v56  }
 0x2a7   : > { %v2438_v10 = vpop.xlane.xlu0 %2437  ;;  %2980 = vperm.xlu1 %5468, %v7909_v11   ;;  %v2914_v11 = vmax.f32 %v2898_v43, %v8109_v47  ;;  %v2867_v15 = vmax.f32 %v2851_v38, %v8111_v13 }
 0x2a8   : > { %v2495_v9 = vpop.xlane.xlu1 %2494 }
 0x2a9   : > { %v2930_v55 = vmax.f32 %v2914_v11, %v8117_v2  ;;  %v2883_v19 = vmax.f32 %v2867_v15, %v8131_v51 }
 0x2aa   : > { %2985 = vperm.xlu0 %5467, %v8055_v31  }
 0x2ab   : > { %v2498_v18 = vpop.xlane.xlu0 %2497  ;;  %3070 = vperm.xlu1 %5468, %v2944_v0   ;;  %v2946_v37 = vmax.f32 %v2930_v55, %v2822_v3  ;;  %v2899_v47 = vmax.f32 %v2883_v19, %v2681_v21 }
 0x2ac   : > { %v2543_v6 = vpop.xlane.xlu1 %2542 }
 0x2ad   : > { %v2853_v12 = vmax.f32 %v2495_v9, %v2543_v6 }
 0x2ae   : > { %3075 = vperm.xlu0 %5467, %v2945_v23  }
 0x2af   : > { %v2546_v26 = vpop.xlane.xlu0 %2545  ;;  %2990 = vperm.xlu1 %5468, %v8069_v24   ;;  %v9610_v24 = vld [vmem:[#allocation141_spill] sm:$0xff] }
 0x2b0   : > { %v2729_v35 = vpop.xlane.xlu1 %2728  ;;  %v2868_v1 = vmax.f32 %v2852_v25, %v9610_v24 }
 0x2b1   : > { %v2915_v32 = vmax.f32 %v2899_v47, %v2729_v35 }
 0x2b2   : > { %2995 = vperm.xlu0 %5467, %v2435_v22   ;;  %v2884_v57 = vmax.f32 %v2868_v1, %v8134_v4 }
 0x2b3   : > { %v2732_v7 = vpop.xlane.xlu0 %2731  ;;  %3080 = vperm.xlu1 %5468, %v2946_v37  }
 0x2b4   : > { %v2591_v31 = vpop.xlane.xlu1 %2590  ;;  %v2900_v28 = vmax.f32 %v2884_v57, %v2684_v17  ;;  %v2854_v17 = vmax.f32 %v2498_v18, %v2546_v26 }
 0x2b5   : > { %v2869_v30 = vmax.f32 %v2853_v12, %v2591_v31  ;;  %v9614_v12 = vld [vmem:[#allocation77_spill] sm:$0xff] }
 0x2b6   : > { %v2916_v13 = vmax.f32 %v2900_v28, %v2732_v7 }
 0x2b7   : > { %v2594_v33 = vpop.xlane.xlu0 %2593  ;;  %3000 = vperm.xlu1 %5468, %v2438_v10  }
 0x2b8   : > { %v2777_v2 = vpop.xlane.xlu1 %2776  ;;  %v2870_v22 = vmax.f32 %v2854_v17, %v2594_v33 }
 0x2b9   : > { %v2931_v44 = vmax.f32 %v2915_v32, %v2777_v2 }
 0x2bb   : > { %v2780_v59 = vpop.xlane.xlu0 %2779 }
 0x2bc   : > { %v2639_v63 = vpop.xlane.xlu1 %2638  ;;  %v2932_v52 = vmax.f32 %v2916_v13, %v2780_v59 }
 0x2bd   : > { %v2885_v56 = vmax.f32 %v2869_v30, %v2639_v63 }
 0x2bf   : > { %v2642_v39 = vpop.xlane.xlu0 %2641 }
 0x2c0   : > { %v2825_v48 = vpop.xlane.xlu1 %2824  ;;  %v2886_v54 = vmax.f32 %v2870_v22, %v2642_v39 }
 0x2c1   : > { %v2947_v34 = vmax.f32 %v2931_v44, %v2825_v48 }
 0x2c3   : > { %v2828_v29 = vpop.xlane.xlu0 %2827  ;;  %3085 = vperm.xlu0 %5467, %v2947_v34   ;;  %v9611_v34 = vld [vmem:[#allocation67_spill] sm:$0xff] }
 0x2c4   : > { %v2948_v41 = vmax.f32 %v2932_v52, %v2828_v29  ;;  %v2687_v27 = vpop.xlane.xlu1 %2686 }
 0x2c5   : > { %v2901_v62 = vmax.f32 %v2885_v56, %v2687_v27  ;;  %v9612_v27 = vld [vmem:[#allocation72_spill] sm:$0xff] }
 0x2c6   : > { %3090 = vperm.xlu1 %5468, %v2948_v41  }
 0x2c7   : > { %v2690_v51 = vpop.xlane.xlu0 %2689 }
 0x2c8   : > { %v2441_v14 = vpop.xlane.xlu1 %2440  ;;  %v2902_v10 = vmax.f32 %v2886_v54, %v2690_v51 }
 0x2c9   : > { %3005 = vperm.xlu0 %5467, %v2441_v14  }
 0x2cb   : > { %v2444_v45 = vpop.xlane.xlu0 %2443 }
 0x2cc   : > { %3010 = vperm.xlu1 %5468, %v2444_v45   ;;  %v2501_v4 = vpop.xlane.xlu1 %2500 }
 0x2cf   : > { %v2504_v61 = vpop.xlane.xlu0 %2503 }
 0x2d0   : > { %v2549_v60 = vpop.xlane.xlu1 %2548 }
 0x2d1   : > { %v2855_v26 = vmax.f32 %v2501_v4, %v2549_v60 }
 0x2d3   : > { %v2552_v3 = vpop.xlane.xlu0 %2551 }
 0x2d4   : > { %v2735_v58 = vpop.xlane.xlu1 %2734  ;;  %v2856_v7 = vmax.f32 %v2504_v61, %v2552_v3  ;;  %v485_v3 = vld [vmem:[%s9068_s3] sm:$0xff] }
 0x2d5   : > { %v2917_v36 = vmax.f32 %v2901_v62, %v2735_v58  ;;  %v9613_v58 = vld [vmem:[#allocation101_spill] sm:$0xff]  ;;  %4896 = vmatprep.mubr.msk.f32.mxu1 %vm2408_vm1, %v485_v3 }
 0x2d6   : > { %v9632_v3 = vld [vmem:[#allocation121_spill] sm:$0xff] }
 0x2d7   : > { %v2738_v5 = vpop.xlane.xlu0 %2737 }
 0x2d8   : > { %v2597_v21 = vpop.xlane.xlu1 %2596  ;;  %v2918_v0 = vmax.f32 %v2902_v10, %v2738_v5  ;;  %v9618_v10 = vld [vmem:[#allocation105_spill] sm:$0xff] }
 0x2d9   : > { %v2871_v35 = vmax.f32 %v2855_v26, %v2597_v21 }
 0x2db   : > { %v2600_v8 = vpop.xlane.xlu0 %2599 }
 0x2dc   : > { %v2783_v49 = vpop.xlane.xlu1 %2782  ;;  %v2872_v15 = vmax.f32 %v2856_v7, %v2600_v8  ;;  %v9615_v8 = vld [vmem:[#allocation102_spill] sm:$0xff]  ;;  %v9622_v7 = vld [vmem:[#allocation116_spill] sm:$0xff] }
 0x2dd   : > { %v2933_v53 = vmax.f32 %v2917_v36, %v2783_v49  ;;  %v9616_v49 = vld [vmem:[#allocation80_spill] sm:$0xff] }
 0x2df   : > { %v2786_v42 = vpop.xlane.xlu0 %2785 }
 0x2e0   : > { %v2645_v40 = vpop.xlane.xlu1 %2644  ;;  %v2934_v23 = vmax.f32 %v2918_v0, %v2786_v42  ;;  %v9617_v42 = vld [vmem:[#allocation115_spill] sm:$0xff]  ;;  %v9619_v0 = vld [vmem:[#allocation117_spill] sm:$0xff] }
 0x2e1   : > { %v2887_v38 = vmax.f32 %v2871_v35, %v2645_v40 }
 0x2e3   : > { %v2648_v46 = vpop.xlane.xlu0 %2647 }
 0x2e4   : > { %v2831_v20 = vpop.xlane.xlu1 %2830  ;;  %v2888_v25 = vmax.f32 %v2872_v15, %v2648_v46 }
 0x2e5   : > { %v2949_v43 = vmax.f32 %v2933_v53, %v2831_v20 }
 0x2e7   : > { %v2834_v11 = vpop.xlane.xlu0 %2833  ;;  %3095 = vperm.xlu0 %5467, %v2949_v43  }
 0x2e8   : > { %v2950_v9 = vmax.f32 %v2934_v23, %v2834_v11  ;;  %v2693_v6 = vpop.xlane.xlu1 %2692  ;;  %v9620_v23 = vld [vmem:[#allocation82_spill] sm:$0xff] }
 0x2e9   : > { %v2903_v33 = vmax.f32 %v2887_v38, %v2693_v6 }
 0x2ea   : > { %3100 = vperm.xlu1 %5468, %v2950_v9  }
 0x2eb   : > { %v2696_v18 = vpop.xlane.xlu0 %2695 }
 0x2ec   : > { %v2447_v55 = vpop.xlane.xlu1 %2446  ;;  %v2904_v24 = vmax.f32 %v2888_v25, %v2696_v18  ;;  %v9621_v18 = vld [vmem:[#allocation151_spill] sm:$0xff] }
 0x2ed   : > { %3015 = vperm.xlu0 %5467, %v2447_v55  }
 0x2ef   : > { %v2450_v37 = vpop.xlane.xlu0 %2449 }
 0x2f0   : > { %3020 = vperm.xlu1 %5468, %v2450_v37   ;;  %v2741_v31 = vpop.xlane.xlu1 %2740 }
 0x2f1   : > { %v2919_v19 = vmax.f32 %v2903_v33, %v2741_v31  ;;  %v9623_v33 = vld [vmem:[#allocation85_spill] sm:$0xff] }
 0x2f3   : > { %v2744_v50 = vpop.xlane.xlu0 %2743 }
 0x2f4   : > { %v2789_v2 = vpop.xlane.xlu1 %2788  ;;  %v2920_v59 = vmax.f32 %v2904_v24, %v2744_v50 }
 0x2f5   : > { %v2935_v1 = vmax.f32 %v2919_v19, %v2789_v2  ;;  %v9626_v19 = vld [vmem:[#allocation89_spill] sm:$0xff] }
 0x2f7   : > { %v2792_v47 = vpop.xlane.xlu0 %2791 }
 0x2f8   : > { %v2837_v57 = vpop.xlane.xlu1 %2836  ;;  %v2936_v32 = vmax.f32 %v2920_v59, %v2792_v47  ;;  %v9627_v59 = vld [vmem:[#allocation107_spill] sm:$0xff] }
 0x2f9   : > { %v2951_v63 = vmax.f32 %v2935_v1, %v2837_v57 }
 0x2fb   : > { %v2840_v28 = vpop.xlane.xlu0 %2839  ;;  %3105 = vperm.xlu0 %5467, %v2951_v63  }
 0x2fc   : > { %v2952_v44 = vmax.f32 %v2936_v32, %v2840_v28  ;;  %v2453_v39 = vpop.xlane.xlu1 %2452  ;;  %v9628_v28 = vld [vmem:[#allocation6_spill] sm:$0xff] }
 0x2fe   : > { %3110 = vperm.xlu1 %5468, %v2952_v44  }
 0x2ff   : > { %3025 = vperm.xlu0 %5467, %v2453_v39   ;;  %v2456_v13 = vpop.xlane.xlu0 %2455 }
 0x302   : > { %3030 = vperm.xlu1 %5468, %v2456_v13  }
 0x30e   : > { %v8171_v48 = vpop.permute.xlu1 %3035 }
 0x30f   : > { %v3241_v52 = vsub.f32 %v9611_v34, %v8171_v48  ;;  %v3129_v50 = vsub.f32 %v9623_v33, %v8171_v48  ;;  %v9629_v34 = vld [vmem:[#allocation118_spill] sm:$0xff] }
 0x311   : > { %v8175_v29 = vpop.permute.xlu0 %3040  ;;  %v3513_v14 = vmul.f32 1.442695, %v3241_v52  ;;  %v3289_v13 = vmul.f32 1.442695, %v3129_v50 }
 0x312   : > { %v2956_v41 = vpop.permute.xlu1 %2955  ;;  %v3242_v51 = vsub.f32 %v9612_v27, %v8175_v29  ;;  %v3130_v24 = vsub.f32 %v9626_v19, %v8175_v29  ;;  %v9630_v27 = vld [vmem:[#allocation153_spill] sm:$0xff] }
 0x313   : > { %5543 = vpow2.f32 %v3513_v14  ;;  %v3113_v5 = vsub.f32 %v9613_v58, %v2956_v41  ;;  %v9631_v14 = vld [vmem:[#allocation136_spill] sm:$0xff] }
 0x314   : > { %v3515_v4 = vmul.f32 1.442695, %v3242_v51  ;;  %v3291_v41 = vmul.f32 1.442695, %v3130_v24  ;;  %v9642_v24 = vld [vmem:[#allocation152_spill] sm:$0xff] }
 0x315   : > { %v8179_v45 = vpop.permute.xlu0 %3045  ;;  %v3257_v62 = vmul.f32 1.442695, %v3113_v5 }
 0x316   : > { %v2961_v61 = vpop.permute.xlu1 %2960  ;;  %5545 = vpow2.f32 %v3515_v4  ;;  %v3243_v30 = vsub.f32 %v9614_v12, %v8179_v45 }
 0x317   : > { %v3114_v17 = vsub.f32 %v9615_v8, %v2961_v61  ;;  %5547 = vpow2.f32 %v3257_v62  ;;  %v9634_v62 = vld [vmem:[#allocation132_spill] sm:$0xff] }
 0x318   : > { %v3517_v36 = vmul.f32 1.442695, %v3243_v30  ;;  %v9633_v30 = vld [vmem:[#allocation54_spill] sm:$0xff] }
 0x319   : > { %v2966_v60 = vpop.permute.xlu0 %2965  ;;  %v3259_v46 = vmul.f32 1.442695, %v3114_v17 }
 0x31a   : > { %v8185_v21 = vpop.permute.xlu1 %3050  ;;  %v3115_v54 = vsub.f32 %v9617_v42, %v2966_v60  ;;  %5549 = vpow2.f32 %v3517_v36 }
 0x31b   : > { %v3244_v56 = vsub.f32 %v9616_v49, %v8185_v21  ;;  %5551 = vpow2.f32 %v3259_v46 }
 0x31c   : > { %v3261_v6 = vmul.f32 1.442695, %v3115_v54 }
 0x31d   : > { %v8193_v22 = vpop.permute.xlu0 %3055  ;;  %v3519_v43 = vmul.f32 1.442695, %v3244_v56  ;;  %v5544_v35 = vpop.eup %5543 }
 0x31e   : > { %v2971_v40 = vpop.permute.xlu1 %2970  ;;  %v3149_v53 = vsub.f32 %v9618_v10, %v8193_v22  ;;  %v3181_v20 = vsub.f32 %v9619_v0, %v8193_v22  ;;  %v3213_v11 = vsub.f32 %v9620_v23, %v8193_v22  ;;  %v3245_v55 = vsub.f32 %v9621_v18, %v8193_v22  ;;  %v9635_v10 = vld [vmem:[#allocation150_spill] sm:$0xff] }
 0x31f   : > { %v3116_v31 = vsub.f32 %v9622_v7, %v2971_v40  ;;  %5553 = vpow2.f32 %v3519_v43 }
 0x320   : > { %v3329_v37 = vmul.f32 1.442695, %v3149_v53  ;;  %v5546_v38 = vpop.eup %5545  ;;  %v3393_v15 = vmul.f32 1.442695, %v3181_v20  ;;  %v3457_v2 = vmul.f32 1.442695, %v3213_v11  ;;  %5555 = vpow2.f32 %v3261_v6 }
 0x321   : > { %v2976_v9 = vpop.permute.xlu0 %2975  ;;  %v5393_v1 = vpack.c.bf16 %v5546_v38, %v5544_v35  ;;  %v3521_v47 = vmul.f32 1.442695, %v3245_v55  ;;  %v3263_v32 = vmul.f32 1.442695, %v3116_v31  ;;  %v8233_v5 = vpop.eup %5547  ;;  %v9636_v20 = vld [vmem:[#allocation34_spill] sm:$0xff] }
 0x322   : > { %v8204_v26 = vpop.permute.xlu1 %3060  ;;  %5557 = vpow2.f32 %v3329_v37  ;;  %v3117_v44 = vsub.f32 %v9628_v28, %v2976_v9  ;;  %v9637_v9 = vld [vmem:[#allocation122_spill] sm:$0xff]  ;;  %v9638_v37 = vld [vmem:[#allocation8_spill] sm:$0xff] }
 0x323   : > { %v3150_v57 = vsub.f32 %v9627_v59, %v8204_v26  ;;  %5395 = vmatpush3.bf16.xpose.msk.msra.mxu0 %vm8211_vm2, %v5393_v1  ;;  %5559 = vpow2.f32 %v3393_v15  ;;  %v3182_v52 = vsub.f32 %v9629_v34, %v8204_v26  ;;  %v3246_v51 = vsub.f32 %v9630_v27, %v8204_v26  ;;  %v9640_v15 = vld [vmem:[#allocation53_spill] sm:$0xff]  ;;  %v9645_v27 = vld [vmem:[#allocation56_spill] sm:$0xff] }
 0x324   : > { %5396 = vmatprep.subr.bf16.mxu0 %v9214_v16  ;;  %5561 = vpow2.f32 %v3457_v2  ;;  %v3214_v4 = vsub.f32 %v9631_v14, %v8204_v26  ;;  %v3265_v60 = vmul.f32 1.442695, %v3117_v44  ;;  %v5550_v49 = vpop.eup %5549 }
 0x325   : > { %v8219_v63 = vpop.permute.xlu0 %3065  ;;  %5563 = vpow2.f32 %v3521_v47  ;;  %v3331_v61 = vmul.f32 1.442695, %v3150_v57  ;;  %v3395_v12 = vmul.f32 1.442695, %v3182_v52  ;;  %v3523_v56 = vmul.f32 1.442695, %v3246_v51  ;;  %v8241_v40 = vpop.eup %5551 }
 0x326   : > { %v2981_v39 = vpop.permute.xlu1 %2980  ;;  %5565 = vpow2.f32 %v3263_v32  ;;  %v3151_v58 = vsub.f32 %v9632_v3, %v8219_v63  ;;  %v3183_v8 = vsub.f32 %v9633_v30, %v8219_v63  ;;  %v3215_v42 = vsub.f32 %v9634_v62, %v8219_v63  ;;  %v9643_v57 = vld [vmem:[#allocation135_spill] sm:$0xff]  ;;  %v9648_v62 = vld [vmem:[#allocation94_spill] sm:$0xff] }
 0x327   : > { %5567 = vpow2.f32 %v3289_v13  ;;  %v3459_v36 = vmul.f32 1.442695, %v3214_v4  ;;  %v3247_v53 = vsub.f32 %v9635_v10, %v8219_v63  ;;  %v3118_v43 = vsub.f32 %v9636_v20, %v2981_v39  ;;  %v9644_v13 = vld [vmem:[#allocation18_spill] sm:$0xff]  ;;  %v9651_v20 = vld [vmem:[#allocation7_spill] sm:$0xff] }
 0x328   : > { %5569 = vpow2.f32 %v3291_v41  ;;  %v3333_v0 = vmul.f32 1.442695, %v3151_v58  ;;  %v3397_v11 = vmul.f32 1.442695, %v3183_v8  ;;  %v3461_v35 = vmul.f32 1.442695, %v3215_v42 }
 0x329   : > { %v2986_v17 = vpop.permute.xlu0 %2985  ;;  %5571 = vpow2.f32 %v3331_v61  ;;  %v5554_v46 = vpop.eup %5553  ;;  %v3525_v38 = vmul.f32 1.442695, %v3247_v53  ;;  %v3267_v19 = vmul.f32 1.442695, %v3118_v43  ;;  %v5203_v4 = vpack.c.bf16 %v8241_v40, %v8233_v5  ;;  %v9647_v8 = vld [vmem:[#allocation93_spill] sm:$0xff] }
 0x32a   : > { %v8239_v54 = vpop.permute.xlu1 %3070  ;;  %5573 = vpow2.f32 %v3265_v60  ;;  %v8246_v23 = vpop.eup %5555  ;;  %v5397_v18 = vpack.c.bf16 %v5554_v46, %v5550_v49  ;;  %v3119_v7 = vsub.f32 %v9638_v37, %v2986_v17  ;;  %v9646_v60 = vld [vmem:[#allocation27_spill] sm:$0xff]  ;;  %v3131_v17 = vsub.f32 %v9647_v8, %v8179_v45 }
 0x32b   : > { %5575 = vpow2.f32 %v3395_v12  ;;  %v3152_v6 = vsub.f32 %v9637_v9, %v8239_v54  ;;  %v3184_v33 = vsub.f32 %v9640_v15, %v8239_v54  ;;  %v3248_v1 = vsub.f32 %v9642_v24, %v8239_v54  ;;  %v9654_v15 = vld [vmem:[#allocation139_spill] sm:$0xff] }
 0x32c   : > { %v8250_v55 = vpop.eup %5557  ;;  %5577 = vpow2.f32 %v3523_v56  ;;  %5399 = vmatpush3.bf16.xpose.msk.msra.mxu0 %vm8211_vm2, %v5397_v18  ;;  %v3216_v32 = vsub.f32 %v9643_v57, %v8239_v54  ;;  %v3269_v39 = vmul.f32 1.442695, %v3119_v7  ;;  %v3132_v42 = vsub.f32 %v9648_v62, %v8185_v21  ;;  %v9653_v18 = vld [vmem:[#allocation62_spill] sm:$0xff]  ;;  %v9662_v62 = vld [vmem:[#allocation119_spill] sm:$0xff] }
 0x32d   : > { %v8253_v31 = vpop.eup %5559  ;;  %5579 = vpow2.f32 %v3459_v36  ;;  %v8257_v50 = vpop.permute.xlu0 %3075  ;;  %5400 = vmatprep.subr.bf16.mxu0 %v9214_v16  ;;  %v3335_v28 = vmul.f32 1.442695, %v3152_v6  ;;  %v3399_v41 = vmul.f32 1.442695, %v3184_v33  ;;  %v3527_v61 = vmul.f32 1.442695, %v3248_v1 }
 0x32e   : > { %9639 = vst [vmem:[#allocation25_spill] sm:$0xff] %v8253_v31  ;;  %v8261_v2 = vpop.eup %5561  ;;  %5581 = vpow2.f32 %v3333_v0  ;;  %v2991_v47 = vpop.permute.xlu1 %2990  ;;  %v3153_v34 = vsub.f32 %v9644_v13, %v8257_v50  ;;  %v3185_v51 = vsub.f32 %v9645_v27, %v8257_v50  ;;  %v3217_v3 = vsub.f32 %v9646_v60, %v8257_v50  ;;  %v9650_v36 = vld [vmem:[#allocation156_spill] sm:$0xff] }
 0x32f   : > { %9641 = vst [vmem:[#allocation14_spill] sm:$0xff] %v8261_v2  ;;  %v5564_v59 = vpop.eup %5563  ;;  %5583 = vpow2.f32 %v3397_v11  ;;  %v3463_v30 = vmul.f32 1.442695, %v3216_v32  ;;  %v3249_v10 = vsub.f32 %v9650_v36, %v8257_v50  ;;  %v3120_v43 = vsub.f32 %v9651_v20, %v2991_v47  ;;  %v9656_v47 = vld [vmem:[#allocation83_spill] sm:$0xff]  ;;  %v9707_v11 = vld [vmem:[#allocation130_spill] sm:$0xff] }
 0x330   : > { %v8268_v44 = vpop.eup %5565  ;;  %5585 = vpow2.f32 %v3461_v35  ;;  %v3337_v56 = vmul.f32 1.442695, %v3153_v34  ;;  %v3401_v53 = vmul.f32 1.442695, %v3185_v51  ;;  %v3465_v0 = vmul.f32 1.442695, %v3217_v3 }
 0x331   : > { %v5568_v52 = vpop.eup %5567  ;;  %5587 = vpow2.f32 %v3525_v38  ;;  %v3293_v6 = vmul.f32 1.442695, %v3131_v17  ;;  %v3295_v38 = vmul.f32 1.442695, %v3132_v42  ;;  %v3529_v24 = vmul.f32 1.442695, %v3249_v10  ;;  %v8309_v1 = vpop.permute.xlu0 %2995 }
 0x332   : > { %v5570_v14 = vpop.eup %5569  ;;  %5589 = vpow2.f32 %v3267_v19  ;;  %v8286_v5 = vpop.permute.xlu1 %3080  ;;  %v3271_v32 = vmul.f32 1.442695, %v3120_v43  ;;  %v3135_v42 = vsub.f32 %v9662_v62, %v8219_v63  ;;  %v5209_v62 = vpack.c.bf16 %v8268_v44, %v8246_v23 }
 0x333   : > { %v8278_v58 = vpop.eup %5571  ;;  %v5200_v12 = vpack.c.bf16 %v5570_v14, %v5568_v52  ;;  %5591 = vpow2.f32 %v3335_v28  ;;  %v3154_v35 = vsub.f32 %v9653_v18, %v8286_v5  ;;  %v3186_v33 = vsub.f32 %v9654_v15, %v8286_v5  ;;  %v9658_v28 = vld [vmem:[#allocation157_spill] sm:$0xff]  ;;  %v9667_v15 = vld [vmem:[#allocation154_spill] sm:$0xff] }
 0x334   : > { %v8282_v49 = vpop.eup %5573  ;;  %5593 = vpow2.f32 %v3269_v39  ;;  %v3218_v57 = vsub.f32 %v9656_v47, %v8286_v5  ;;  %v3250_v39 = vsub.f32 %v9658_v28, %v8286_v5  ;;  %v3301_v47 = vmul.f32 1.442695, %v3135_v42 }
 0x335   : > { %v8288_v40 = vpop.eup %5575  ;;  %5202 = vmatprep.subr.msk.bf16.mxu1 %vm8211_vm2, %v5200_v12  ;;  %5595 = vpow2.f32 %v3399_v41  ;;  %v3339_v52 = vmul.f32 1.442695, %v3154_v35  ;;  %v9659_v41 = vld [vmem:[#allocation103_spill] sm:$0xff]  ;;  %v3403_v14 = vmul.f32 1.442695, %v3186_v33  ;;  %v9661_v12 = vld [vmem:[#allocation9_spill] sm:$0xff] }
 0x336   : > { %9649 = vst [vmem:[#allocation48_spill] sm:$0xff] %v8288_v40  ;;  %v5578_v46 = vpop.eup %5577  ;;  %5205 = vmatpush3.bf16.xpose.msk.msra.mxu1 %vm8211_vm2, %v5203_v4  ;;  %5597 = vpow2.f32 %v3527_v61  ;;  %v3001_v13 = vpop.permute.xlu1 %3000  ;;  %v3133_v27 = vsub.f32 %v9659_v41, %v8193_v22  ;;  %v9660_v4 = vld [vmem:[#allocation104_spill] sm:$0xff]  ;;  %v3467_v3 = vmul.f32 1.442695, %v3218_v57  ;;  %v9668_v57 = vld [vmem:[#allocation70_spill] sm:$0xff] }
 0x337   : > { %v8299_v9 = vpop.eup %5579  ;;  %5599 = vpow2.f32 %v3463_v30  ;;  %v5401_v37 = vpack.c.bf16 %v5578_v46, %v5564_v59  ;;  %v3134_v61 = vsub.f32 %v9660_v4, %v8204_v26  ;;  %v3122_v30 = vsub.f32 %v9661_v12, %v3001_v13  ;;  %v9670_v13 = vld [vmem:[#allocation163_spill] sm:$0xff]  ;;  %v9673_v12 = vld [vmem:[#allocation36_spill] sm:$0xff] }
 0x338   : > { %9652 = vst [vmem:[#allocation13_spill] sm:$0xff] %v8299_v9  ;;  %v8303_v7 = vpop.eup %5581  ;;  %5601 = vpow2.f32 %v3337_v56  ;;  %v3531_v56 = vmul.f32 1.442695, %v3250_v39  ;;  %v3297_v10 = vmul.f32 1.442695, %v3133_v27 }
 0x339   : > { %v8307_v19 = vpop.eup %5583  ;;  %5603 = vpow2.f32 %v3401_v53  ;;  %5403 = vmatpush3.bf16.xpose.msk.msra.mxu0 %vm8211_vm2, %v5401_v37  ;;  %v9664_v53 = vld [vmem:[#allocation120_spill] sm:$0xff]  ;;  %v3299_v43 = vmul.f32 1.442695, %v3134_v61  ;;  %v3275_v37 = vmul.f32 1.442695, %v3122_v30  ;;  %v3138_v30 = vsub.f32 %v9673_v12, %v8286_v5 }
 0x33a   : > { %9655 = vst [vmem:[#allocation52_spill] sm:$0xff] %v8307_v19  ;;  %v8315_v59 = vpop.eup %5585  ;;  %5605 = vpow2.f32 %v3465_v0  ;;  %5404 = vmatprep.subr.bf16.mxu0 %v9214_v16  ;;  %v3136_v46 = vsub.f32 %v9664_v53, %v8239_v54 }
 0x33b   : > { %9657 = vst [vmem:[#allocation33_spill] sm:$0xff] %v8315_v59  ;;  %v5588_v34 = vpop.eup %5587  ;;  %5607 = vpow2.f32 %v3293_v6  ;;  %v9665_v6 = vld [vmem:[#allocation28_spill] sm:$0xff]  ;;  %v3307_v44 = vmul.f32 1.442695, %v3138_v30 }
 0x33c   : > { %v8322_v51 = vpop.eup %5589  ;;  %5609 = vpow2.f32 %v3295_v38  ;;  %v3303_v39 = vmul.f32 1.442695, %v3136_v46  ;;  %v9681_v30 = vld [vmem:[#allocation20_spill] sm:$0xff] }
 0x33d   : > { %v8326_v60 = vpop.eup %5591  ;;  %5611 = vpow2.f32 %v3529_v24 }
 0x33e   : > { %v8331_v17 = vpop.eup %5593  ;;  %5613 = vpow2.f32 %v3271_v32 }
 0x33f   : > { %v8335_v36 = vpop.eup %5595  ;;  %5615 = vpow2.f32 %v3339_v52 }
 0x340   : > { %9663 = vst [vmem:[#allocation143_spill] sm:$0xff] %v8335_v36  ;;  %v5598_v20 = vpop.eup %5597  ;;  %5617 = vpow2.f32 %v3403_v14  ;;  %v9672_v14 = vld [vmem:[#allocation5_spill] sm:$0xff] }
 0x341   : > { %v8343_v35 = vpop.eup %5599  ;;  %5619 = vpow2.f32 %v3467_v3  ;;  %v5405_v38 = vpack.c.bf16 %v5598_v20, %v5588_v34  ;;  %v3137_v4 = vsub.f32 %v9672_v14, %v8257_v50  ;;  %v9680_v14 = vld [vmem:[#allocation10_spill] sm:$0xff] }
 0x342   : > { %v8329_v8 = vpop.permute.xlu0 %3085  ;;  %9666 = vst [vmem:[#allocation57_spill] sm:$0xff] %v8343_v35  ;;  %v8347_v24 = vpop.eup %5601  ;;  %5621 = vpow2.f32 %v3531_v56 }
 0x343   : > { %v3155_v18 = vsub.f32 %v9665_v6, %v8329_v8  ;;  %v3187_v33 = vsub.f32 %v9667_v15, %v8329_v8  ;;  %v3219_v32 = vsub.f32 %v9668_v57, %v8329_v8  ;;  %v8351_v28 = vpop.eup %5603  ;;  %5623 = vpow2.f32 %v3297_v10  ;;  %5407 = vmatpush3.bf16.xpose.msk.msra.mxu0 %vm8211_vm2, %v5405_v38  ;;  %v9674_v10 = vld [vmem:[#allocation81_spill] sm:$0xff]  ;;  %v9675_v6 = vld [vmem:[#allocation155_spill] sm:$0xff]  ;;  %v9676_v15 = vld [vmem:[#allocation30_spill] sm:$0xff] }
 0x344   : > { %9669 = vst [vmem:[#allocation35_spill] sm:$0xff] %v8351_v28  ;;  %v3251_v34 = vsub.f32 %v9670_v13, %v8329_v8  ;;  %v8359_v41 = vpop.eup %5605  ;;  %5625 = vpow2.f32 %v3299_v43  ;;  %5408 = vmatprep.subr.bf16.mxu0 %v9214_v16  ;;  %v3305_v38 = vmul.f32 1.442695, %v3137_v4  ;;  %v3121_v4 = vsub.f32 %v9680_v14, %v8309_v1  ;;  %v9724_v28 = vld [vmem:[#allocation37_spill] sm:$0xff] }
 0x345   : > { %v8357_v52 = vpop.permute.xlu1 %3090  ;;  %9671 = vst [vmem:[#allocation144_spill] sm:$0xff] %v8359_v41  ;;  %v3341_v27 = vmul.f32 1.442695, %v3155_v18  ;;  %v5608_v61 = vpop.eup %5607  ;;  %5627 = vpow2.f32 %v3275_v37  ;;  %v3405_v3 = vmul.f32 1.442695, %v3187_v33 }
 0x346   : > { %v5610_v56 = vpop.eup %5609  ;;  %5629 = vpow2.f32 %v3301_v47  ;;  %v3469_v42 = vmul.f32 1.442695, %v3219_v32  ;;  %v3156_v53 = vsub.f32 %v9674_v10, %v8357_v52  ;;  %v3533_v43 = vmul.f32 1.442695, %v3251_v34  ;;  %v9677_v47 = vld [vmem:[#allocation164_spill] sm:$0xff] }
 0x347   : > { %v5612_v46 = vpop.eup %5611  ;;  %v5206_v20 = vpack.c.bf16 %v5610_v56, %v5608_v61  ;;  %5631 = vpow2.f32 %v3303_v39  ;;  %v3188_v18 = vsub.f32 %v9675_v6, %v8357_v52  ;;  %v3220_v33 = vsub.f32 %v9676_v15, %v8357_v52  ;;  %v9682_v6 = vld [vmem:[#allocation19_spill] sm:$0xff] }
 0x348   : > { %v8372_v37 = vpop.eup %5613  ;;  %5633 = vpow2.f32 %v3341_v27  ;;  %v3252_v57 = vsub.f32 %v9677_v47, %v8357_v52  ;;  %v3343_v39 = vmul.f32 1.442695, %v3156_v53  ;;  %v3139_v56 = vsub.f32 %v9681_v30, %v8329_v8 }
 0x349   : > { %v8376_v23 = vpop.eup %5615  ;;  %5208 = vmatprep.subr.msk.bf16.mxu1 %vm8211_vm2, %v5206_v20  ;;  %5635 = vpow2.f32 %v3405_v3  ;;  %v3407_v61 = vmul.f32 1.442695, %v3188_v18  ;;  %v3471_v12 = vmul.f32 1.442695, %v3220_v33  ;;  %v3006_v20 = vpop.permute.xlu0 %3005  ;;  %v3140_v15 = vsub.f32 %v9682_v6, %v8357_v52 }
 0x34a   : > { %v8382_v32 = vpop.eup %5617  ;;  %5211 = vmatpush3.bf16.xpose.msk.msra.mxu1 %vm8211_vm2, %v5209_v62  ;;  %5637 = vpow2.f32 %v3469_v42  ;;  %v3535_v53 = vmul.f32 1.442695, %v3252_v57  ;;  %v3273_v47 = vmul.f32 1.442695, %v3121_v4 }
 0x34b   : > { %9678 = vst [vmem:[#allocation75_spill] sm:$0xff] %v8382_v32  ;;  %v8390_v27 = vpop.eup %5619  ;;  %5639 = vpow2.f32 %v3533_v43  ;;  %v5215_v43 = vpack.c.bf16 %v8322_v51, %v8282_v49  ;;  %v3011_v18 = vpop.permute.xlu1 %3010  ;;  %v3309_v49 = vmul.f32 1.442695, %v3139_v56  ;;  %v3311_v4 = vmul.f32 1.442695, %v3140_v15  ;;  %v9687_v56 = vld [vmem:[#allocation110_spill] sm:$0xff] }
 0x34c   : > { %9679 = vst [vmem:[#allocation16_spill] sm:$0xff] %v8390_v27  ;;  %v5622_v3 = vpop.eup %5621  ;;  %5641 = vpow2.f32 %v3305_v38  ;;  %v9693_v38 = vld [vmem:[#allocation42_spill] sm:$0xff] }
 0x34d   : > { %v5624_v42 = vpop.eup %5623  ;;  %5643 = vpow2.f32 %v3307_v44  ;;  %v5409_v10 = vpack.c.bf16 %v5622_v3, %v5612_v46  ;;  %v9683_v44 = vld [vmem:[#allocation12_spill] sm:$0xff] }
 0x34e   : > { %v5626_v1 = vpop.eup %5625  ;;  %5645 = vpow2.f32 %v3343_v39  ;;  %v3123_v57 = vsub.f32 %v9683_v44, %v3006_v20  ;;  %v9684_v39 = vld [vmem:[#allocation39_spill] sm:$0xff]  ;;  %v3166_v20 = vsub.f32 %v9687_v56, %v8204_v26 }
 0x34f   : > { %v8404_v33 = vpop.eup %5627  ;;  %v5212_v14 = vpack.c.bf16 %v5626_v1, %v5624_v42  ;;  %5411 = vmatpush3.bf16.xpose.msk.msra.mxu0 %vm8211_vm2, %v5409_v10  ;;  %5647 = vpow2.f32 %v3407_v61  ;;  %v3124_v3 = vsub.f32 %v9684_v39, %v3011_v18 }
 0x350   : > { %v5630_v46 = vpop.eup %5629  ;;  %5649 = vpow2.f32 %v3471_v12  ;;  %5412 = vmatprep.subr.bf16.mxu0 %v9214_v16  ;;  %v9685_v12 = vld [vmem:[#allocation108_spill] sm:$0xff]  ;;  %v3277_v15 = vmul.f32 1.442695, %v3123_v57 }
 0x351   : > { %v5632_v51 = vpop.eup %5631  ;;  %5214 = vmatprep.subr.msk.bf16.mxu1 %vm8211_vm2, %v5212_v14  ;;  %5651 = vpow2.f32 %v3535_v53  ;;  %v3165_v42 = vsub.f32 %v9685_v12, %v8193_v22  ;;  %v9688_v53 = vld [vmem:[#allocation123_spill] sm:$0xff]  ;;  %v3279_v14 = vmul.f32 1.442695, %v3124_v3  ;;  %v9691_v12 = vld [vmem:[#allocation26_spill] sm:$0xff] }
 0x352   : > { %v8413_v30 = vpop.eup %5633  ;;  %5217 = vmatpush3.bf16.xpose.msk.msra.mxu1 %vm8211_vm2, %v5215_v43  ;;  %v5218_v61 = vpack.c.bf16 %v5632_v51, %v5630_v46  ;;  %5653 = vpow2.f32 %v3273_v47  ;;  %v3167_v6 = vsub.f32 %v9688_v53, %v8219_v63  ;;  %v9690_v47 = vld [vmem:[#allocation125_spill] sm:$0xff]  ;;  %v5221_v51 = vpack.c.bf16 %v8372_v37, %v8331_v17  ;;  %v9692_v3 = vld [vmem:[#allocation38_spill] sm:$0xff] }
 0x353   : > { %v8419_v10 = vpop.eup %5635  ;;  %5655 = vpow2.f32 %v3309_v49  ;;  %v3168_v46 = vsub.f32 %v9690_v47, %v8239_v54  ;;  %v3361_v39 = vmul.f32 1.442695, %v3165_v42  ;;  %v3169_v56 = vsub.f32 %v9691_v12, %v8257_v50 }
 0x354   : > { %9686 = vst [vmem:[#allocation47_spill] sm:$0xff] %v8419_v10  ;;  %v8425_v1 = vpop.eup %5637  ;;  %5220 = vmatprep.subr.msk.bf16.mxu1 %vm8211_vm2, %v5218_v61  ;;  %5657 = vpow2.f32 %v3311_v4  ;;  %v3363_v61 = vmul.f32 1.442695, %v3166_v20  ;;  %v3365_v53 = vmul.f32 1.442695, %v3167_v6  ;;  %v3170_v4 = vsub.f32 %v9692_v3, %v8286_v5  ;;  %v9695_v20 = vld [vmem:[#allocation41_spill] sm:$0xff] }
 0x355   : > { %9689 = vst [vmem:[#allocation15_spill] sm:$0xff] %v8425_v1  ;;  %v5640_v18 = vpop.eup %5639  ;;  %5659 = vpow2.f32 %v3277_v15  ;;  %v3171_v17 = vsub.f32 %v9693_v38, %v8329_v8  ;;  %v3367_v12 = vmul.f32 1.442695, %v3168_v46  ;;  %v3172_v6 = vsub.f32 %v9695_v20, %v8357_v52  ;;  %v9698_v15 = vld [vmem:[#allocation92_spill] sm:$0xff]  ;;  %v9705_v46 = vld [vmem:[#allocation106_spill] sm:$0xff] }
 0x356   : > { %v5642_v44 = vpop.eup %5641  ;;  %5661 = vpow2.f32 %v3279_v14  ;;  %v3369_v38 = vmul.f32 1.442695, %v3169_v56  ;;  %v3371_v14 = vmul.f32 1.442695, %v3170_v4  ;;  %v3146_v34 = vsub.f32 %v9698_v15, %v8175_v29 }
 0x357   : > { %v5644_v49 = vpop.eup %5643  ;;  %5663 = vpow2.f32 %v3361_v39  ;;  %v3373_v20 = vmul.f32 1.442695, %v3171_v17  ;;  %v3375_v56 = vmul.f32 1.442695, %v3172_v6 }
 0x358   : > { %v8441_v43 = vpop.eup %5645  ;;  %v5224_v47 = vpack.c.bf16 %v5644_v49, %v5642_v44  ;;  %5665 = vpow2.f32 %v3363_v61  ;;  %v3323_v15 = vmul.f32 1.442695, %v3146_v34 }
 0x359   : > { %v8447_v42 = vpop.eup %5647  ;;  %5667 = vpow2.f32 %v3365_v53 }
 0x35a   : > { %9694 = vst [vmem:[#allocation51_spill] sm:$0xff] %v8447_v42  ;;  %v8453_v57 = vpop.eup %5649  ;;  %5223 = vmatpush3.bf16.xpose.msk.msra.mxu1 %vm8211_vm2, %v5221_v51  ;;  %v9697_v51 = vld [vmem:[#allocation88_spill] sm:$0xff]  ;;  %5669 = vpow2.f32 %v3367_v12  ;;  %v9723_v42 = vld [vmem:[#allocation65_spill] sm:$0xff] }
 0x35b   : > { %9696 = vst [vmem:[#allocation137_spill] sm:$0xff] %v8453_v57  ;;  %v5652_v44 = vpop.eup %5651  ;;  %5226 = vmatprep.subr.msk.bf16.mxu1 %vm8211_vm2, %v5224_v47  ;;  %v3145_v39 = vsub.f32 %v9697_v51, %v8171_v48  ;;  %5671 = vpow2.f32 %v3369_v38  ;;  %v9701_v38 = vld [vmem:[#allocation161_spill] sm:$0xff] }
 0x35c   : > { %v5413_v49 = vpack.c.bf16 %v5652_v44, %v5640_v18  ;;  %v5654_v37 = vpop.eup %5653  ;;  %v9699_v18 = vld [vmem:[#allocation95_spill] sm:$0xff]  ;;  %5673 = vpow2.f32 %v3371_v14 }
 0x35d   : > { %v5656_v62 = vpop.eup %5655  ;;  %v5227_v47 = vpack.c.bf16 %v8404_v33, %v5654_v37  ;;  %v3161_v53 = vsub.f32 %v9699_v18, %v8171_v48  ;;  %5675 = vpow2.f32 %v3373_v20  ;;  %v3321_v17 = vmul.f32 1.442695, %v3145_v39  ;;  %v9700_v33 = vld [vmem:[#allocation66_spill] sm:$0xff] }
 0x35e   : > { %5415 = vmatpush3.bf16.xpose.msk.msra.mxu0 %vm8211_vm2, %v5413_v49  ;;  %v5658_v61 = vpop.eup %5657  ;;  %5677 = vpow2.f32 %v3375_v56  ;;  %v9702_v20 = vld [vmem:[#allocation50_spill] sm:$0xff] }
 0x35f   : > { %5416 = vmatprep.subr.bf16.mxu0 %v9214_v16  ;;  %v5230_v4 = vpack.c.bf16 %v5658_v61, %v5656_v62  ;;  %v5660_v6 = vpop.eup %5659  ;;  %v3353_v62 = vmul.f32 1.442695, %v3161_v53  ;;  %5679 = vpow2.f32 %v3321_v17  ;;  %v9703_v61 = vld [vmem:[#allocation21_spill] sm:$0xff]  ;;  %v9706_v17 = vld [vmem:[#allocation44_spill] sm:$0xff] }
 0x360   : > { %v5662_v49 = vpop.eup %5661  ;;  %5681 = vpow2.f32 %v3323_v15 }
 0x361   : > { %v8483_v14 = vpop.eup %5663  ;;  %v5233_v53 = vpack.c.bf16 %v5662_v49, %v5660_v6  ;;  %5683 = vpow2.f32 %v3353_v62  ;;  %v9708_v6 = vld [vmem:[#allocation22_spill] sm:$0xff] }
 0x362   : > { %5229 = vmatpush3.bf16.xpose.msk.msra.mxu1 %vm8211_vm2, %v5227_v47  ;;  %v8489_v56 = vpop.eup %5665 }
 0x363   : > { %5232 = vmatprep.subr.msk.bf16.mxu1 %vm8211_vm2, %v5230_v4  ;;  %v8495_v4 = vpop.eup %5667 }
 0x366   : > { %v8473_v12 = vpop.permute.xlu0 %3095 }
 0x367   : > { %v3157_v37 = vsub.f32 %v9700_v33, %v8473_v12  ;;  %v3189_v44 = vsub.f32 %v9701_v38, %v8473_v12  ;;  %v3253_v51 = vsub.f32 %v9702_v20, %v8473_v12  ;;  %v9704_v33 = vld [vmem:[#allocation162_spill] sm:$0xff] }
 0x369   : > { %v3345_v34 = vmul.f32 1.442695, %v3157_v37  ;;  %v8487_v39 = vpop.permute.xlu1 %3100  ;;  %v3409_v47 = vmul.f32 1.442695, %v3189_v44  ;;  %v8499_v37 = vpop.eup %5669  ;;  %v3141_v44 = vsub.f32 %v9706_v17, %v8473_v12  ;;  %v9710_v17 = vld [vmem:[#allocation131_spill] sm:$0xff] }
 0x36a   : > { %v3158_v18 = vsub.f32 %v9703_v61, %v8487_v39  ;;  %v3190_v38 = vsub.f32 %v9704_v33, %v8487_v39  ;;  %v3254_v20 = vsub.f32 %v9705_v46, %v8487_v39  ;;  %v8503_v61 = vpop.eup %5671  ;;  %v3537_v33 = vmul.f32 1.442695, %v3253_v51  ;;  %5235 = vmatpush3.bf16.xpose.msk.msra.mxu1 %vm8211_vm2, %v5233_v53  ;;  %v9712_v53 = vld [vmem:[#allocation69_spill] sm:$0xff]  ;;  %v9713_v51 = vld [vmem:[#allocation23_spill] sm:$0xff] }
 0x36b   : > { %5685 = vpow2.f32 %v3345_v34  ;;  %v3142_v15 = vsub.f32 %v9708_v6, %v8487_v39  ;;  %v8508_v49 = vpop.eup %5673  ;;  %v9709_v34 = vld [vmem:[#allocation29_spill] sm:$0xff]  ;;  %v3221_v57 = vsub.f32 %v9713_v51, %v8473_v12 }
 0x36c   : > { %v3347_v3 = vmul.f32 1.442695, %v3158_v18  ;;  %v3411_v13 = vmul.f32 1.442695, %v3190_v38  ;;  %v3016_v0 = vpop.permute.xlu0 %3015  ;;  %5687 = vpow2.f32 %v3409_v47  ;;  %v3539_v46 = vmul.f32 1.442695, %v3254_v20  ;;  %v8514_v62 = vpop.eup %5675 }
 0x36d   : > { %v3125_v16 = vsub.f32 %v9707_v11, %v3016_v0  ;;  %v3173_v47 = vsub.f32 %v9709_v34, %v8473_v12  ;;  %v8522_v20 = vpop.eup %5677  ;;  %v9711_v38 = vld [vmem:[#allocation91_spill] sm:$0xff]  ;;  %v3315_v41 = vmul.f32 1.442695, %v3142_v15  ;;  %v3473_v27 = vmul.f32 1.442695, %v3221_v57 }
 0x36e   : > { %5689 = vpow2.f32 %v3347_v3  ;;  %v3174_v18 = vsub.f32 %v9711_v38, %v8487_v39  ;;  %v3222_v3 = vsub.f32 %v9712_v53, %v8487_v39 }
 0x36f   : > { %v3281_v11 = vmul.f32 1.442695, %v3125_v16  ;;  %v3021_v0 = vpop.permute.xlu1 %3020  ;;  %5691 = vpow2.f32 %v3411_v13  ;;  %v3313_v16 = vmul.f32 1.442695, %v3141_v44  ;;  %v3377_v13 = vmul.f32 1.442695, %v3173_v47 }
 0x370   : > { %v3126_v6 = vsub.f32 %v9710_v17, %v3021_v0  ;;  %5693 = vpow2.f32 %v3537_v33  ;;  %v8533_v0 = vpop.eup %5679  ;;  %v9714_v33 = vld [vmem:[#allocation96_spill] sm:$0xff]  ;;  %v3379_v17 = vmul.f32 1.442695, %v3174_v18  ;;  %v3475_v44 = vmul.f32 1.442695, %v3222_v3 }
 0x371   : > { %5695 = vpow2.f32 %v3539_v46  ;;  %v3162_v38 = vsub.f32 %v9714_v33, %v8175_v29  ;;  %v8537_v53 = vpop.eup %5681 }
 0x372   : > { %v3283_v34 = vmul.f32 1.442695, %v3126_v6  ;;  %5697 = vpow2.f32 %v3281_v11  ;;  %v8539_v1 = vpop.eup %5683 }
 0x373   : > { %v3355_v11 = vmul.f32 1.442695, %v3162_v38  ;;  %v9722_v38 = vld [vmem:[#allocation159_spill] sm:$0xff] }
 0x374   : > { %5699 = vpow2.f32 %v3283_v34 }
 0x375   : > { %5701 = vpow2.f32 %v3313_v16  ;;  %v8541_v46 = vpop.eup %5685  ;;  %v9720_v16 = vld [vmem:[#allocation17_spill] sm:$0xff] }
 0x376   : > { %5703 = vpow2.f32 %v3315_v41  ;;  %9715 = vst [vmem:[#allocation141_spill] sm:$0xff] %v8541_v46  ;;  %v8543_v15 = vpop.eup %5687  ;;  %v9719_v41 = vld [vmem:[#allocation24_spill] sm:$0xff] }
 0x377   : > { %5705 = vpow2.f32 %v3377_v13  ;;  %9716 = vst [vmem:[#allocation67_spill] sm:$0xff] %v8543_v15  ;;  %v9721_v13 = vld [vmem:[#allocation124_spill] sm:$0xff] }
 0x378   : > { %5707 = vpow2.f32 %v3379_v17  ;;  %v8545_v51 = vpop.eup %5689 }
 0x379   : > { %9717 = vst [vmem:[#allocation72_spill] sm:$0xff] %v8545_v51  ;;  %5709 = vpow2.f32 %v3475_v44  ;;  %v8547_v47 = vpop.eup %5691 }
 0x37a   : > { %9718 = vst [vmem:[#allocation101_spill] sm:$0xff] %v8547_v47  ;;  %5711 = vpow2.f32 %v3473_v27  ;;  %v8549_v18 = vpop.permute.xlu0 %3105  ;;  %v5694_v57 = vpop.eup %5693 }
 0x37b   : > { %v3159_v3 = vsub.f32 %v9719_v41, %v8549_v18  ;;  %v3191_v34 = vsub.f32 %v9720_v16, %v8549_v18  ;;  %v3223_v33 = vsub.f32 %v9721_v13, %v8549_v18  ;;  %v3255_v17 = vsub.f32 %v9722_v38, %v8549_v18  ;;  %v5696_v44 = vpop.eup %5695 }
 0x37c   : > { %5713 = vpow2.f32 %v3355_v11  ;;  %v5698_v59 = vpop.eup %5697  ;;  %v5417_v9 = vpack.c.bf16 %v5696_v44, %v5694_v57  ;;  %v9725_v11 = vld [vmem:[#allocation133_spill] sm:$0xff]  ;;  %v9726_v57 = vld [vmem:[#allocation40_spill] sm:$0xff] }
 0x37d   : > { %v3349_v6 = vmul.f32 1.442695, %v3159_v3  ;;  %v3413_v35 = vmul.f32 1.442695, %v3191_v34  ;;  %v3477_v2 = vmul.f32 1.442695, %v3223_v33  ;;  %v8563_v41 = vpop.permute.xlu1 %3110 }
 0x37e   : > { %v5700_v10 = vpop.eup %5699  ;;  %v3541_v16 = vmul.f32 1.442695, %v3255_v17  ;;  %v3160_v13 = vsub.f32 %v9723_v42, %v8563_v41  ;;  %v3192_v38 = vsub.f32 %v9724_v28, %v8563_v41  ;;  %v3224_v32 = vsub.f32 %v9725_v11, %v8563_v41  ;;  %v3026_v19 = vpop.permute.xlu0 %3025  ;;  %5419 = vmatpush3.bf16.xpose.msk.msra.mxu0 %vm8211_vm2, %v5417_v9  ;;  %v9727_v34 = vld [vmem:[#allocation138_spill] sm:$0xff]  ;;  %v9730_v9 = vld [vmem:[#allocation11_spill] sm:$0xff] }
 0x37f   : > { %v5702_v27 = vpop.eup %5701  ;;  %5715 = vpow2.f32 %v3349_v6  ;;  %v3256_v3 = vsub.f32 %v9726_v57, %v8563_v41  ;;  %v3127_v33 = vsub.f32 %v9727_v34, %v3026_v19  ;;  %v5239_v15 = vpack.c.bf16 %v5700_v10, %v5698_v59  ;;  %v9731_v57 = vld [vmem:[#allocation58_spill] sm:$0xff] }
 0x380   : > { %v5704_v17 = vpop.eup %5703  ;;  %5717 = vpow2.f32 %v3413_v35  ;;  %v3351_v42 = vmul.f32 1.442695, %v3160_v13  ;;  %v3415_v44 = vmul.f32 1.442695, %v3192_v38  ;;  %v9728_v28 = vmov 0.0|0.0   ;;  %v9732_v13 = vld [vmem:[#allocation43_spill] sm:$0xff] }
 0x381   : > { %5420 = vmatprep.subr.bf16.mxu0 %v9728_v28  ;;  %v8577_v47 = vpop.eup %5705  ;;  %5719 = vpow2.f32 %v3477_v2  ;;  %v5236_v11 = vpack.c.bf16 %v5704_v17, %v5702_v27  ;;  %v3479_v6 = vmul.f32 1.442695, %v3224_v32  ;;  %v3031_v36 = vpop.permute.xlu1 %3030  ;;  %v3143_v31 = vsub.f32 %v9730_v9, %v8549_v18  ;;  %v9734_v32 = vld [vmem:[#allocation99_spill] sm:$0xff]  ;;  %v9738_v9 = vld [vmem:[#allocation129_spill] sm:$0xff] }
 0x382   : > { %9729 = vst [vmem:[#allocation77_spill] sm:$0xff] %v8577_v47  ;;  %v8581_v40 = vpop.eup %5707  ;;  %5721 = vpow2.f32 %v3541_v16  ;;  %v3543_v19 = vmul.f32 1.442695, %v3256_v3  ;;  %v3128_v35 = vsub.f32 %v9731_v57, %v3031_v36  ;;  %v3144_v59 = vsub.f32 %v9732_v13, %v8563_v41  ;;  %v9736_v3 = vld [vmem:[#allocation100_spill] sm:$0xff] }
 0x383   : > { %v8586_v10 = vpop.eup %5709  ;;  %5238 = vmatprep.subr.msk.bf16.mxu1 %vm8211_vm2, %v5236_v11  ;;  %5723 = vpow2.f32 %v3351_v42  ;;  %v3285_v2 = vmul.f32 1.442695, %v3127_v33  ;;  %v3163_v27 = vsub.f32 %v9734_v32, %v8179_v45  ;;  %v3164_v34 = vsub.f32 %v9736_v3, %v8185_v21  ;;  %v9737_v33 = vld [vmem:[#allocation79_spill] sm:$0xff] }
 0x384   : > { %9733 = vst [vmem:[#allocation102_spill] sm:$0xff] %v8586_v10  ;;  %v8594_v16 = vpop.eup %5711  ;;  %5725 = vpow2.f32 %v3415_v44  ;;  %5241 = vmatpush3.bf16.xpose.msk.msra.mxu1 %vm8211_vm2, %v5239_v15  ;;  %v3287_v36 = vmul.f32 1.442695, %v3128_v35  ;;  %v3317_v17 = vmul.f32 1.442695, %v3143_v31  ;;  %v3197_v42 = vsub.f32 %v9737_v33, %v8193_v22  ;;  %v9739_v35 = vld [vmem:[#allocation127_spill] sm:$0xff] }
 0x385   : > { %9735 = vst [vmem:[#allocation80_spill] sm:$0xff] %v8594_v16  ;;  %5727 = vpow2.f32 %v3479_v6  ;;  %v3319_v11 = vmul.f32 1.442695, %v3144_v59  ;;  %v3198_v57 = vsub.f32 %v9738_v9, %v8204_v26  ;;  %v3357_v15 = vmul.f32 1.442695, %v3163_v27  ;;  %v9740_v6 = vld [vmem:[#allocation128_spill] sm:$0xff] }
 0x386   : > { %v8602_v28 = vpop.eup %5713  ;;  %5729 = vpow2.f32 %v3543_v19  ;;  %v3199_v13 = vsub.f32 %v9739_v35, %v8219_v63  ;;  %v3359_v31 = vmul.f32 1.442695, %v3164_v34  ;;  %v3200_v32 = vsub.f32 %v9740_v6, %v8239_v54  ;;  %v9742_v59 = vld [vmem:[#allocation140_spill] sm:$0xff]  ;;  %v9744_v27 = vld [vmem:[#allocation142_spill] sm:$0xff] }
 0x387   : > { %5731 = vpow2.f32 %v3285_v2  ;;  %v3425_v19 = vmul.f32 1.442695, %v3197_v42  ;;  %v3201_v33 = vsub.f32 %v9742_v59, %v8257_v50  ;;  %v3427_v2 = vmul.f32 1.442695, %v3198_v57  ;;  %v9746_v34 = vld [vmem:[#allocation158_spill] sm:$0xff]  ;;  %v9747_v42 = vld [vmem:[#allocation160_spill] sm:$0xff] }
 0x388   : > { %5733 = vpow2.f32 %v3287_v36  ;;  %v3202_v44 = vsub.f32 %v9744_v27, %v8286_v5  ;;  %v3429_v36 = vmul.f32 1.442695, %v3199_v13  ;;  %v3203_v6 = vsub.f32 %v9746_v34, %v8329_v8  ;;  %v9749_v57 = vld [vmem:[#allocation165_spill] sm:$0xff] }
 0x389   : > { %v8612_v3 = vpop.eup %5715  ;;  %5735 = vpow2.f32 %v3317_v17  ;;  %v3431_v17 = vmul.f32 1.442695, %v3200_v32  ;;  %v3204_v59 = vsub.f32 %v9747_v42, %v8357_v52  ;;  %v3205_v27 = vsub.f32 %v9749_v57, %v8473_v12 }
 0x38a   : > { %9741 = vst [vmem:[#allocation115_spill] sm:$0xff] %v8612_v3  ;;  %v8616_v9 = vpop.eup %5717  ;;  %5737 = vpow2.f32 %v3319_v11  ;;  %v3433_v11 = vmul.f32 1.442695, %v3201_v33  ;;  %v3435_v13 = vmul.f32 1.442695, %v3202_v44  ;;  %v9754_v3 = vld [vmem:[#allocation98_spill] sm:$0xff] }
 0x38b   : > { %9743 = vst [vmem:[#allocation105_spill] sm:$0xff] %v8616_v9  ;;  %v8620_v35 = vpop.eup %5719  ;;  %5739 = vpow2.f32 %v3357_v15  ;;  %v3437_v42 = vmul.f32 1.442695, %v3203_v6  ;;  %v3439_v51 = vmul.f32 1.442695, %v3204_v59  ;;  %v9753_v15 = vld [vmem:[#allocation109_spill] sm:$0xff] }
 0x38c   : > { %9745 = vst [vmem:[#allocation117_spill] sm:$0xff] %v8620_v35  ;;  %v5722_v38 = vpop.eup %5721  ;;  %5741 = vpow2.f32 %v3359_v31  ;;  %v9750_v31 = vld [vmem:[#allocation84_spill] sm:$0xff] }
 0x38d   : > { %v8626_v16 = vpop.eup %5723  ;;  %5743 = vpow2.f32 %v3425_v19  ;;  %v3206_v32 = vsub.f32 %v9750_v31, %v8487_v39  ;;  %v9752_v19 = vld [vmem:[#allocation49_spill] sm:$0xff]  ;;  %v3148_v31 = vsub.f32 %v9754_v3, %v8185_v21 }
 0x38e   : > { %9748 = vst [vmem:[#allocation82_spill] sm:$0xff] %v8626_v16  ;;  %v8630_v10 = vpop.eup %5725  ;;  %5745 = vpow2.f32 %v3427_v2  ;;  %v3207_v33 = vsub.f32 %v9752_v19, %v8549_v18  ;;  %v3208_v2 = vsub.f32 %v9753_v15, %v8563_v41 }
 0x38f   : > { %v8636_v34 = vpop.eup %5727  ;;  %5747 = vpow2.f32 %v3429_v36  ;;  %v3441_v36 = vmul.f32 1.442695, %v3205_v27  ;;  %v3443_v47 = vmul.f32 1.442695, %v3206_v32 }
 0x390   : > { %9751 = vst [vmem:[#allocation151_spill] sm:$0xff] %v8636_v34  ;;  %v5730_v46 = vpop.eup %5729  ;;  %5749 = vpow2.f32 %v3431_v17  ;;  %v9755_v17 = vld [vmem:[#allocation97_spill] sm:$0xff]  ;;  %v3445_v15 = vmul.f32 1.442695, %v3207_v33 }
 0x391   : > { %v5732_v44 = vpop.eup %5731  ;;  %v5421_v16 = vpack.c.bf16 %v5730_v46, %v5722_v38  ;;  %5751 = vpow2.f32 %v3433_v11  ;;  %v3147_v59 = vsub.f32 %v9755_v17, %v8179_v45  ;;  %v3447_v46 = vmul.f32 1.442695, %v3208_v2  ;;  %v9757_v17 = vld [vmem:[#allocation147_spill] sm:$0xff] }
 0x392   : > { %v5734_v6 = vpop.eup %5733  ;;  %5753 = vpow2.f32 %v3435_v13  ;;  %v3327_v11 = vmul.f32 1.442695, %v3148_v31  ;;  %v9756_v13 = vld [vmem:[#allocation86_spill] sm:$0xff]  ;;  %v3230_v35 = vsub.f32 %v9757_v17, %v8204_v26  ;;  %v9761_v31 = vld [vmem:[#allocation149_spill] sm:$0xff] }
 0x393   : > { %v5736_v57 = vpop.eup %5735  ;;  %5423 = vmatpush3.bf16.xpose.msk.msra.mxu0 %vm8211_vm2, %v5421_v16  ;;  %5755 = vpow2.f32 %v3437_v42  ;;  %v5245_v3 = vpack.c.bf16 %v5734_v6, %v5732_v44  ;;  %v3229_v32 = vsub.f32 %v9756_v13, %v8193_v22  ;;  %v3325_v16 = vmul.f32 1.442695, %v3147_v59  ;;  %v9759_v22 = vld [vmem:[#allocation146_spill] sm:$0xff] }
 0x394   : > { %v5738_v9 = vpop.eup %5737  ;;  %5757 = vpow2.f32 %v3439_v51  ;;  %v5248_v51 = vpack.c.bf16 %v8602_v28, %v8539_v1  ;;  %v3232_v26 = vsub.f32 %v9759_v22, %v8239_v54  ;;  %v3491_v44 = vmul.f32 1.442695, %v3230_v35  ;;  %v9762_v54 = vld [vmem:[#allocation46_spill] sm:$0xff]  ;;  %v9763_v35 = vld [vmem:[#allocation45_spill] sm:$0xff] }
 0x395   : > { %v5740_v38 = vpop.eup %5739  ;;  %v5242_v27 = vpack.c.bf16 %v5738_v9, %v5736_v57  ;;  %5759 = vpow2.f32 %v3441_v36  ;;  %v9758_v9 = vld [vmem:[#allocation145_spill] sm:$0xff]  ;;  %v3489_v28 = vmul.f32 1.442695, %v3229_v32  ;;  %v3234_v36 = vsub.f32 %v9761_v31, %v8286_v5  ;;  %v9764_v32 = vld [vmem:[#allocation31_spill] sm:$0xff] }
 0x396   : > { %v5742_v19 = vpop.eup %5741  ;;  %5761 = vpow2.f32 %v3443_v47  ;;  %v3231_v42 = vsub.f32 %v9758_v9, %v8219_v63  ;;  %v9760_v63 = vld [vmem:[#allocation148_spill] sm:$0xff]  ;;  %v3235_v6 = vsub.f32 %v9762_v54, %v8329_v8  ;;  %v3237_v17 = vsub.f32 %v9764_v32, %v8473_v12 }
 0x397   : > { %v8656_v34 = vpop.eup %5743  ;;  %5244 = vmatprep.subr.msk.bf16.mxu1 %vm8211_vm2, %v5242_v27  ;;  %5763 = vpow2.f32 %v3445_v15  ;;  %v3233_v57 = vsub.f32 %v9760_v63, %v8257_v50  ;;  %v5251_v50 = vpack.c.bf16 %v8537_v53, %v8533_v0  ;;  %v3236_v27 = vsub.f32 %v9763_v35, %v8357_v52  ;;  %v9765_v0 = vld [vmem:[#allocation90_spill] sm:$0xff]  ;;  %v8709_v52 = vld [vmem:[%s9068_s3] sm:$0xff] }
 0x398   : > { %v8664_v33 = vpop.eup %5745  ;;  %5247 = vmatpush3.bf16.xpose.msk.msra.mxu1 %vm8211_vm2, %v5245_v3  ;;  %5765 = vpow2.f32 %v3447_v46  ;;  %v3493_v3 = vmul.f32 1.442695, %v3231_v42  ;;  %v3501_v9 = vmul.f32 1.442695, %v3235_v6  ;;  %v3238_v53 = vsub.f32 %v9765_v0, %v8487_v39 }
 0x399   : > { %v8670_v47 = vpop.eup %5747  ;;  %5767 = vpow2.f32 %v3327_v11  ;;  %5250 = vmatprep.subr.msk.bf16.mxu1 %vm8211_vm2, %v5248_v51  ;;  %v5308_v1 = vpack.c.bf16 %v8664_v33, %v8656_v34  ;;  %v3495_v11 = vmul.f32 1.442695, %v3232_v26  ;;  %v3497_v13 = vmul.f32 1.442695, %v3233_v57  ;;  %v9766_v26 = vld [vmem:[#allocation126_spill] sm:$0xff]  ;;  %v9800_v34 = vld [vmem:[#allocation75_spill] sm:$0xff] }
 0x39a   : > { %v8678_v2 = vpop.eup %5749  ;;  %5769 = vpow2.f32 %v3325_v16  ;;  %v3499_v51 = vmul.f32 1.442695, %v3234_v36  ;;  %v5254_v22 = vpack.c.bf16 %v5742_v19, %v5740_v38  ;;  %v3503_v39 = vmul.f32 1.442695, %v3236_v27  ;;  %v9767_v57 = vld [vmem:[#allocation134_spill] sm:$0xff]  ;;  %v9801_v33 = vld [vmem:[#allocation35_spill] sm:$0xff] }
 0x39b   : > { %v8684_v59 = vpop.eup %5751  ;;  %v5314_v15 = vpack.c.bf16 %v8678_v2, %v8670_v47  ;;  %5771 = vpow2.f32 %v3489_v28  ;;  %v3239_v28 = vsub.f32 %v9766_v26, %v8549_v18  ;;  %v3240_v19 = vsub.f32 %v9767_v57, %v8563_v41  ;;  %v9803_v47 = vld [vmem:[#allocation68_spill] sm:$0xff] }
 0x39c   : > { %v8688_v46 = vpop.eup %5753  ;;  %5773 = vpow2.f32 %v3491_v44  ;;  %v3505_v31 = vmul.f32 1.442695, %v3237_v17  ;;  %v3507_v54 = vmul.f32 1.442695, %v3238_v53  ;;  %v3226_v2 = vsub.f32 %v9803_v47, %v8175_v29  ;;  %v9819_v47 = vld [vmem:[#allocation13_spill] sm:$0xff] }
 0x39d   : > { %v8694_v5 = vpop.eup %5755  ;;  %v5320_v8 = vpack.c.bf16 %v8688_v46, %v8684_v59  ;;  %5775 = vpow2.f32 %v3493_v3  ;;  %v9804_v59 = vld [vmem:[#allocation63_spill] sm:$0xff] }
 0x39e   : > { %v8700_v16 = vpop.eup %5757  ;;  %5777 = vpow2.f32 %v3495_v11  ;;  %v3511_v11 = vmul.f32 1.442695, %v3240_v19  ;;  %v3483_v46 = vmul.f32 1.442695, %v3226_v2  ;;  %v9820_v2 = vld [vmem:[#allocation14_spill] sm:$0xff] }
 0x39f   : > { %v8704_v42 = vpop.eup %5759  ;;  %4897 = vmatmul.mubr.msk.f32.vlgmr.msra.gmra.mrb[0].mxu1 %vm2408_vm1, %v8709_v52  ;;  %v5326_v12 = vpack.c.bf16 %v8700_v16, %v8694_v5  ;;  %5779 = vpow2.f32 %v3497_v13  ;;  %v9809_v16 = vld [vmem:[#allocation78_spill] sm:$0xff] }
 0x3a0   : > { %v8717_v63 = vpop.eup %5761  ;;  %5253 = vmatpush3.bf16.xpose.msk.msra.mxu1 %vm8211_vm2, %v5251_v50  ;;  %4930 = vmatprep.mubr.msk.f32.mxu1 %vm2408_vm1, %v8709_v52  ;;  %5781 = vpow2.f32 %v3499_v51  ;;  %v3509_v50 = vmul.f32 1.442695, %v3239_v28  ;;  %v9768_v51 = vpack.c.bf16 %v8489_v56, %v8483_v14 }
 0x3a1   : > { %v8725_v38 = vpop.eup %5763  ;;  %5256 = vmatprep.subr.msk.bf16.mxu1 %vm8211_vm2, %v5254_v22  ;;  %v5332_v44 = vpack.c.bf16 %v8717_v63, %v8704_v42  ;;  %5783 = vpow2.f32 %v3501_v9 }
 0x3a2   : > { %v8731_v36 = vpop.eup %5765  ;;  %5785 = vpow2.f32 %v3503_v39 }
 0x3a3   : > { %v5768_v6 = vpop.eup %5767  ;;  %v5338_v3 = vpack.c.bf16 %v8731_v36, %v8725_v38  ;;  %5787 = vpow2.f32 %v3505_v31  ;;  %v9769_v31 = vpack.c.bf16 %v8278_v58, %v8250_v55  ;;  %v9771_v55 = vpack.c.bf16 %v8326_v60, %v8303_v7 }
 0x3a4   : > { %v5770_v35 = vpop.eup %5769  ;;  %5789 = vpow2.f32 %v3507_v54  ;;  %v9772_v58 = vpack.c.bf16 %v8508_v49, %v8503_v61  ;;  %v9776_v60 = vpack.c.bf16 %v8522_v20, %v8514_v62  ;;  %v9777_v61 = vld [vmem:[#allocation60_spill] sm:$0xff]  ;;  %v9780_v62 = vld [vmem:[#allocation114_spill] sm:$0xff] }
 0x3a5   : > { %v5257_v27 = vpack.c.bf16 %v5768_v6, %v5770_v35  ;;  %v8735_v32 = vpop.eup %5771  ;;  %5791 = vpow2.f32 %v3509_v50  ;;  %v9770_v6 = vpack.c.bf16 %v8499_v37, %v8495_v4  ;;  %v9773_v4 = vld [vmem:[#allocation87_spill] sm:$0xff]  ;;  %v3194_v49 = vsub.f32 %v9777_v61, %v8175_v29 }
 0x3a6   : > { %v8737_v13 = vpop.eup %5773  ;;  %5793 = vpow2.f32 %v3511_v11  ;;  %v3176_v37 = vsub.f32 %v9773_v4, %v8563_v41  ;;  %v3178_v20 = vsub.f32 %v9780_v62, %v8175_v29  ;;  %v9789_v62 = vld [vmem:[#allocation113_spill] sm:$0xff] }
 0x3a7   : > { %v8741_v17 = vpop.eup %5775  ;;  %v5356_v9 = vpack.c.bf16 %v8737_v13, %v8735_v32  ;;  %v9825_v32 = vld [vmem:[#allocation16_spill] sm:$0xff] }
 0x3a8   : > { %5259 = vmatpush3.bf16.xpose.msk.msra.mxu1 %vm8211_vm2, %v5257_v27  ;;  %v8750_v0 = vpop.eup %5777  ;;  %v9774_v27 = vld [vmem:[#allocation32_spill] sm:$0xff] }
 0x3a9   : > { %5262 = vmatprep.subr.msk.bf16.mxu1 %vm8211_vm2, %v9768_v51  ;;  %v8752_v53 = vpop.eup %5779  ;;  %v5362_v22 = vpack.c.bf16 %v8750_v0, %v8741_v17  ;;  %v3175_v51 = vsub.f32 %v9774_v27, %v8549_v18  ;;  %v9778_v18 = vld [vmem:[#allocation55_spill] sm:$0xff]  ;;  %v9826_v13 = vld [vmem:[#allocation144_spill] sm:$0xff]  ;;  %v9828_v17 = vld [vmem:[#allocation137_spill] sm:$0xff] }
 0x3aa   : > { %v8756_v26 = vpop.eup %5781  ;;  %v3193_v41 = vsub.f32 %v9778_v18, %v8171_v48  ;;  %v9786_v18 = vld [vmem:[#allocation72_spill] sm:$0xff]  ;;  %v9829_v0 = vld [vmem:[#allocation15_spill] sm:$0xff] }
 0x3ab   : > { %v8758_v28 = vpop.eup %5783  ;;  %v5368_v14 = vpack.c.bf16 %v8756_v26, %v8752_v53  ;;  %v3381_v7 = vmul.f32 1.442695, %v3175_v51  ;;  %v9784_v51 = vld [vmem:[#allocation112_spill] sm:$0xff]  ;;  %v9831_v53 = vld [vmem:[#allocation102_spill] sm:$0xff] }
 0x3ac   : > { %v8762_v56 = vpop.eup %5785  ;;  %v9832_v26 = vld [vmem:[#allocation80_spill] sm:$0xff] }
 0x3ad   : > { %v8764_v39 = vpop.eup %5787  ;;  %v5374_v57 = vpack.c.bf16 %v8762_v56, %v8758_v28  ;;  %v9834_v28 = vld [vmem:[#allocation151_spill] sm:$0xff]  ;;  %v9835_v56 = vld [vmem:[#allocation117_spill] sm:$0xff] }
 0x3ae   : > { %v8768_v19 = vpop.eup %5789 }
 0x3af   : > { %v8775_v54 = vpop.eup %5791  ;;  %v5380_v50 = vpack.c.bf16 %v8768_v19, %v8764_v39 }
 0x3b0   : > { %5265 = vmatpush3.bf16.xpose.msk.msra.mxu1 %vm8211_vm2, %v9769_v31  ;;  %v8784_v11 = vpop.eup %5793  ;;  %v3383_v31 = vmul.f32 1.442695, %v3176_v37  ;;  %v9783_v37 = vld [vmem:[#allocation74_spill] sm:$0xff] }
 0x3b1   : > { %5268 = vmatprep.subr.msk.bf16.mxu1 %vm8211_vm2, %v9770_v6  ;;  %v5386_v35 = vpack.c.bf16 %v8784_v11, %v8775_v54  ;;  %v9775_v6 = vpack.c.bf16 %v8376_v23, %v8347_v24  ;;  %v9779_v24 = vpack.c.bf16 %v8441_v43, %v8413_v30  ;;  %v3417_v23 = vmul.f32 1.442695, %v3193_v41  ;;  %v9787_v41 = vld [vmem:[#allocation141_spill] sm:$0xff] }
 0x3b2   : > { %5795 = vpow2.f32 %v3383_v31  ;;  %v3196_v27 = vsub.f32 %v9783_v37, %v8185_v21  ;;  %v3177_v30 = vsub.f32 %v9784_v51, %v8171_v48  ;;  %v9785_v31 = vld [vmem:[#allocation71_spill] sm:$0xff] }
 0x3b3   : > { %5797 = vpow2.f32 %v3381_v7  ;;  %v3387_v7 = vmul.f32 1.442695, %v3178_v20 }
 0x3b4   : > { %v3423_v61 = vmul.f32 1.442695, %v3196_v27 }
 0x3b8   : > { %5271 = vmatpush3.bf16.xpose.msk.msra.mxu1 %vm8211_vm2, %v9771_v55  ;;  %v3419_v55 = vmul.f32 1.442695, %v3194_v49  ;;  %v3385_v49 = vmul.f32 1.442695, %v3177_v30 }
 0x3b9   : > { %5274 = vmatprep.subr.msk.bf16.mxu1 %vm8211_vm2, %v9772_v58  ;;  %v9781_v58 = vld [vmem:[#allocation77_spill] sm:$0xff] }
 0x3ba   : > { %v9782_v4 = vpack.c.bf16 %v8581_v40, %v9781_v58  ;;  %5799 = vpow2.f32 %v3419_v55  ;;  %v3180_v58 = vsub.f32 %v9789_v62, %v8185_v21 }
 0x3bb   : > { %5801 = vpow2.f32 %v3417_v23  ;;  %v9790_v23 = vld [vmem:[#allocation111_spill] sm:$0xff] }
 0x3bc   : > { %v5796_v43 = vpop.eup %5795  ;;  %5803 = vpow2.f32 %v3387_v7  ;;  %v3179_v20 = vsub.f32 %v9790_v23, %v8179_v45  ;;  %v3391_v37 = vmul.f32 1.442695, %v3180_v58  ;;  %v9794_v58 = vld [vmem:[#allocation48_spill] sm:$0xff]  ;;  %v9795_v23 = vld [vmem:[#allocation25_spill] sm:$0xff] }
 0x3bd   : > { %5805 = vpow2.f32 %v3423_v61 }
 0x3be   : > { %5807 = vpow2.f32 %v3385_v49  ;;  %v3389_v51 = vmul.f32 1.442695, %v3179_v20  ;;  %v9796_v20 = vpack.c.bf16 %v9794_v58, %v9795_v23 }
 0x3c0   : > { %5277 = vmatpush3.bf16.xpose.msk.msra.mxu1 %vm8211_vm2, %v9775_v6  ;;  %v3195_v6 = vsub.f32 %v9785_v31, %v8179_v45  ;;  %v9792_v31 = vld [vmem:[#allocation115_spill] sm:$0xff] }
 0x3c1   : > { %5280 = vmatprep.subr.msk.bf16.mxu1 %vm8211_vm2, %v9776_v60  ;;  %v5798_v60 = vpop.eup %5797 }
 0x3c2   : > { %v5290_v40 = vpack.c.bf16 %v5796_v43, %v5798_v60  ;;  %v3421_v55 = vmul.f32 1.442695, %v3195_v6  ;;  %v9791_v43 = vld [vmem:[#allocation82_spill] sm:$0xff] }
 0x3c3   : > { %v9793_v6 = vpack.c.bf16 %v9791_v43, %v9792_v31  ;;  %v9808_v31 = vld [vmem:[#allocation64_spill] sm:$0xff] }
 0x3c4   : > { %5809 = vpow2.f32 %v3421_v55  ;;  %v3210_v5 = vsub.f32 %v9808_v31, %v8175_v29 }
 0x3c5   : > { %5811 = vpow2.f32 %v3391_v37  ;;  %v9798_v37 = vld [vmem:[#allocation52_spill] sm:$0xff] }
 0x3c6   : > { %5813 = vpow2.f32 %v3389_v51  ;;  %v9806_v51 = vld [vmem:[#allocation47_spill] sm:$0xff] }
 0x3c7   : > { %5815 = vpow2.f32 %v3483_v46  ;;  %v9823_v46 = vld [vmem:[#allocation33_spill] sm:$0xff] }
 0x3c8   : > { %5283 = vmatpush3.bf16.xpose.msk.msra.mxu1 %vm8211_vm2, %v9779_v24  ;;  %v9788_v24 = vpack.c.bf16 %v9786_v18, %v9787_v41  ;;  %v5903_v41 = vmov 0.0  }
 0x3c9   : > { %5286 = vmatprep.subr.msk.bf16.mxu1 %vm8211_vm2, %v9782_v4  ;;  %v5800_v4 = vpop.eup %5799  ;;  %5197 = vmatprep.mubr.msk.f32.mxu0 %vm5902_vm3, %v5903_v41  ;;  %v9813_v41 = vld [vmem:[#allocation67_spill] sm:$0xff] }
 0x3ca   : > { %v5802_v27 = vpop.eup %5801  ;;  %5198 = vmatmul.mubr.msk.f32.vlgmr.msra.gmra.mrb[144].mxu0 %vm2408_vm1, %v8709_v52 }
 0x3cb   : > { %v5296_v30 = vpack.c.bf16 %v5800_v4, %v5802_v27  ;;  %v5804_v7 = vpop.eup %5803  ;;  %v9797_v4 = vld [vmem:[#allocation143_spill] sm:$0xff] }
 0x3cc   : > { %v5806_v60 = vpop.eup %5805  ;;  %v9799_v27 = vpack.c.bf16 %v9797_v4, %v9798_v37  ;;  %v9817_v37 = vld [vmem:[#allocation105_spill] sm:$0xff] }
 0x3cd   : > { %v5808_v61 = vpop.eup %5807 }
 0x3ce   : > { %v5810_v49 = vpop.eup %5809 }
 0x3cf   : > { %v5302_v18 = vpack.c.bf16 %v5806_v60, %v5810_v49  ;;  %v9811_v60 = vld [vmem:[#allocation61_spill] sm:$0xff]  ;;  %v3451_v49 = vmul.f32 1.442695, %v3210_v5 }
 0x3d0   : > { %5289 = vmatpush3.bf16.xpose.msk.msra.mxu1 %vm8211_vm2, %v9788_v24  ;;  %v5812_v24 = vpop.eup %5811 }
 0x3d1   : > { %5292 = vmatprep.subr.msk.bf16.mxu1 %vm8211_vm2, %v5290_v40  ;;  %v5299_v40 = vpack.c.bf16 %v5804_v7, %v5808_v61  ;;  %v5814_v55 = vpop.eup %5813  ;;  %v3227_v61 = vsub.f32 %v9811_v60, %v8179_v45 }
 0x3d2   : > { %v5305_v62 = vpack.c.bf16 %v5812_v24, %v5814_v55 }
 0x3d3   : > { %v3485_v63 = vmul.f32 1.442695, %v3227_v61 }
 0x3d8   : > { %5295 = vmatpush3.bf16.xpose.msk.msra.mxu1 %vm8211_vm2, %v9793_v6  ;;  %v9810_v6 = vld [vmem:[#allocation59_spill] sm:$0xff] }
 0x3d9   : > { %5298 = vmatprep.subr.msk.bf16.mxu1 %vm8211_vm2, %v5296_v30  ;;  %v3209_v7 = vsub.f32 %v9810_v6, %v8171_v48 }
 0x3db   : > { %v3449_v29 = vmul.f32 1.442695, %v3209_v7 }
 0x3df   : > { %4931 = vmatmul.mubr.msk.f32.vlgmr.msra.gmra.mrb[2].mxu1 %vm2408_vm1, %v8709_v52 }
 0x3e0   : > { %5301 = vmatpush3.bf16.xpose.msk.msra.mxu1 %vm8211_vm2, %v5299_v40  ;;  %4964 = vmatprep.mubr.msk.f32.mxu1 %vm2408_vm1, %v8709_v52 }
 0x3e1   : > { %5304 = vmatprep.subr.msk.bf16.mxu1 %vm8211_vm2, %v5302_v18  ;;  %v9812_v18 = vld [vmem:[#allocation101_spill] sm:$0xff] }
 0x3e2   : > { %v9814_v42 = vpack.c.bf16 %v9812_v18, %v9813_v41 }
 0x3e8   : > { %5307 = vmatpush3.bf16.xpose.msk.msra.mxu1 %vm8211_vm2, %v5305_v62  ;;  %v5816_v62 = vpop.eup %5815 }
 0x3e9   : > { %5310 = vmatprep.subr.msk.bf16.mxu1 %vm8211_vm2, %v5308_v1  ;;  %v9802_v1 = vpack.c.bf16 %v9800_v34, %v9801_v33 }
 0x3f0   : > { %5313 = vmatpush3.bf16.xpose.msk.msra.mxu1 %vm8211_vm2, %v9796_v20 }
 0x3f1   : > { %5316 = vmatprep.subr.msk.bf16.mxu1 %vm8211_vm2, %v5314_v15  ;;  %v3225_v15 = vsub.f32 %v9804_v59, %v8171_v48  ;;  %v9816_v48 = vld [vmem:[#allocation73_spill] sm:$0xff]  ;;  %v9821_v59 = vpack.c.bf16 %v9819_v47, %v9820_v2 }
 0x3f2   : > { %v3211_v55 = vsub.f32 %v9816_v48, %v8179_v45 }
 0x3f3   : > { %v3481_v43 = vmul.f32 1.442695, %v3225_v15  ;;  %v9822_v15 = vld [vmem:[#allocation57_spill] sm:$0xff] }
 0x3f4   : > { %v3453_v20 = vmul.f32 1.442695, %v3211_v55 }
 0x3f5   : > { %5817 = vpow2.f32 %v3481_v43 }
 0x3f6   : > { %5819 = vpow2.f32 %v3451_v49 }
 0x3f8   : > { %5319 = vmatpush3.bf16.xpose.msk.msra.mxu1 %vm8211_vm2, %v9799_v27 }
 0x3f9   : > { %5322 = vmatprep.subr.msk.bf16.mxu1 %vm8211_vm2, %v5320_v8  ;;  %v9805_v8 = vld [vmem:[#allocation51_spill] sm:$0xff] }
 0x3fa   : > { %v9807_v30 = vpack.c.bf16 %v9805_v8, %v9806_v51  ;;  %v9824_v8 = vpack.c.bf16 %v9822_v15, %v9823_v46 }
 0x3ff   : > { %v5818_v23 = vpop.eup %5817 }
 0x400   : > { %5325 = vmatpush3.bf16.xpose.msk.msra.mxu1 %vm8211_vm2, %v9802_v1  ;;  %v5344_v4 = vpack.c.bf16 %v5816_v62, %v5818_v23  ;;  %v5820_v38 = vpop.eup %5819 }
 0x401   : > { %5328 = vmatprep.subr.msk.bf16.mxu1 %vm8211_vm2, %v5326_v12  ;;  %v3228_v12 = vsub.f32 %v9809_v16, %v8185_v21 }
 0x403   : > { %v3487_v40 = vmul.f32 1.442695, %v3228_v12 }
 0x405   : > { %5821 = vpow2.f32 %v3487_v40 }
 0x406   : > { %5823 = vpow2.f32 %v3449_v29 }
 0x407   : > { %5825 = vpow2.f32 %v3485_v63 }
 0x408   : > { %5331 = vmatpush3.bf16.xpose.msk.msra.mxu1 %vm8211_vm2, %v9807_v30 }
 0x409   : > { %5334 = vmatprep.subr.msk.bf16.mxu1 %vm8211_vm2, %v5332_v44  ;;  %v9815_v44 = vld [vmem:[#allocation76_spill] sm:$0xff] }
 0x40a   : > { %v3212_v24 = vsub.f32 %v9815_v44, %v8185_v21  ;;  %v9818_v21 = vpack.c.bf16 %v8630_v10, %v9817_v37 }
 0x40c   : > { %v3455_v58 = vmul.f32 1.442695, %v3212_v24 }
 0x40e   : > { %5827 = vpow2.f32 %v3455_v58 }
 0x40f   : > { %5829 = vpow2.f32 %v3453_v20  ;;  %v5822_v36 = vpop.eup %5821 }
 0x410   : > { %5337 = vmatpush3.bf16.xpose.msk.msra.mxu1 %vm8211_vm2, %v9814_v42  ;;  %v5824_v45 = vpop.eup %5823 }
 0x411   : > { %5340 = vmatprep.subr.msk.bf16.mxu1 %vm8211_vm2, %v5338_v3  ;;  %v5826_v3 = vpop.eup %5825  ;;  %v5347_v27 = vpack.c.bf16 %v5820_v38, %v5824_v45 }
 0x412   : > { %v5350_v34 = vpack.c.bf16 %v5822_v36, %v5826_v3 }
 0x418   : > { %5343 = vmatpush3.bf16.xpose.msk.msra.mxu1 %vm8211_vm2, %v9818_v21  ;;  %v5828_v10 = vpop.eup %5827 }
 0x419   : > { %5346 = vmatprep.subr.msk.bf16.mxu1 %vm8211_vm2, %v5344_v4  ;;  %v5830_v33 = vpop.eup %5829 }
 0x41a   : > { %v5353_v1 = vpack.c.bf16 %v5828_v10, %v5830_v33 }
 0x41f   : > { %4965 = vmatmul.mubr.msk.f32.vlgmr.msra.gmra.mrb[4].mxu1 %vm2408_vm1, %v8709_v52 }
 0x420   : > { %5349 = vmatpush3.bf16.xpose.msk.msra.mxu1 %vm8211_vm2, %v5347_v27  ;;  %4998 = vmatprep.mubr.msk.f32.mxu1 %vm2408_vm1, %v8709_v52 }
 0x421   : > { %5352 = vmatprep.subr.msk.bf16.mxu1 %vm8211_vm2, %v5350_v34 }
 0x428   : > { %5355 = vmatpush3.bf16.xpose.msk.msra.mxu1 %vm8211_vm2, %v5353_v1 }
 0x429   : > { %5358 = vmatprep.subr.msk.bf16.mxu1 %vm8211_vm2, %v5356_v9  ;;  %v9827_v9 = vpack.c.bf16 %v9825_v32, %v9826_v13 }
 0x430   : > { %5361 = vmatpush3.bf16.xpose.msk.msra.mxu1 %vm8211_vm2, %v9821_v59 }
 0x431   : > { %5364 = vmatprep.subr.msk.bf16.mxu1 %vm8211_vm2, %v5362_v22  ;;  %v9830_v22 = vpack.c.bf16 %v9828_v17, %v9829_v0 }
 0x438   : > { %5367 = vmatpush3.bf16.xpose.msk.msra.mxu1 %vm8211_vm2, %v9824_v8 }
 0x439   : > { %5370 = vmatprep.subr.msk.bf16.mxu1 %vm8211_vm2, %v5368_v14  ;;  %v9833_v14 = vpack.c.bf16 %v9831_v53, %v9832_v26 }
 0x440   : > { %5373 = vmatpush3.bf16.xpose.msk.msra.mxu1 %vm8211_vm2, %v9827_v9 }
 0x441   : > { %5376 = vmatprep.subr.msk.bf16.mxu1 %vm8211_vm2, %v5374_v57  ;;  %v9836_v57 = vpack.c.bf16 %v9834_v28, %v9835_v56 }
 0x448   : > { %5379 = vmatpush3.bf16.xpose.msk.msra.mxu1 %vm8211_vm2, %v9830_v22 }
 0x449   : > { %5382 = vmatprep.subr.msk.bf16.mxu1 %vm8211_vm2, %v5380_v50 }
 0x450   : > { %5385 = vmatpush3.bf16.xpose.msk.msra.mxu1 %vm8211_vm2, %v9833_v14 }
 0x451   : > { %5388 = vmatprep.subr.msk.bf16.mxu1 %vm8211_vm2, %v5386_v35 }
 0x458   : > { %5391 = vmatpush3.bf16.xpose.msk.msra.mxu1 %vm8211_vm2, %v9836_v57 }
 0x45f   : > { %4999 = vmatmul.mubr.msk.f32.vlgmr.msra.gmra.mrb[6].mxu1 %vm2408_vm1, %v8709_v52 }
 0x472   : > { %v4046_v39 = vpop.f32.mrb[0].mxu1 }
 0x473   : > { %v4048_v19 = vpop.f32.mrb[1].mxu1  ;;  %5831 = vrcp.f32 %v4046_v39 }
 0x47d   : > { %v5832_v48 = vpop.eup %5831 }
 0x47e   : > { %v4337_v62 = vrot.slane %v5832_v48, 7  ;;  %v4342_v58 = vrot.slane %v5832_v48, 6 }
 0x480   : > { %v4339_v23 = vmul.f32 %v4337_v62, %v4046_v39  ;;  %v4344_v20 = vmul.f32 %v4342_v58, %v4046_v39 }
 0x482   : > { %v4340_v37 = vmul.f32 32.0, %v4339_v23  ;;  %v4345_v21 = vmul.f32 32.0, %v4344_v20 }
 0x484   : > { %v4341_v34 = vadd.f32 16.0, %v4340_v37  ;;  %v4346_v10 = vadd.f32 16.0, %v4345_v21 }
 0x486   : > { %v4385_v59 = vrot.slane %v4341_v34, 1  ;;  %v4388_v15 = vrot.slane %v4346_v10, 1 }
 0x488   : > { %v4400_v17 = vsel %vm4399_vm4, %v4385_v59, %v4388_v15 }
 0x49d   : > { %v4330_v5 = vpop.f32.mrb[144].mxu0 }
 0x49e   : > { %v5199_v35 = vpop.f32.mrb[145].mxu0 }
 0x4b2   : > { %v4117_v50 = vpop.f32.mrb[2].mxu1 }
 0x4b3   : > { %v4347_v51 = vadd.f32 %v4117_v50, %v4048_v19  ;;  %v4348_v30 = vmul.f32 0.14285715, %v4117_v50  ;;  %v4119_v43 = vpop.f32.mrb[3].mxu1 }
 0x4b4   : > { %v4351_v31 = vmul.f32 0.2857143, %v4119_v43 }
 0x4b5   : > { %v4350_v54 = vadd.f32 %v4347_v51, %v4119_v43 }
 0x4b6   : > { %v4352_v11 = vadd.f32 %v4351_v31, %v4348_v30 }
 0x4f2   : > { %v4188_v16 = vpop.f32.mrb[4].mxu1 }
 0x4f3   : > { %v4353_v12 = vadd.f32 %v4350_v54, %v4188_v16  ;;  %v4354_v6 = vmul.f32 0.42857143, %v4188_v16  ;;  %v4190_v7 = vpop.f32.mrb[5].mxu1 }
 0x4f4   : > { %v4357_v25 = vmul.f32 0.5714286, %v4190_v7 }
 0x4f5   : > { %v4355_v60 = vadd.f32 %v4354_v6, %v4352_v11  ;;  %v4356_v61 = vadd.f32 %v4353_v12, %v4190_v7 }
 0x4f7   : > { %v4358_v49 = vadd.f32 %v4357_v25, %v4355_v60 }
 0x532   : > { %v4259_v52 = vpop.f32.mrb[6].mxu1 }
 0x533   : > { %v4359_v40 = vadd.f32 %v4356_v61, %v4259_v52  ;;  %v4360_v29 = vmul.f32 0.71428573, %v4259_v52  ;;  %v4261_v18 = vpop.f32.mrb[7].mxu1 }
 0x534   : > { %v4363_v41 = vmul.f32 0.85714287, %v4261_v18 }
 0x535   : > { %v4361_v42 = vadd.f32 %v4360_v29, %v4358_v49  ;;  %v4362_v63 = vadd.f32 %v4359_v40, %v4261_v18 }
 0x537   : > { %v4364_v44 = vadd.f32 %v4363_v41, %v4361_v42  ;;  %v4365_v24 = vadd.f32 %v4362_v63, %v4330_v5 }
 0x539   : > { %v4366_v55 = vadd.f32 %v4364_v44, %v4330_v5  ;;  %5833 = vrcp.f32 %v4365_v24 }
 0x543   : > { %v5834_v4 = vpop.eup %5833 }
 0x544   : > { %v4370_v38 = vrot.slane %v5834_v4, 7  ;;  %v4376_v36 = vrot.slane %v5834_v4, 6  ;;  %v4382_v45 = vmul.f32 %v5834_v4, %v4366_v55 }
 0x546   : > { %v4372_v3 = vmul.f32 %v4370_v38, %v4365_v24  ;;  %v4378_v27 = vmul.f32 %v4376_v36, %v4365_v24  ;;  %v4383_v32 = vmul.f32 2200.0, %v4382_v45 }
 0x548   : > { %v4373_v33 = vmul.f32 32.0, %v4372_v3  ;;  %v4379_v1 = vmul.f32 32.0, %v4378_v27  ;;  %v4397_v0 = vrot.slane %v4383_v32, 4 }
 0x54a   : > { %v4374_v47 = vadd.f32 16.0, %v4373_v33  ;;  %v4380_v2 = vadd.f32 16.0, %v4379_v1 }
 0x54c   : > { %v4375_v46 = vmul.f32 8.59375, %v4374_v47  ;;  %v4381_v8 = vmul.f32 8.59375, %v4380_v2 }
 0x54e   : > { %v4391_v13 = vrot.slane %v4375_v46, 7  ;;  %v4394_v9 = vrot.slane %v4381_v8, 7 }
 0x550   : > { %v4402_v22 = vsel %vm4401_vm5, %v4400_v17, %v4391_v13 }
 0x551   : > { %v4404_v53 = vsel %vm4403_vm6, %v4402_v22, %v4394_v9 }
 0x552   : > { %v4406_v26 = vsel %vm4405_vm7, %v4404_v53, %v4397_v0 }
 0x553   : > { %v4408_v14 = vsel %vm4407_vm8, %v4406_v26, 0.0 }
 0x554   : > { %4409 = vst [vmem:[%s190_s29] sm:$0xff] %v4408_v14 }
 0x555   : > { %5849 = shalt.err (!%p5846_p3)
}
 0x556   : > { %s5850_s12 = scalar_lea.hbm %s9021_s7, 128  ;;  %s5854_s20 = scalar_lea.hbm %s9069_s4, 256 }
 0x557   : > { %p5851_p4 = scmp.ne.s32.totalorder %s9021_s7, %s5850_s12  ;;  %p5855_p9 = scmp.lt.u32.totalorder %s9021_s7, %s9069_s4 }
 0x558   : > { %p5856_p10 = scmp.lt.u32.totalorder %s5854_s20, %s5850_s12  ;;  %p5858_p12 = scmp.lt.u32.totalorder %s5850_s12, %s9021_s7 }
 0x559   : > { %p5852_p7 = pnand %p5851_p4, %p5968_p5 }
 0x55a   : > { %p5857_p11 = por %p5856_p10, %p5855_p9 }
 0x55b   : > { %p5853_p8 = pneg %p5852_p7 }
 0x55c   : > { %p5859_p13 = por %p5858_p12, %p5857_p11 }
 0x55e   : > { %p5860_p0 = pnand %p5859_p13, %p5853_p8 }
 0x560   : > { %5863 = shalt.err (!%p5860_p0)
}
 0x561   : > { %5424 = dma.vmem_to_hbm [thread:$0]  (%p5968_p5), %s9023_s30, 128, %s9021_s7, %s4411_s19  }
 0x562 PF: > { %p5430_p1 = scmp.ge.s32.totalorder %s5898_s18, 2  ;;  %s4436_s27 = sand.u32 1, %s5886_s15  }
 0x563   : > { %s4437_s28 = scalar_lea.sflag [#allocation3], %s4436_s27 }
 0x564   : > { %p5427_p2 = pnand %p5430_p1, %p5972_p6 }
 0x566   : > { %5881 = dma.done.wait (!%p5427_p2), %s4437_s28, 128  }
 0x567   : > { %5883 = vsyncadd (!%p5427_p2), %s4437_s28, 4294967168  ;;  %p14_p3 = scmp.ge.s32.totalorder %s5955_s21, 4   ;;  %s9837_s15 = smov %s5890_s16 }
 0x568   : > { %s9838_s16 = smov %s5894_s17  ;;  %s9839_s17 = smov %s5966_s24 }
 0x569   : > { %s9840_s18 = smov %s5955_s21  ;;  %16 = sbr.rel (!%p14_p3) target bundleno = 3 (0x3), region = 71 }
 0x570   :  { %4442 = vsyncpa [#allocation3], 1 }
 0x571   :  { %4444 = vsyncpa [#allocation3 + $0x1], 1 }

</bundles_post_ra>
